<compile_context>
chip_gen: v6e
topology: v6e:2x2x1
jax: 0.10.0
libtpu: 0.0.40
codegen_flags: <defaults>
</compile_context>

<pallas_src>
import numpy as np
import jax
import jax.numpy as jnp
from jax.experimental import pallas as pl
from jax.experimental.pallas import tpu as pltpu


def class_block_kernel(x_ref, w1_ref, b1_ref, w2_ref, b2_ref, out_ref):
    """One batch tile: fused 1x1-conv(+folded BN)+ReLU, then the Linear classifier.

    x_ref  : (bm, C)        bfloat16  (already bf16 in HBM)
    w1_ref : (C, nb)        bfloat16  (BN scale folded into columns)
    b1_ref : (1, nb)        float32   (folded BN bias)
    w2_ref : (nb, cls_pad)  bfloat16  (classifier weight, lane-padded)
    b2_ref : (1, cls_pad)   float32
    out_ref: (bm, cls_pad)  float32
    """
    # ---- add_block: 1x1 conv (no bias) + BN (scale folded) + ReLU ----------
    h = jnp.dot(x_ref[...], w1_ref[...], preferred_element_type=jnp.float32)
    h = jnp.maximum(h + b1_ref[...], 0.0)

    # ---- classifier: Linear -------------------------------------------------
    logits = jnp.dot(h.astype(jnp.bfloat16), w2_ref[...],
                     preferred_element_type=jnp.float32)
    # TODO(synk): optionally emit bf16 logits (halves output writeback bytes on
    # mem-bound v5e/v6e) if downstream tolerates it.
    out_ref[...] = logits + b2_ref[...]


def _round_up(x, m):
    return (x + m - 1) // m * m


def _pick_block_m(n_rows, requested):
    """Largest batch tile that still leaves >= 2 grid steps (v7x megacore),
    capped at 1024 rows, rounded to the 8-sublane granule."""
    if requested is not None:
        bm = requested
    else:
        half = _round_up(pl.cdiv(n_rows, 2), 8)
        bm = max(128, min(1024, half))
    # Never make the tile (much) larger than the (sublane-rounded) batch.
    return max(8, min(bm, _round_up(n_rows, 8)))


def class_block_forward(x_nchw, params, *, block_m=None):
    """x_nchw: (N, input_dim, 1, 1) float32 -> (N, class_num) float32 logits."""
    w1f, b1f, w2, b2 = params
    N, C, H, W = x_nchw.shape
    # torch.squeeze + Linear only type-checks for 1x1 spatial input.
    assert (H, W) == (1, 1), "ClassBlock expects globally-pooled 1x1 input"
    assert C == w1f.shape[0]
    nb = w1f.shape[1]
    class_num = w2.shape[1]

    # Free reshape (no transpose): (N, C, 1, 1) -> (N, C); also implements
    # torch.squeeze.  Stream x as bf16 -> halves the dominant HBM stream and
    # matches the bf16 matmul-input rounding anyway.
    x2d = x_nchw.reshape(N, C).astype(jnp.bfloat16)

    # Pad the class dimension to a multiple of 128 (zero weight columns) so the
    # output store is a lane-dense, unmasked vst; slice the logits back after.
    cls_pad = _round_up(class_num, 128)
    if cls_pad != class_num:
        w2 = jnp.pad(w2, ((0, 0), (0, cls_pad - class_num)))
        b2 = jnp.pad(b2, ((0, 0), (0, cls_pad - class_num)))

    bm = _pick_block_m(N, block_m)
    # No jnp.pad copy of x: Pallas handles the partial last block (garbage OOB
    # rows are never reduced across; their output writes are dropped).
    grid = (pl.cdiv(N, bm),)

    vmem_limit = 32 * 1024 * 1024
    # Worst-case tile math: double-buffered streamed tiles + (possibly
    # double-buffered) resident weights + the f32 intermediate h.
    est_vmem = (2 * bm * C * 2 + 2 * bm * cls_pad * 4
                + 2 * (C * nb * 2 + nb * 4 + nb * cls_pad * 2 + cls_pad * 4)
                + bm * nb * 4)
    assert est_vmem < vmem_limit, (est_vmem, vmem_limit)

    cost = pl.CostEstimate(
        flops=2 * N * (C * nb + nb * cls_pad),
        transcendentals=0,
        bytes_accessed=(N * C * 2 + C * nb * 2 + nb * 4
                        + nb * cls_pad * 2 + cls_pad * 4 + N * cls_pad * 4),
    )

    def run(single_buffer_weights):
        if single_buffer_weights:
            # Invariant operands (constant index_map) don't need a second
            # pipeline buffer; keeps large W2 within v7x's 64 MiB VMEM budget.
            def wspec(shape):
                return pl.BlockSpec(shape, lambda i: (0, 0),
                                    pipeline_mode=pl.Buffered(1))
        else:
            def wspec(shape):
                return pl.BlockSpec(shape, lambda i: (0, 0))

        return pl.pallas_call(
            class_block_kernel,
            out_shape=jax.ShapeDtypeStruct((N, cls_pad), jnp.float32),
            grid_spec=pltpu.PrefetchScalarGridSpec(
                num_scalar_prefetch=0,
                grid=grid,
                in_specs=[
                    # Batch tile streams through the pipeline (double-buffered).
                    pl.BlockSpec((bm, C), lambda i: (i, 0)),
                    # Weights / biases: constant block index -> VMEM-resident.
                    wspec((C, nb)),
                    wspec((1, nb)),
                    wspec((nb, cls_pad)),
                    wspec((1, cls_pad)),
                ],
                out_specs=pl.BlockSpec((bm, cls_pad), lambda i: (i, 0)),
            ),
            compiler_params=pltpu.CompilerParams(
                dimension_semantics=("parallel",),
                vmem_limit_bytes=vmem_limit,
            ),
            cost_estimate=cost,
        )(x2d, w1f, b1f, w2, b2)

    try:
        out = run(single_buffer_weights=True)
    except Exception:
        # pipeline_mode=pl.Buffered(1) not supported by this JAX/Mosaic version:
        # fall back to default double buffering (weights are still DMA'd once).
        out = run(single_buffer_weights=False)

    return out[:, :class_num] if cls_pad != class_num else out


def make_params(key, input_dim, num_bottleneck, class_num):
    """Deterministic synthetic weights. Inference-mode BN folded into the conv."""
    ks = jax.random.split(key, 6)

    # Conv2d(input_dim, num_bottleneck, kernel_size=1, bias=False), stored as
    # (input_dim, num_bottleneck) for x @ W.
    w_conv = 0.05 * jax.random.normal(ks[0], (input_dim, num_bottleneck),
                                      jnp.float32)
    # BatchNorm2d(num_bottleneck) inference parameters.
    gamma = 1.0 + 0.1 * jax.random.normal(ks[1], (num_bottleneck,), jnp.float32)
    beta = 0.1 * jax.random.normal(ks[2], (num_bottleneck,), jnp.float32)
    mean = 0.1 * jax.random.normal(ks[3], (num_bottleneck,), jnp.float32)
    var = jax.random.uniform(ks[4], (num_bottleneck,), jnp.float32, 0.5, 1.5)
    scale = gamma / jnp.sqrt(var + 1e-5)
    bias = beta - mean * scale
    # Fold BN scale into the conv weight columns; only the bias add stays in-kernel.
    w1_fold = (w_conv * scale[None, :]).astype(jnp.bfloat16)
    b1_fold = bias.reshape(1, num_bottleneck)

    # Linear(num_bottleneck, class_num): weights_init_classifier -> small normal
    # weights, zero bias (scaled up a bit for a healthier numeric test).
    w_lin = 0.02 * jax.random.normal(ks[5], (num_bottleneck, class_num),
                                     jnp.float32)
    b_lin = jnp.zeros((1, class_num), jnp.float32)
    return w1_fold, b1_fold, w_lin.astype(jnp.bfloat16), b_lin


def reference_forward(x_nchw, params):
    """Plain-JAX reference (same bf16 matmul-input rounding as the kernel)."""
    w1f, b1f, w2, b2 = params
    N, C, H, W = x_nchw.shape
    x2d = x_nchw.reshape(N, C).astype(jnp.bfloat16)
    h = jnp.dot(x2d, w1f, preferred_element_type=jnp.float32)
    h = jnp.maximum(h + b1f, 0.0)
    logits = jnp.dot(h.astype(jnp.bfloat16), w2,
                     preferred_element_type=jnp.float32)
    return logits + b2


if __name__ == "__main__":
    # ClassBlock is applied to globally-pooled features, i.e. 1x1 spatial.
    # class_num=751 (Market-1501-style re-ID head) exercises the lane-padding
    # (751 -> 768) path; default block_m picker gives bm=128, grid=(2,).
    N, input_dim, num_bottleneck, class_num = 256, 256, 512, 751

    key = jax.random.PRNGKey(0)
    k_x, k_p = jax.random.split(key)
    x = jax.random.normal(k_x, (N, input_dim, 1, 1), jnp.float32)  # NCHW
    params = make_params(k_p, input_dim, num_bottleneck, class_num)

    out = jax.block_until_ready(class_block_forward(x, params))
    ref = jax.block_until_ready(reference_forward(x, params))

    assert out.shape == (N, class_num)
    np.testing.assert_allclose(np.asarray(out), np.asarray(ref),
                               rtol=5e-3, atol=2e-3)
    print("KERNEL_OK")
</pallas_src>

<mosaic_0001>
module attributes {stable_mosaic.version = 11 : i64} {
  func.func @class_block_kernel(%arg0: i32, %arg1: memref<128x256xbf16, #tpu.memory_space<vmem>>, %arg2: memref<256x512xbf16, #tpu.memory_space<vmem>>, %arg3: memref<1x512xf32, #tpu.memory_space<vmem>>, %arg4: memref<512x768xbf16, #tpu.memory_space<vmem>>, %arg5: memref<1x768xf32, #tpu.memory_space<vmem>>, %arg6: memref<128x768xf32, #tpu.memory_space<vmem>>) attributes {dimension_semantics = [#tpu.dimension_semantics<parallel>], iteration_bounds = array<i64: 2>, scalar_prefetch = 0 : i64, scratch_operands = 0 : i64, tpu.core_type = #tpu.core_type<tc>, window_params = [{transform_indices = @transform_0, window_bounds = array<i64: 128, 256>}, {pipeline_mode = #tpu.pipeline_mode<synchronous>, transform_indices = @transform_1, window_bounds = array<i64: 256, 512>}, {pipeline_mode = #tpu.pipeline_mode<synchronous>, transform_indices = @transform_2, window_bounds = array<i64: 1, 512>}, {pipeline_mode = #tpu.pipeline_mode<synchronous>, transform_indices = @transform_3, window_bounds = array<i64: 512, 768>}, {pipeline_mode = #tpu.pipeline_mode<synchronous>, transform_indices = @transform_4, window_bounds = array<i64: 1, 768>}, {transform_indices = @transform_5, window_bounds = array<i64: 128, 768>}]} {
    %c0 = arith.constant 0 : index
    %c0_0 = arith.constant 0 : index
    %0 = vector.load %arg1[%c0, %c0_0] : memref<128x256xbf16, #tpu.memory_space<vmem>>, vector<128x256xbf16>
    %c0_1 = arith.constant 0 : index
    %c0_2 = arith.constant 0 : index
    %1 = vector.load %arg2[%c0_1, %c0_2] : memref<256x512xbf16, #tpu.memory_space<vmem>>, vector<256x512xbf16>
    %cst = arith.constant dense<0.000000e+00> : vector<128x512xf32>
    %2 = tpu.matmul %0, %1, %cst {dimension_numbers = #tpu.dot_dimension_numbers<[1], [0], [0], [1], [0, 0, 1, 1], [], []>} : vector<128x256xbf16>, vector<256x512xbf16>, vector<128x512xf32> -> vector<128x512xf32>
    %c0_3 = arith.constant 0 : index
    %c0_4 = arith.constant 0 : index
    %3 = vector.load %arg3[%c0_3, %c0_4] : memref<1x512xf32, #tpu.memory_space<vmem>>, vector<1x512xf32>
    %4 = vector.broadcast %3 : vector<1x512xf32> to vector<128x512xf32>
    %5 = arith.addf %2, %4 : vector<128x512xf32>
    %cst_5 = arith.constant 0.000000e+00 : f32
    %6 = vector.broadcast %cst_5 : f32 to vector<128x512xf32>
    %7 = arith.maximumf %5, %6 : vector<128x512xf32>
    %8 = arith.truncf %7 : vector<128x512xf32> to vector<128x512xbf16>
    %c0_6 = arith.constant 0 : index
    %c0_7 = arith.constant 0 : index
    %9 = vector.load %arg4[%c0_6, %c0_7] : memref<512x768xbf16, #tpu.memory_space<vmem>>, vector<512x768xbf16>
    %cst_8 = arith.constant dense<0.000000e+00> : vector<128x768xf32>
    %10 = tpu.matmul %8, %9, %cst_8 {dimension_numbers = #tpu.dot_dimension_numbers<[1], [0], [0], [1], [0, 0, 1, 1], [], []>} : vector<128x512xbf16>, vector<512x768xbf16>, vector<128x768xf32> -> vector<128x768xf32>
    %c0_9 = arith.constant 0 : index
    %c0_10 = arith.constant 0 : index
    %11 = vector.load %arg5[%c0_9, %c0_10] : memref<1x768xf32, #tpu.memory_space<vmem>>, vector<1x768xf32>
    %12 = vector.broadcast %11 : vector<1x768xf32> to vector<128x768xf32>
    %13 = arith.addf %10, %12 : vector<128x768xf32>
    %c0_11 = arith.constant 0 : index
    %c0_12 = arith.constant 0 : index
    %14 = vector.load %arg6[%c0_11, %c0_12] : memref<128x768xf32, #tpu.memory_space<vmem>>, vector<128x768xf32>
    tpu.vector_store %arg6[%c0_11, %c0_12], %13 {strides = array<i32>} : memref<128x768xf32, #tpu.memory_space<vmem>>, vector<128x768xf32>,
    return
  }
  func.func @transform_0(%arg0: i32) -> (i32, i32) {
    %c0_i32 = arith.constant 0 : i32
    %c0_i32_0 = arith.constant 0 : i32
    return %arg0, %c0_i32 : i32, i32
  }
  func.func @transform_1(%arg0: i32) -> (i32, i32) {
    %c0_i32 = arith.constant 0 : i32
    %c0_i32_0 = arith.constant 0 : i32
    %c0_i32_1 = arith.constant 0 : i32
    return %c0_i32, %c0_i32_0 : i32, i32
  }
  func.func @transform_2(%arg0: i32) -> (i32, i32) {
    %c0_i32 = arith.constant 0 : i32
    %c0_i32_0 = arith.constant 0 : i32
    %c0_i32_1 = arith.constant 0 : i32
    return %c0_i32, %c0_i32_0 : i32, i32
  }
  func.func @transform_3(%arg0: i32) -> (i32, i32) {
    %c0_i32 = arith.constant 0 : i32
    %c0_i32_0 = arith.constant 0 : i32
    %c0_i32_1 = arith.constant 0 : i32
    return %c0_i32, %c0_i32_0 : i32, i32
  }
  func.func @transform_4(%arg0: i32) -> (i32, i32) {
    %c0_i32 = arith.constant 0 : i32
    %c0_i32_0 = arith.constant 0 : i32
    %c0_i32_1 = arith.constant 0 : i32
    return %c0_i32, %c0_i32_0 : i32, i32
  }
  func.func @transform_5(%arg0: i32) -> (i32, i32) {
    %c0_i32 = arith.constant 0 : i32
    %c0_i32_0 = arith.constant 0 : i32
    return %arg0, %c0_i32 : i32, i32
  }
}

module attributes {stable_mosaic.version = 11 : i64} {
  func.func @class_block_kernel(%arg0: i32, %arg1: memref<128x256xbf16, #tpu.memory_space<vmem>>, %arg2: memref<256x512xbf16, #tpu.memory_space<vmem>>, %arg3: memref<1x512xf32, #tpu.memory_space<vmem>>, %arg4: memref<512x768xbf16, #tpu.memory_space<vmem>>, %arg5: memref<1x768xf32, #tpu.memory_space<vmem>>, %arg6: memref<128x768xf32, #tpu.memory_space<vmem>>) attributes {dimension_semantics = [#tpu.dimension_semantics<parallel>], iteration_bounds = array<i64: 2>, scalar_prefetch = 0 : i64, scratch_operands = 0 : i64, tpu.core_type = #tpu.core_type<tc>, window_params = [{transform_indices = @transform_0, window_bounds = array<i64: 128, 256>}, {pipeline_mode = #tpu.pipeline_mode<synchronous>, transform_indices = @transform_1, window_bounds = array<i64: 256, 512>}, {pipeline_mode = #tpu.pipeline_mode<synchronous>, transform_indices = @transform_2, window_bounds = array<i64: 1, 512>}, {pipeline_mode = #tpu.pipeline_mode<synchronous>, transform_indices = @transform_3, window_bounds = array<i64: 512, 768>}, {pipeline_mode = #tpu.pipeline_mode<synchronous>, transform_indices = @transform_4, window_bounds = array<i64: 1, 768>}, {transform_indices = @transform_5, window_bounds = array<i64: 128, 768>}]} {
    %c0 = arith.constant 0 : index
    %c0_0 = arith.constant 0 : index
    %0 = vector.load %arg1[%c0, %c0_0] : memref<128x256xbf16, #tpu.memory_space<vmem>>, vector<128x256xbf16>
    %c0_1 = arith.constant 0 : index
    %c0_2 = arith.constant 0 : index
    %1 = vector.load %arg2[%c0_1, %c0_2] : memref<256x512xbf16, #tpu.memory_space<vmem>>, vector<256x512xbf16>
    %cst = arith.constant dense<0.000000e+00> : vector<128x512xf32>
    %2 = tpu.matmul %0, %1, %cst {dimension_numbers = #tpu.dot_dimension_numbers<[1], [0], [0], [1], [0, 0, 1, 1], [], []>} : vector<128x256xbf16>, vector<256x512xbf16>, vector<128x512xf32> -> vector<128x512xf32>
    %c0_3 = arith.constant 0 : index
    %c0_4 = arith.constant 0 : index
    %3 = vector.load %arg3[%c0_3, %c0_4] : memref<1x512xf32, #tpu.memory_space<vmem>>, vector<1x512xf32>
    %4 = vector.broadcast %3 : vector<1x512xf32> to vector<128x512xf32>
    %5 = arith.addf %2, %4 : vector<128x512xf32>
    %cst_5 = arith.constant 0.000000e+00 : f32
    %6 = vector.broadcast %cst_5 : f32 to vector<128x512xf32>
    %7 = arith.maximumf %5, %6 : vector<128x512xf32>
    %8 = arith.truncf %7 : vector<128x512xf32> to vector<128x512xbf16>
    %c0_6 = arith.constant 0 : index
    %c0_7 = arith.constant 0 : index
    %9 = vector.load %arg4[%c0_6, %c0_7] : memref<512x768xbf16, #tpu.memory_space<vmem>>, vector<512x768xbf16>
    %cst_8 = arith.constant dense<0.000000e+00> : vector<128x768xf32>
    %10 = tpu.matmul %8, %9, %cst_8 {dimension_numbers = #tpu.dot_dimension_numbers<[1], [0], [0], [1], [0, 0, 1, 1], [], []>} : vector<128x512xbf16>, vector<512x768xbf16>, vector<128x768xf32> -> vector<128x768xf32>
    %c0_9 = arith.constant 0 : index
    %c0_10 = arith.constant 0 : index
    %11 = vector.load %arg5[%c0_9, %c0_10] : memref<1x768xf32, #tpu.memory_space<vmem>>, vector<1x768xf32>
    %12 = vector.broadcast %11 : vector<1x768xf32> to vector<128x768xf32>
    %13 = arith.addf %10, %12 : vector<128x768xf32>
    %c0_11 = arith.constant 0 : index
    %c0_12 = arith.constant 0 : index
    %14 = vector.load %arg6[%c0_11, %c0_12] : memref<128x768xf32, #tpu.memory_space<vmem>>, vector<128x768xf32>
    tpu.vector_store %arg6[%c0_11, %c0_12], %13 {strides = array<i32>} : memref<128x768xf32, #tpu.memory_space<vmem>>, vector<128x768xf32>,
    return
  }
  func.func @transform_0(%arg0: i32) -> (i32, i32) {
    %c0_i32 = arith.constant 0 : i32
    %c0_i32_0 = arith.constant 0 : i32
    return %arg0, %c0_i32 : i32, i32
  }
  func.func @transform_1(%arg0: i32) -> (i32, i32) {
    %c0_i32 = arith.constant 0 : i32
    %c0_i32_0 = arith.constant 0 : i32
    %c0_i32_1 = arith.constant 0 : i32
    return %c0_i32, %c0_i32_0 : i32, i32
  }
  func.func @transform_2(%arg0: i32) -> (i32, i32) {
    %c0_i32 = arith.constant 0 : i32
    %c0_i32_0 = arith.constant 0 : i32
    %c0_i32_1 = arith.constant 0 : i32
    return %c0_i32, %c0_i32_0 : i32, i32
  }
  func.func @transform_3(%arg0: i32) -> (i32, i32) {
    %c0_i32 = arith.constant 0 : i32
    %c0_i32_0 = arith.constant 0 : i32
    %c0_i32_1 = arith.constant 0 : i32
    return %c0_i32, %c0_i32_0 : i32, i32
  }
  func.func @transform_4(%arg0: i32) -> (i32, i32) {
    %c0_i32 = arith.constant 0 : i32
    %c0_i32_0 = arith.constant 0 : i32
    %c0_i32_1 = arith.constant 0 : i32
    return %c0_i32, %c0_i32_0 : i32, i32
  }
  func.func @transform_5(%arg0: i32) -> (i32, i32) {
    %c0_i32 = arith.constant 0 : i32
    %c0_i32_0 = arith.constant 0 : i32
    return %arg0, %c0_i32 : i32, i32
  }
}

</mosaic_0001>

<bundles_post_ra>
// kernel: tpu_custom_call.1
= control target key start
LH: loop header
LB: loop body
LE: loop exit
PB: predicated region body
PF: predicated region fallthrough
CT: control target
= control target key end

     0   :  { %10 = vsyncpa [#allocation3], 0  ;;  %s4892_s0 = inlined_call_operand.hbm [shape: bf16[256,256], index: 0, kind: input, shape index: {}]   ;;  %s4893_s1 = inlined_call_operand.hbm [shape: bf16[256,512], index: 1, kind: input, shape index: {}]   ;;  %s4894_s2 = inlined_call_operand.hbm [shape: f32[1,512], index: 2, kind: input, shape index: {}]   ;;  %s4895_s3 = inlined_call_operand.hbm [shape: bf16[512,768], index: 3, kind: input, shape index: {}]   ;;  %s4896_s4 = inlined_call_operand.vmem [shape: f32[1,768], index: 4, kind: input, shape index: {}]   ;;  %s4897_s5 = inlined_call_operand.hbm [shape: f32[256,768], index: 5, kind: output, shape index: {}]  }
   0x1   :  { %12 = vsyncpa [#allocation3 + $0x1], 0 }
   0x2   :  { %13 = vsyncpa [#allocation6], 0 }
   0x3   :  { %14 = vsyncpa [#allocation9], 0 }
   0x4   :  { %15 = vsyncpa [#allocation4], 0 }
   0x5   :  { %17 = vsyncpa [#allocation4 + $0x1], 0  ;;  %s4199_s18 = smov 0   ;;  %s4201_s19 = smov 0  }
   0x6   :  { %s4203_s20 = smov 0   ;;  %s4205_s21 = smov 0  }
   0x7 LB: > { %s4220_s22 = sadd.s32 4294967295, %s4154_s21   ;;  %s3187_s23 = sadd.s32 4294967294, %s4154_s21   ;;  %s4154_s21 = sphi %s4205_s21, %s4921_s21   ;;  %s4150_s20 = sphi %s4203_s20, %s4920_s20   ;;  %s4146_s19 = sphi %s4201_s19, %s4919_s19   ;;  %s4142_s18 = sphi %s4199_s18, %s4918_s18  }
   0x8   : > { %p43_p0 = scmp.ne.s32.totalorder %s4146_s19, %s4142_s18  ;;  %p4898_p1 = scmp.eq.s32.totalorder %s4220_s22, 0 }
   0x9   : > { %p157_p3 = scmp.eq.s32.totalorder %s3187_s23, 1  ;;  %p3188_p5 = scmp.ge.s32.totalorder %s4154_s21, 1 }
   0xa   : > { %p4229_p4 = por %p4898_p1, %p43_p0  ;;  %p164_p7 = scmp.lt.s32.totalorder %s4154_s21, 3 }
   0xb   : > { %p4234_p6 = por %p157_p3, %p43_p0  ;;  %s4156_s27 = smov [#allocation5]  }
   0xc   : > { %s4902_s24 = scalar_select %p4229_p4, 1, 0 }
   0xd   : > { %s4903_s25 = scalar_select %p4234_p6, 1, 0 }
   0xe   : > { %p4239_p8 = pnand %p3188_p5, %p164_p7  ;;  %s176_s28 = sshll.u32 %s4156_s27, 4  ;;  %s177_s28 = int_to_ptr.vmem [resolvable:$true] %s176_s28 }
   0xf   : > { %s4157_s30 = smov [#allocation7]   ;;  %s4158_s7 = smov [#allocation8]  }
  0x10   : > { %s4904_s26 = scalar_select %p4239_p8, 1, 0 }
  0x11   : > { %p3499_p9 = pneg %p4239_p8  ;;  %s190_s6 = sshll.u32 %s4157_s30, 4  ;;  %s191_s6 = int_to_ptr.vmem [resolvable:$true] %s190_s6 }
  0x12   : > { %s200_s8 = sshll.u32 %s4158_s7, 4  ;;  %s3987_s9 = scalar_lea.vmem %s177_s28, 8192  ;;  %s201_s8 = int_to_ptr.vmem [resolvable:$true] %s200_s8 }
  0x13   : > { %p4248_p11 = pnand %p3499_p9, %p4898_p1  ;;  %p3988_p13 = scmp.ne.s32.totalorder %s177_s28, %s3987_s9 }
  0x14   : > { %p3995_p5 = scmp.lt.s32.totalorder %s177_s28, %s177_s28  ;;  %p3996_p7 = scmp.lt.s32.totalorder %s3987_s9, %s3987_s9 }
  0x15   : > { %p3978_p12 = pneg %p4248_p11 }
  0x16   : > { %p3997_p9 = por %p3996_p7, %p3995_p5 }
  0x17   : > { %p3990_p0 = pnand %p3988_p13, %p3978_p12 }
  0x19   : > { %p3991_p3 = pneg %p3990_p0 }
  0x1b   : > { %p3998_p10 = pnand %p3997_p9, %p3991_p3 }
  0x1d   : > { %4001 = shalt.err (!%p3998_p10)
}
  0x1e   : > { %s4159_s10 = smov 256   ;;  %s4160_s11 = smov 16  }
  0x1f   : > { %3502 = dma.hbm_to_vmem [thread:$0]  (!%p4248_p11), %s4893_s1, 8192, %s177_s28, [#allocation6], %s4159_s10, %s4159_s10, %s4160_s11  }
  0x20   : > { %s4013_s14 = scalar_lea.vmem %s191_s6, 64  ;;  %p4021_p2 = scmp.lt.s32.totalorder %s191_s6, %s191_s6 }
  0x21   : > { %p4014_p1 = scmp.ne.s32.totalorder %s191_s6, %s4013_s14  ;;  %p4022_p6 = scmp.lt.s32.totalorder %s4013_s14, %s4013_s14 }
  0x23   : > { %p4016_p13 = pnand %p4014_p1, %p3978_p12  ;;  %p4023_p5 = por %p4022_p6, %p4021_p2 }
  0x25   : > { %p4017_p0 = pneg %p4016_p13 }
  0x27   : > { %p4024_p3 = pnand %p4023_p5, %p4017_p0 }
  0x29   : > { %4027 = shalt.err (!%p4024_p3)
}
  0x2a   : > { %3505 = dma.hbm_to_vmem [thread:$0]  (!%p4248_p11), %s4894_s2, 64, %s191_s6, [#allocation6]  }
  0x2b   : > { %s4039_s17 = scalar_lea.vmem %s201_s8, 24576  ;;  %p4047_p9 = scmp.lt.s32.totalorder %s201_s8, %s201_s8 }
  0x2c   : > { %p4040_p10 = scmp.ne.s32.totalorder %s201_s8, %s4039_s17  ;;  %p4048_p13 = scmp.lt.s32.totalorder %s4039_s17, %s4039_s17 }
  0x2e   : > { %p4042_p7 = pnand %p4040_p10, %p3978_p12  ;;  %p4049_p4 = por %p4048_p13, %p4047_p9 }
  0x30   : > { %p4043_p1 = pneg %p4042_p7 }
  0x32   : > { %p4050_p2 = pnand %p4049_p4, %p4043_p1 }
  0x34   : > { %4053 = shalt.err (!%p4050_p2)
}
  0x35   : > { %s4161_s23 = smov 384   ;;  %s4162_s27 = smov 24  }
  0x36   : > { %3508 = dma.hbm_to_vmem [thread:$0]  (!%p4248_p11), %s4895_s3, 24576, %s201_s8, [#allocation9], %s4161_s23, %s4161_s23, %s4162_s27  }
  0x37   : > { %s4279_s6 = sadd.s32 1, %s4154_s21   ;;  %s30_s9 = sadd.s32 1, %s4150_s20 }
  0x38   : > { %s27_s7 = ssub.s32 %s4154_s21, %s4279_s6  ;;  %p37_p6 = scmp.ne.s32.totalorder %s4150_s20, %s4146_s19 }
  0x39   : > { %p28_p4 = scmp.eq.s32.totalorder %s27_s7, 0  ;;  %p38_p12 = scmp.eq.s32.totalorder %s4154_s21, 0 }
  0x3a   : > { %p3520_p0 = scmp.lt.s32.totalorder %s4154_s21, 2  ;;  %p4906_p3 = scmp.eq.s32.totalorder %s4220_s22, 1 }
  0x3b   : > { %s4289_s10 = scalar_select %p28_p4, %s4150_s20, %s30_s9  }
  0x3c   : > { %p39_p5 = por %p38_p12, %p37_p6  ;;  %p4293_p10 = por %p4906_p3, %p37_p6 }
  0x3d   : > { %s217_s29 = sand.u32 1, %s4150_s20   ;;  %s3480_s12 = sshll.u32 %s4154_s21, 11 }
  0x3e   : > { %s4907_s11 = scalar_select %p4293_p10, 1, 0 }
  0x3f   : > { %s3193_s8 = sshll.u32 %s217_s29, 7  ;;  %s4302_s15 = scalar_lea.hbm %s4892_s0, %s3480_s12 }
  0x40   : > { %s221_s16 = scalar_lea.vmem [#allocation2], %s3193_s8  ;;  %p4304_p11 = pnand %p3520_p0, %p39_p5 }
  0x41   : > { %s229_s17 = sshll.u32 %s221_s16, 4  ;;  %s4310_s27 = scalar_lea.sflag [#allocation3], %s217_s29  ;;  %s4308_s17 = int_to_ptr.vmem [resolvable:$true] %s229_s17 }
  0x42   : > { %s4054_s28 = scalar_lea.hbm %s4302_s15, 2048  ;;  %p4056_p1 = pneg %p4304_p11 }
  0x43   : > { %p4055_p7 = scmp.ne.s32.totalorder %s4302_s15, %s4054_s28  ;;  %s4059_s9 = scalar_lea.hbm %s4892_s0, 4096 }
  0x44   : > { %p4060_p2 = scmp.lt.s32.totalorder %s4302_s15, %s4892_s0  ;;  %p4061_p4 = scmp.lt.s32.totalorder %s4059_s9, %s4054_s28 }
  0x45   : > { %p4057_p9 = pnand %p4056_p1, %p4055_p7 }
  0x46   : > { %p4062_p6 = por %p4061_p4, %p4060_p2 }
  0x47   : > { %p4058_p13 = pneg %p4057_p9 }
  0x49   : > { %p4063_p12 = pnand %p4062_p6, %p4058_p13 }
  0x4b   : > { %4066 = shalt.err (!%p4063_p12)
}
  0x4c   : > { %s4067_s29 = scalar_lea.vmem %s4308_s17, 2048  ;;  %s4163_s13 = smov [#allocation2]  }
  0x4d   : > { %p4068_p0 = scmp.ne.s32.totalorder %s4308_s17, %s4067_s29  ;;  %s4072_s14 = sshll.u32 %s4163_s13, 4  ;;  %s4073_s14 = int_to_ptr.vmem [resolvable:$false] %s4072_s14 }
  0x4e   : > { %s4074_s16 = scalar_lea.vmem %s4073_s14, 4096  ;;  %p4075_p7 = scmp.lt.s32.totalorder %s4308_s17, %s4073_s14 }
  0x4f   : > { %p4070_p5 = pnand %p4068_p0, %p4056_p1  ;;  %p4076_p9 = scmp.lt.s32.totalorder %s4074_s16, %s4067_s29 }
  0x51   : > { %p4071_p3 = pneg %p4070_p5  ;;  %p4077_p10 = por %p4076_p9, %p4075_p7 }
  0x53   : > { %p4078_p8 = pnand %p4077_p10, %p4071_p3 }
  0x55   : > { %4081 = shalt.err (!%p4078_p8)
}
  0x56   : > { %s4164_s28 = smov 128   ;;  %s4165_s30 = smov 8  }
  0x57   : > { %3512 = dma.hbm_to_vmem [thread:$0]  (!%p4304_p11), %s4302_s15, 2048, %s4308_s17, %s4310_s27, %s4164_s28, %s4164_s28, %s4165_s30  }
  0x58   : > { %p4909_p1 = scmp.ne.s32.totalorder %s4904_s26, 0 }
  0x59   : > { %s4334_s7 = sand.u32 (!%p4909_p1), 1, %s4146_s19   ;;  %p4910_p8 = scmp.ne.s32.totalorder (!%p4909_p1), %s4902_s24, 0 }
  0x5a   : > { %241 = sbr.rel (%p4909_p1) target bundleno = 774 (0x306), region = 40  ;;  %s3198_s9 = sshll.u32 (!%p4909_p1), %s4334_s7, 7 }
  0x5b   : > { %s244_s12 = scalar_lea.sflag (!%p4909_p1), [#allocation3], %s4334_s7  ;;  %s4338_s8 = scalar_lea.vmem (!%p4909_p1), [#allocation2], %s3198_s9 }
  0x5f   : > { %4125 = dma.done.wait (%p4910_p8), %s244_s12, 2048  }
  0x60   : > { %4127 = vsyncadd (%p4910_p8), %s244_s12, 4294965248  ;;  %p4911_p10 = scmp.eq.s32.totalorder %s4220_s22, 0 }
  0x62   : > { %4129 = dma.done.wait (%p4911_p10), [#allocation6], 8256   ;;  %p4912_p11 = pmov %p4911_p10 }
  0x63   : > { %p4913_p13 = pmov %p4911_p10 }
  0x64   : > { %4131 = vsyncadd (%p4912_p11), [#allocation6], 4294959040 }
  0x65   : > { %4133 = dma.done.wait (%p4913_p13), [#allocation9], 24576   ;;  %p4914_p2 = pmov %p4911_p10 }
  0x66   : > { %v3568_v0 = vld [vmem:[#allocation5 + $0xe4] ss:$16 sps:$4 sm:$0xff]   ;;  %v3570_v1 = vld [vmem:[#allocation5 + $0xec] ss:$16 sps:$4 sm:$0xff]   ;;  %v3572_v2 = vld [vmem:[#allocation5 + $0xe0] ss:$16 sps:$4 sm:$0xff]  }
  0x67   : > { %4135 = vsyncadd (%p4914_p2), [#allocation9], 4294942720  ;;  %790 = vmatprep.subr.bf16.mxu0 %v3568_v0  ;;  %v3573_v3 = vld [vmem:[#allocation5 + $0xe8] ss:$16 sps:$4 sm:$0xff]   ;;  %903 = vmatprep.subr.bf16.mxu1 %v3570_v1  ;;  %v3574_v4 = vld [vmem:[#allocation5 + $0xc4] ss:$16 sps:$4 sm:$0xff]  }
  0x68   : > { %791 = vmatpush1.bf16.msra.mxu0 %v3572_v2  ;;  %904 = vmatpush1.bf16.msra.mxu1 %v3573_v3  ;;  %v3576_v5 = vld [vmem:[#allocation5 + $0xcc] ss:$16 sps:$4 sm:$0xff]   ;;  %v3578_v6 = vld [vmem:[#allocation5 + $0xc0] ss:$16 sps:$4 sm:$0xff]   ;;  %v3579_v7 = vld [vmem:[#allocation5 + $0xc8] ss:$16 sps:$4 sm:$0xff]  }
  0x69   : > { %792 = vmatprep.subr.bf16.mxu0 %v3574_v4  ;;  %905 = vmatprep.subr.bf16.mxu1 %v3576_v5  ;;  %v3580_v8 = vld [vmem:[#allocation5 + $0xa4] ss:$16 sps:$4 sm:$0xff]   ;;  %v3582_v9 = vld [vmem:[#allocation5 + $0xac] ss:$16 sps:$4 sm:$0xff]   ;;  %v3584_v10 = vld [vmem:[#allocation5 + $0xa0] ss:$16 sps:$4 sm:$0xff]  }
  0x6a   : > { %v3585_v11 = vld [vmem:[#allocation5 + $0xa8] ss:$16 sps:$4 sm:$0xff]   ;;  %v3586_v12 = vld [vmem:[#allocation5 + $0x84] ss:$16 sps:$4 sm:$0xff]   ;;  %v3588_v13 = vld [vmem:[#allocation5 + $0x8c] ss:$16 sps:$4 sm:$0xff]  }
  0x6b   : > { %v3590_v14 = vld [vmem:[#allocation5 + $0x80] ss:$16 sps:$4 sm:$0xff]   ;;  %v3591_v15 = vld [vmem:[#allocation5 + $0x88] ss:$16 sps:$4 sm:$0xff]   ;;  %v3592_v16 = vld [vmem:[#allocation5 + $0x64] ss:$16 sps:$4 sm:$0xff]  }
  0x6c   : > { %793 = vmatpush1.bf16.msra.mxu0 %v3578_v6  ;;  %906 = vmatpush1.bf16.msra.mxu1 %v3579_v7  ;;  %v3594_v17 = vld [vmem:[#allocation5 + $0x6c] ss:$16 sps:$4 sm:$0xff]   ;;  %v3596_v18 = vld [vmem:[#allocation5 + $0x60] ss:$16 sps:$4 sm:$0xff]   ;;  %v3597_v19 = vld [vmem:[#allocation5 + $0x68] ss:$16 sps:$4 sm:$0xff]  }
  0x6d   : > { %794 = vmatprep.subr.bf16.mxu0 %v3580_v8  ;;  %907 = vmatprep.subr.bf16.mxu1 %v3582_v9  ;;  %v3598_v20 = vld [vmem:[#allocation5 + $0x44] ss:$16 sps:$4 sm:$0xff]   ;;  %v3600_v21 = vld [vmem:[#allocation5 + $0x4c] ss:$16 sps:$4 sm:$0xff]   ;;  %v3602_v22 = vld [vmem:[#allocation5 + $0x40] ss:$16 sps:$4 sm:$0xff]  }
  0x6e   : > { %v3603_v23 = vld [vmem:[#allocation5 + $0x48] ss:$16 sps:$4 sm:$0xff]   ;;  %v3604_v24 = vld [vmem:[#allocation5 + $0x24] ss:$16 sps:$4 sm:$0xff]   ;;  %v3606_v25 = vld [vmem:[#allocation5 + $0x2c] ss:$16 sps:$4 sm:$0xff]  }
  0x6f   : > { %v3608_v26 = vld [vmem:[#allocation5 + $0x20] ss:$16 sps:$4 sm:$0xff]   ;;  %v3609_v27 = vld [vmem:[#allocation5 + $0x28] ss:$16 sps:$4 sm:$0xff]   ;;  %v3610_v28 = vld [vmem:[#allocation5 + $0x4] ss:$16 sps:$4 sm:$0xff]  }
  0x70   : > { %795 = vmatpush1.bf16.msra.mxu0 %v3584_v10  ;;  %908 = vmatpush1.bf16.msra.mxu1 %v3585_v11  ;;  %v3612_v29 = vld [vmem:[#allocation5 + $0xc] ss:$16 sps:$4 sm:$0xff]   ;;  %v3614_v30 = vld [vmem:[#allocation5] ss:$16 sps:$4 sm:$0xff]   ;;  %v3615_v31 = vld [vmem:[#allocation5 + $0x8] ss:$16 sps:$4 sm:$0xff]  }
  0x71   : > { %796 = vmatprep.subr.bf16.mxu0 %v3586_v12  ;;  %909 = vmatprep.subr.bf16.mxu1 %v3588_v13  ;;  %v3616_v32 = vld [vmem:[#allocation5 + $0x1e4] ss:$16 sps:$4 sm:$0xff]   ;;  %v3618_v33 = vld [vmem:[#allocation5 + $0x1ec] ss:$16 sps:$4 sm:$0xff]   ;;  %v3620_v34 = vld [vmem:[#allocation5 + $0x1e0] ss:$16 sps:$4 sm:$0xff]  }
  0x72   : > { %v3621_v35 = vld [vmem:[#allocation5 + $0x1e8] ss:$16 sps:$4 sm:$0xff]   ;;  %v3622_v36 = vld [vmem:[#allocation5 + $0x1c4] ss:$16 sps:$4 sm:$0xff]   ;;  %v3624_v37 = vld [vmem:[#allocation5 + $0x1cc] ss:$16 sps:$4 sm:$0xff]  }
  0x73   : > { %v3626_v38 = vld [vmem:[#allocation5 + $0x1c0] ss:$16 sps:$4 sm:$0xff]   ;;  %v3627_v39 = vld [vmem:[#allocation5 + $0x1c8] ss:$16 sps:$4 sm:$0xff]   ;;  %v3628_v40 = vld [vmem:[#allocation5 + $0x1a4] ss:$16 sps:$4 sm:$0xff]  }
  0x74   : > { %797 = vmatpush1.bf16.msra.mxu0 %v3590_v14  ;;  %910 = vmatpush1.bf16.msra.mxu1 %v3591_v15  ;;  %v3630_v41 = vld [vmem:[#allocation5 + $0x1ac] ss:$16 sps:$4 sm:$0xff]   ;;  %v3632_v42 = vld [vmem:[#allocation5 + $0x1a0] ss:$16 sps:$4 sm:$0xff]   ;;  %v3633_v43 = vld [vmem:[#allocation5 + $0x1a8] ss:$16 sps:$4 sm:$0xff]  }
  0x75   : > { %798 = vmatprep.subr.bf16.mxu0 %v3592_v16  ;;  %911 = vmatprep.subr.bf16.mxu1 %v3594_v17  ;;  %v3634_v44 = vld [vmem:[#allocation5 + $0x184] ss:$16 sps:$4 sm:$0xff]   ;;  %v3636_v45 = vld [vmem:[#allocation5 + $0x18c] ss:$16 sps:$4 sm:$0xff]   ;;  %v3638_v46 = vld [vmem:[#allocation5 + $0x180] ss:$16 sps:$4 sm:$0xff]  }
  0x76   : > { %v3639_v47 = vld [vmem:[#allocation5 + $0x188] ss:$16 sps:$4 sm:$0xff]   ;;  %v3666_v48 = vld [vmem:[%s4338_s8 + $0x4] ss:$8 sps:$4 sm:$0xff]   ;;  %v3644_v51 = vld [vmem:[#allocation5 + $0x160] ss:$16 sps:$4 sm:$0xff]  }
  0x77   : > { %v3640_v49 = vld [vmem:[#allocation5 + $0x164] ss:$16 sps:$4 sm:$0xff]   ;;  %v3642_v50 = vld [vmem:[#allocation5 + $0x16c] ss:$16 sps:$4 sm:$0xff]   ;;  %822 = vmatprep.mubr.bf16.mxu0 %v3666_v48  ;;  %935 = vmatprep.mubr.bf16.mxu1 %v3666_v48  ;;  %v3645_v52 = vld [vmem:[#allocation5 + $0x168] ss:$16 sps:$4 sm:$0xff]  }
  0x78   : > { %799 = vmatpush1.bf16.msra.mxu0 %v3596_v18  ;;  %912 = vmatpush1.bf16.msra.mxu1 %v3597_v19  ;;  %v3646_v53 = vld [vmem:[#allocation5 + $0x144] ss:$16 sps:$4 sm:$0xff]   ;;  %v3648_v54 = vld [vmem:[#allocation5 + $0x14c] ss:$16 sps:$4 sm:$0xff]   ;;  %v3650_v55 = vld [vmem:[#allocation5 + $0x140] ss:$16 sps:$4 sm:$0xff]  }
  0x79   : > { %800 = vmatprep.subr.bf16.mxu0 %v3598_v20  ;;  %913 = vmatprep.subr.bf16.mxu1 %v3600_v21  ;;  %v3651_v56 = vld [vmem:[#allocation5 + $0x148] ss:$16 sps:$4 sm:$0xff]   ;;  %v3652_v57 = vld [vmem:[#allocation5 + $0x124] ss:$16 sps:$4 sm:$0xff]   ;;  %v3654_v58 = vld [vmem:[#allocation5 + $0x12c] ss:$16 sps:$4 sm:$0xff]  }
  0x7a   : > { %v3656_v59 = vld [vmem:[#allocation5 + $0x120] ss:$16 sps:$4 sm:$0xff]   ;;  %v3657_v60 = vld [vmem:[#allocation5 + $0x128] ss:$16 sps:$4 sm:$0xff]   ;;  %v3658_v61 = vld [vmem:[#allocation5 + $0x104] ss:$16 sps:$4 sm:$0xff]  }
  0x7b   : > { %v3660_v62 = vld [vmem:[#allocation5 + $0x10c] ss:$16 sps:$4 sm:$0xff]   ;;  %v3662_v63 = vld [vmem:[#allocation5 + $0x100] ss:$16 sps:$4 sm:$0xff]   ;;  %v3663_v0 = vld [vmem:[#allocation5 + $0x108] ss:$16 sps:$4 sm:$0xff]  }
  0x7c   : > { %801 = vmatpush1.bf16.msra.mxu0 %v3602_v22  ;;  %914 = vmatpush1.bf16.msra.mxu1 %v3603_v23  ;;  %v3690_v1 = vld [vmem:[#allocation8 + $0x154] ss:$24 sps:$4 sm:$0xff]   ;;  %v3664_v3 = vld [vmem:[%s4338_s8] ss:$8 sps:$4 sm:$0xff]   ;;  %v3667_v4 = vld [vmem:[%s4338_s8 + $0x14] ss:$8 sps:$4 sm:$0xff]  }
  0x7d   : > { %802 = vmatprep.subr.bf16.mxu0 %v3604_v24  ;;  %915 = vmatprep.subr.bf16.mxu1 %v3606_v25  ;;  %v3693_v2 = vld [vmem:[#allocation8 + $0x454] ss:$24 sps:$4 sm:$0xff]   ;;  %v3688_v5 = vld [vmem:[#allocation8 + $0x150] ss:$24 sps:$4 sm:$0xff]   ;;  %v3696_v7 = vld [vmem:[#allocation8 + $0x124] ss:$24 sps:$4 sm:$0xff]  }
  0x7e   : > { %v3691_v6 = vld [vmem:[#allocation8 + $0x450] ss:$24 sps:$4 sm:$0xff]   ;;  %v3699_v8 = vld [vmem:[#allocation8 + $0x424] ss:$24 sps:$4 sm:$0xff]   ;;  %v3694_v9 = vld [vmem:[#allocation8 + $0x120] ss:$24 sps:$4 sm:$0xff]  }
  0x7f   : > { %v3697_v10 = vld [vmem:[#allocation8 + $0x420] ss:$24 sps:$4 sm:$0xff]   ;;  %v3702_v11 = vld [vmem:[#allocation8 + $0xf4] ss:$24 sps:$4 sm:$0xff]   ;;  %v3700_v15 = vld [vmem:[#allocation8 + $0xf0] ss:$24 sps:$4 sm:$0xff]  }
  0x80   : > { %803 = vmatpush1.bf16.msra.mxu0 %v3608_v26  ;;  %916 = vmatpush1.bf16.msra.mxu1 %v3609_v27  ;;  %v3705_v12 = vld [vmem:[#allocation8 + $0x3f4] ss:$24 sps:$4 sm:$0xff]   ;;  %v3670_v14 = vld [vmem:[%s4338_s8 + $0x24] ss:$8 sps:$4 sm:$0xff]   ;;  %v3708_v17 = vld [vmem:[#allocation8 + $0xc4] ss:$24 sps:$4 sm:$0xff]  }
  0x81   : > { %804 = vmatprep.subr.bf16.mxu0 %v3610_v28  ;;  %917 = vmatprep.subr.bf16.mxu1 %v3612_v29  ;;  %v3669_v13 = vld [vmem:[%s4338_s8 + $0x10] ss:$8 sps:$4 sm:$0xff]   ;;  %v3703_v16 = vld [vmem:[#allocation8 + $0x3f0] ss:$24 sps:$4 sm:$0xff]   ;;  %v3711_v18 = vld [vmem:[#allocation8 + $0x3c4] ss:$24 sps:$4 sm:$0xff]  }
  0x82   : > { %v3706_v19 = vld [vmem:[#allocation8 + $0xc0] ss:$24 sps:$4 sm:$0xff]   ;;  %v3714_v21 = vld [vmem:[#allocation8 + $0x94] ss:$24 sps:$4 sm:$0xff]   ;;  %v3672_v23 = vld [vmem:[%s4338_s8 + $0x20] ss:$8 sps:$4 sm:$0xff]  }
  0x83   : > { %v3709_v20 = vld [vmem:[#allocation8 + $0x3c0] ss:$24 sps:$4 sm:$0xff]   ;;  %v3717_v22 = vld [vmem:[#allocation8 + $0x394] ss:$24 sps:$4 sm:$0xff]   ;;  %v3712_v25 = vld [vmem:[#allocation8 + $0x90] ss:$24 sps:$4 sm:$0xff]  }
  0x84   : > { %805 = vmatpush1.bf16.msra.mxu0 %v3614_v30  ;;  %918 = vmatpush1.bf16.msra.mxu1 %v3615_v31  ;;  %v3673_v24 = vld [vmem:[%s4338_s8 + $0x34] ss:$8 sps:$4 sm:$0xff]   ;;  %v3720_v27 = vld [vmem:[#allocation8 + $0x64] ss:$24 sps:$4 sm:$0xff]   ;;  %v3675_v30 = vld [vmem:[%s4338_s8 + $0x30] ss:$8 sps:$4 sm:$0xff]  }
  0x85   : > { %806 = vmatprep.subr.bf16.mxu0 %v3616_v32  ;;  %919 = vmatprep.subr.bf16.mxu1 %v3618_v33  ;;  %v3715_v26 = vld [vmem:[#allocation8 + $0x390] ss:$24 sps:$4 sm:$0xff]   ;;  %v3723_v28 = vld [vmem:[#allocation8 + $0x364] ss:$24 sps:$4 sm:$0xff]   ;;  %v3718_v29 = vld [vmem:[#allocation8 + $0x60] ss:$24 sps:$4 sm:$0xff]  }
  0x86   : > { %v3721_v31 = vld [vmem:[#allocation8 + $0x360] ss:$24 sps:$4 sm:$0xff]   ;;  %v3726_v33 = vld [vmem:[#allocation8 + $0x34] ss:$24 sps:$4 sm:$0xff]   ;;  %v3747_v48 = vld [vmem:[#allocation8 + $0x5a4] ss:$24 sps:$4 sm:$0xff]  }
  0x87   : > { %v3676_v32 = vld [vmem:[%s4338_s8 + $0x44] ss:$8 sps:$4 sm:$0xff]   ;;  %s3481_s15 = smul.u32 768, %s4334_s7  ;;  %p4915_p6 = scmp.ne.s32.totalorder %s4907_s11, 0 }
  0x88   : > { %807 = vmatpush2.bf16.msra.mxu0 %v3620_v34  ;;  %920 = vmatpush2.bf16.msra.mxu1 %v3621_v35  ;;  %v3729_v34 = vld [vmem:[#allocation8 + $0x334] ss:$24 sps:$4 sm:$0xff]   ;;  %v3724_v35 = vld [vmem:[#allocation8 + $0x30] ss:$24 sps:$4 sm:$0xff]   ;;  %s3482_s23 = smul.u32 12288, %s4220_s22  ;;  %s3071_s22 = scalar_lea.sflag [#allocation4], %s4334_s7 }
  0x89   : > { %808 = vmatprep.subr.bf16.mxu0 %v3622_v36  ;;  %921 = vmatprep.subr.bf16.mxu1 %v3624_v37  ;;  %v3727_v36 = vld [vmem:[#allocation8 + $0x330] ss:$24 sps:$4 sm:$0xff]   ;;  %v3732_v37 = vld [vmem:[#allocation8 + $0x4] ss:$24 sps:$4 sm:$0xff]   ;;  %s4632_s17 = scalar_lea.vmem [#allocation10], %s3481_s15  ;;  %s4166_s28 = smov [#allocation10]  }
  0x8a   : > { %s3085_s27 = sshll.u32 %s4632_s17, 4  ;;  %s4845_s14 = scalar_lea.hbm %s4897_s5, %s3482_s23  ;;  %s4848_s27 = int_to_ptr.vmem [resolvable:$true] %s3085_s27 }
  0x8b   : > { %s4082_s16 = scalar_lea.vmem %s4848_s27, 12288  ;;  %s4086_s30 = sshll.u32 %s4166_s28, 4  ;;  %s4087_s30 = int_to_ptr.vmem [resolvable:$false] %s4086_s30 }
  0x8c   : > { %809 = vmatpush2.bf16.msra.mxu0 %v3626_v38  ;;  %922 = vmatpush2.bf16.msra.mxu1 %v3627_v39  ;;  %v3735_v38 = vld [vmem:[#allocation8 + $0x304] ss:$24 sps:$4 sm:$0xff]   ;;  %v3730_v39 = vld [vmem:[#allocation8] ss:$24 sps:$4 sm:$0xff]   ;;  %p4083_p4 = scmp.ne.s32.totalorder %s4848_s27, %s4082_s16  ;;  %s4088_s9 = scalar_lea.vmem %s4087_s30, 24576 }
  0x8d   : > { %810 = vmatprep.subr.bf16.mxu0 %v3628_v40  ;;  %923 = vmatprep.subr.bf16.mxu1 %v3630_v41  ;;  %v3733_v40 = vld [vmem:[#allocation8 + $0x300] ss:$24 sps:$4 sm:$0xff]   ;;  %v3738_v41 = vld [vmem:[#allocation8 + $0x2d4] ss:$24 sps:$4 sm:$0xff]   ;;  %p4089_p5 = scmp.lt.s32.totalorder %s4848_s27, %s4087_s30  ;;  %p4090_p3 = scmp.lt.s32.totalorder %s4088_s9, %s4082_s16 }
  0x8e   : > { %p4084_p12 = pnand %p4083_p4, %p4915_p6 }
  0x8f   : > { %p4091_p7 = por %p4090_p3, %p4089_p5 }
  0x90   : > { %811 = vmatpush2.bf16.msra.mxu0 %v3632_v42  ;;  %924 = vmatpush2.bf16.msra.mxu1 %v3633_v43  ;;  %v3741_v42 = vld [vmem:[#allocation8 + $0x5d4] ss:$24 sps:$4 sm:$0xff]   ;;  %v3678_v43 = vld [vmem:[%s4338_s8 + $0x40] ss:$8 sps:$4 sm:$0xff]   ;;  %p4085_p0 = pneg %p4084_p12 }
  0x91   : > { %812 = vmatprep.subr.bf16.mxu0 %v3634_v44  ;;  %925 = vmatprep.subr.bf16.mxu1 %v3636_v45  ;;  %v3679_v44 = vld [vmem:[%s4338_s8 + $0x54] ss:$8 sps:$4 sm:$0xff]  }
  0x92   : > { %v3736_v45 = vld [vmem:[#allocation8 + $0x2d0] ss:$24 sps:$4 sm:$0xff]   ;;  %p4092_p9 = pnand %p4091_p7, %p4085_p0 }
  0x94   : > { %813 = vmatpush2.bf16.msra.mxu0 %v3638_v46  ;;  %926 = vmatpush2.bf16.msra.mxu1 %v3639_v47  ;;  %v3739_v46 = vld [vmem:[#allocation8 + $0x5d0] ss:$24 sps:$4 sm:$0xff]   ;;  %v3744_v47 = vld [vmem:[#allocation8 + $0x2a4] ss:$24 sps:$4 sm:$0xff]  }
  0x95   : > { %814 = vmatprep.subr.bf16.mxu0 %v3640_v49  ;;  %927 = vmatprep.subr.bf16.mxu1 %v3642_v50  ;;  %v3742_v49 = vld [vmem:[#allocation8 + $0x2a0] ss:$24 sps:$4 sm:$0xff]  }
  0x96   : > { %v3745_v50 = vld [vmem:[#allocation8 + $0x5a0] ss:$24 sps:$4 sm:$0xff]  }
  0x98   : > { %815 = vmatpush2.bf16.msra.mxu0 %v3644_v51  ;;  %928 = vmatpush2.bf16.msra.mxu1 %v3645_v52  ;;  %v3750_v51 = vld [vmem:[#allocation8 + $0x274] ss:$24 sps:$4 sm:$0xff]  }
  0x99   : > { %816 = vmatprep.subr.bf16.mxu0 %v3646_v53  ;;  %929 = vmatprep.subr.bf16.mxu1 %v3648_v54  ;;  %v3753_v52 = vld [vmem:[#allocation8 + $0x574] ss:$24 sps:$4 sm:$0xff]   ;;  %v3682_v54 = vld [vmem:[%s4338_s8 + $0x64] ss:$8 sps:$4 sm:$0xff]  }
  0x9a   : > { %v3681_v53 = vld [vmem:[%s4338_s8 + $0x50] ss:$8 sps:$4 sm:$0xff]  }
  0x9c   : > { %817 = vmatpush2.bf16.msra.mxu0 %v3650_v55  ;;  %930 = vmatpush2.bf16.msra.mxu1 %v3651_v56  ;;  %v3748_v55 = vld [vmem:[#allocation8 + $0x270] ss:$24 sps:$4 sm:$0xff]  }
  0x9d   : > { %818 = vmatprep.subr.bf16.mxu0 %v3652_v57  ;;  %931 = vmatprep.subr.bf16.mxu1 %v3654_v58  ;;  %v3751_v56 = vld [vmem:[#allocation8 + $0x570] ss:$24 sps:$4 sm:$0xff]   ;;  %v3756_v57 = vld [vmem:[#allocation8 + $0x244] ss:$24 sps:$4 sm:$0xff]  }
  0x9e   : > { %v3759_v58 = vld [vmem:[#allocation8 + $0x544] ss:$24 sps:$4 sm:$0xff]  }
  0xa0   : > { %819 = vmatpush2.bf16.msra.mxu0 %v3656_v59  ;;  %932 = vmatpush2.bf16.msra.mxu1 %v3657_v60  ;;  %v3754_v59 = vld [vmem:[#allocation8 + $0x240] ss:$24 sps:$4 sm:$0xff]  }
  0xa1   : > { %820 = vmatprep.subr.bf16.mxu0 %v3658_v61  ;;  %933 = vmatprep.subr.bf16.mxu1 %v3660_v62  ;;  %v3757_v60 = vld [vmem:[#allocation8 + $0x540] ss:$24 sps:$4 sm:$0xff]   ;;  %v3762_v61 = vld [vmem:[#allocation8 + $0x214] ss:$24 sps:$4 sm:$0xff]  }
  0xa2   : > { %v3765_v62 = vld [vmem:[#allocation8 + $0x514] ss:$24 sps:$4 sm:$0xff]  }
  0xa4   : > { %821 = vmatpush2.bf16.msra.mxu0 %v3662_v63  ;;  %934 = vmatpush2.bf16.msra.mxu1 %v3663_v0  ;;  %v3684_v63 = vld [vmem:[%s4338_s8 + $0x60] ss:$8 sps:$4 sm:$0xff]   ;;  %v3685_v0 = vld [vmem:[%s4338_s8 + $0x74] ss:$8 sps:$4 sm:$0xff]  }
  0xa5   : > { %2296 = vmatprep.subr.bf16.mxu0 %v3690_v1  ;;  %2409 = vmatprep.subr.bf16.mxu1 %v3693_v2  ;;  %v3760_v1 = vld [vmem:[#allocation8 + $0x210] ss:$24 sps:$4 sm:$0xff]  }
  0xa6   : > { %v3763_v2 = vld [vmem:[#allocation8 + $0x510] ss:$24 sps:$4 sm:$0xff]  }
  0xa7   : > { %823 = vmatmul.mubr.bf16.vlgmr.msra.gmra.mxu0 %v3664_v3  ;;  %936 = vmatmul.mubr.bf16.vlgmr.msra.gmra.mxu1 %v3664_v3  ;;  %v3687_v3 = vld [vmem:[%s4338_s8 + $0x70] ss:$8 sps:$4 sm:$0xff]  }
  0xa8   : > { %832 = vmatprep.mubr.bf16.mxu0 %v3667_v4  ;;  %945 = vmatprep.mubr.bf16.mxu1 %v3667_v4  ;;  %v3768_v4 = vld [vmem:[#allocation8 + $0x1e4] ss:$24 sps:$4 sm:$0xff]  }
  0xa9   : > { %2297 = vmatpush1.bf16.msra.mxu0 %v3688_v5  ;;  %2410 = vmatpush1.bf16.msra.mxu1 %v3691_v6  ;;  %v3771_v5 = vld [vmem:[#allocation8 + $0x4e4] ss:$24 sps:$4 sm:$0xff]   ;;  %v3766_v6 = vld [vmem:[#allocation8 + $0x1e0] ss:$24 sps:$4 sm:$0xff]  }
  0xaa   : > { %2298 = vmatprep.subr.bf16.mxu0 %v3696_v7  ;;  %2411 = vmatprep.subr.bf16.mxu1 %v3699_v8  ;;  %v3769_v7 = vld [vmem:[#allocation8 + $0x4e0] ss:$24 sps:$4 sm:$0xff]   ;;  %v3774_v8 = vld [vmem:[#allocation8 + $0x1b4] ss:$24 sps:$4 sm:$0xff]  }
  0xad   : > { %2299 = vmatpush1.bf16.msra.mxu0 %v3694_v9  ;;  %2412 = vmatpush1.bf16.msra.mxu1 %v3697_v10  ;;  %v3777_v9 = vld [vmem:[#allocation8 + $0x4b4] ss:$24 sps:$4 sm:$0xff]   ;;  %v3772_v10 = vld [vmem:[#allocation8 + $0x1b0] ss:$24 sps:$4 sm:$0xff]  }
  0xae   : > { %2300 = vmatprep.subr.bf16.mxu0 %v3702_v11  ;;  %2413 = vmatprep.subr.bf16.mxu1 %v3705_v12  ;;  %v3775_v11 = vld [vmem:[#allocation8 + $0x4b0] ss:$24 sps:$4 sm:$0xff]   ;;  %v3780_v12 = vld [vmem:[#allocation8 + $0x184] ss:$24 sps:$4 sm:$0xff]  }
  0xaf   : > { %833 = vmatmul.mubr.bf16.gmra.mxu0 %v3669_v13  ;;  %946 = vmatmul.mubr.bf16.gmra.mxu1 %v3669_v13  ;;  %v3783_v13 = vld [vmem:[#allocation8 + $0x484] ss:$24 sps:$4 sm:$0xff]  }
  0xb0   : > { %842 = vmatprep.mubr.bf16.mxu0 %v3670_v14  ;;  %955 = vmatprep.mubr.bf16.mxu1 %v3670_v14  ;;  %v3778_v14 = vld [vmem:[#allocation8 + $0x180] ss:$24 sps:$4 sm:$0xff]  }
  0xb1   : > { %2301 = vmatpush1.bf16.msra.mxu0 %v3700_v15  ;;  %2414 = vmatpush1.bf16.msra.mxu1 %v3703_v16  ;;  %v3781_v15 = vld [vmem:[#allocation8 + $0x480] ss:$24 sps:$4 sm:$0xff]   ;;  %v3786_v16 = vld [vmem:[#allocation8 + $0x15c] ss:$24 sps:$4 sm:$0xff]  }
  0xb2   : > { %2302 = vmatprep.subr.bf16.mxu0 %v3708_v17  ;;  %2415 = vmatprep.subr.bf16.mxu1 %v3711_v18  ;;  %v3789_v17 = vld [vmem:[#allocation8 + $0x45c] ss:$24 sps:$4 sm:$0xff]   ;;  %v370_v18 = vlaneseq }
  0xb5   : > { %2303 = vmatpush1.bf16.msra.mxu0 %v3706_v19  ;;  %2416 = vmatpush1.bf16.msra.mxu1 %v3709_v20  ;;  %v4368_v19 = vshrl.u32 %v370_v18, 7 }
  0xb6   : > { %2304 = vmatprep.subr.bf16.mxu0 %v3714_v21  ;;  %2417 = vmatprep.subr.bf16.mxu1 %v3717_v22 }
  0xb7   : > { %843 = vmatmul.mubr.bf16.gmra.mxu0 %v3672_v23  ;;  %956 = vmatmul.mubr.bf16.gmra.mxu1 %v3672_v23  ;;  %v376_v20 = vsub.s32 1, %v4368_v19  ;;  %v384_v21 = vsub.s32 3, %v4368_v19  ;;  %v372_v22 = vsub.s32 0, %v4368_v19  ;;  %v380_v23 = vsub.s32 2, %v4368_v19 }
  0xb8   : > { %852 = vmatprep.mubr.bf16.mxu0 %v3673_v24  ;;  %965 = vmatprep.mubr.bf16.mxu1 %v3673_v24  ;;  %v368_v24 = vld [vmem:[#allocation7] sm:$0xf] }
  0xb9   : > { %2305 = vmatpush1.bf16.msra.mxu0 %v3712_v25  ;;  %2418 = vmatpush1.bf16.msra.mxu1 %v3715_v26 }
  0xba   : > { %2306 = vmatprep.subr.bf16.mxu0 %v3720_v27  ;;  %2419 = vmatprep.subr.bf16.mxu1 %v3723_v28  ;;  %v4376_v27 = vrot.slane %v368_v24, %v376_v20  ;;  %v4380_v28 = vrot.slane %v368_v24, %v384_v21 }
  0xbd   : > { %2307 = vmatpush1.bf16.msra.mxu0 %v3718_v29  ;;  %2420 = vmatpush1.bf16.msra.mxu1 %v3721_v31  ;;  %v4384_v29 = vrot.slane %v368_v24, %v372_v22 }
  0xbe   : > { %2308 = vmatprep.subr.bf16.mxu0 %v3726_v33  ;;  %2421 = vmatprep.subr.bf16.mxu1 %v3729_v34 }
  0xbf   : > { %853 = vmatmul.mubr.bf16.gmra.mxu0 %v3675_v30  ;;  %966 = vmatmul.mubr.bf16.gmra.mxu1 %v3675_v30  ;;  %v4388_v30 = vrot.slane %v368_v24, %v380_v23  ;;  %v3798_v24 = vld [vmem:[#allocation8 + $0xfc] ss:$24 sps:$4 sm:$0xff]  }
  0xc0   : > { %862 = vmatprep.mubr.bf16.mxu0 %v3676_v32  ;;  %975 = vmatprep.mubr.bf16.mxu1 %v3676_v32 }
  0xc1   : > { %2309 = vmatpush1.bf16.msra.mxu0 %v3724_v35  ;;  %2422 = vmatpush1.bf16.msra.mxu1 %v3727_v36 }
  0xc2   : > { %2310 = vmatprep.subr.bf16.mxu0 %v3732_v37  ;;  %2423 = vmatprep.subr.bf16.mxu1 %v3735_v38 }
  0xc5   : > { %2311 = vmatpush1.bf16.msra.mxu0 %v3730_v39  ;;  %2424 = vmatpush1.bf16.msra.mxu1 %v3733_v40 }
  0xc6   : > { %2312 = vmatprep.subr.bf16.mxu0 %v3738_v41  ;;  %2425 = vmatprep.subr.bf16.mxu1 %v3741_v42 }
  0xc7   : > { %863 = vmatmul.mubr.bf16.gmra.mxu0 %v3678_v43  ;;  %976 = vmatmul.mubr.bf16.gmra.mxu1 %v3678_v43 }
  0xc8   : > { %872 = vmatprep.mubr.bf16.mxu0 %v3679_v44  ;;  %985 = vmatprep.mubr.bf16.mxu1 %v3679_v44 }
  0xc9   : > { %2313 = vmatpush2.bf16.msra.mxu0 %v3736_v45  ;;  %2426 = vmatpush2.bf16.msra.mxu1 %v3739_v46 }
  0xca   : > { %2314 = vmatprep.subr.bf16.mxu0 %v3744_v47  ;;  %2427 = vmatprep.subr.bf16.mxu1 %v3747_v48 }
  0xcd   : > { %2315 = vmatpush2.bf16.msra.mxu0 %v3742_v49  ;;  %2428 = vmatpush2.bf16.msra.mxu1 %v3745_v50 }
  0xce   : > { %2316 = vmatprep.subr.bf16.mxu0 %v3750_v51  ;;  %2429 = vmatprep.subr.bf16.mxu1 %v3753_v52 }
  0xcf   : > { %873 = vmatmul.mubr.bf16.gmra.mxu0 %v3681_v53  ;;  %986 = vmatmul.mubr.bf16.gmra.mxu1 %v3681_v53 }
  0xd0   : > { %882 = vmatprep.mubr.bf16.mxu0 %v3682_v54  ;;  %995 = vmatprep.mubr.bf16.mxu1 %v3682_v54 }
  0xd1   : > { %2317 = vmatpush2.bf16.msra.mxu0 %v3748_v55  ;;  %2430 = vmatpush2.bf16.msra.mxu1 %v3751_v56 }
  0xd2   : > { %2318 = vmatprep.subr.bf16.mxu0 %v3756_v57  ;;  %2431 = vmatprep.subr.bf16.mxu1 %v3759_v58 }
  0xd5   : > { %2319 = vmatpush2.bf16.msra.mxu0 %v3754_v59  ;;  %2432 = vmatpush2.bf16.msra.mxu1 %v3757_v60  ;;  %v3784_v59 = vld [vmem:[#allocation8 + $0x158] ss:$24 sps:$4 sm:$0xff]  }
  0xd6   : > { %2320 = vmatprep.subr.bf16.mxu0 %v3762_v61  ;;  %2433 = vmatprep.subr.bf16.mxu1 %v3765_v62  ;;  %v3787_v60 = vld [vmem:[#allocation8 + $0x458] ss:$24 sps:$4 sm:$0xff]  }
  0xd7   : > { %883 = vmatmul.mubr.bf16.gmra.mxu0 %v3684_v63  ;;  %996 = vmatmul.mubr.bf16.gmra.mxu1 %v3684_v63 }
  0xd8   : > { %892 = vmatprep.mubr.bf16.mxu0 %v3685_v0  ;;  %1005 = vmatprep.mubr.bf16.mxu1 %v3685_v0 }
  0xd9   : > { %2321 = vmatpush2.bf16.msra.mxu0 %v3760_v1  ;;  %2434 = vmatpush2.bf16.msra.mxu1 %v3763_v2  ;;  %v3792_v1 = vld [vmem:[#allocation8 + $0x12c] ss:$24 sps:$4 sm:$0xff]  }
  0xda   : > { %2322 = vmatprep.subr.bf16.mxu0 %v3768_v4  ;;  %2435 = vmatprep.subr.bf16.mxu1 %v3771_v5  ;;  %v3795_v2 = vld [vmem:[#allocation8 + $0x42c] ss:$24 sps:$4 sm:$0xff]  }
  0xdd   : > { %2323 = vmatpush2.bf16.msra.mxu0 %v3766_v6  ;;  %2436 = vmatpush2.bf16.msra.mxu1 %v3769_v7 }
  0xde   : > { %2324 = vmatprep.subr.bf16.mxu0 %v3774_v8  ;;  %2437 = vmatprep.subr.bf16.mxu1 %v3777_v9 }
  0xdf   : > { %893 = vmatmul.mubr.bf16.gmra.mxu0 %v3687_v3  ;;  %1006 = vmatmul.mubr.bf16.gmra.mxu1 %v3687_v3 }
  0xe1   : > { %2325 = vmatpush2.bf16.msra.mxu0 %v3772_v10  ;;  %2438 = vmatpush2.bf16.msra.mxu1 %v3775_v11 }
  0xe2   : > { %2326 = vmatprep.subr.bf16.mxu0 %v3780_v12  ;;  %2439 = vmatprep.subr.bf16.mxu1 %v3783_v13  ;;  %v3790_v13 = vld [vmem:[#allocation8 + $0x128] ss:$24 sps:$4 sm:$0xff]  }
  0xe5   : > { %2327 = vmatpush2.bf16.msra.mxu0 %v3778_v14  ;;  %2440 = vmatpush2.bf16.msra.mxu1 %v3781_v15  ;;  %v3793_v14 = vld [vmem:[#allocation8 + $0x428] ss:$24 sps:$4 sm:$0xff]  }
  0xe6   : > { %2522 = vmatprep.subr.bf16.mxu0 %v3786_v16  ;;  %2635 = vmatprep.subr.bf16.mxu1 %v3789_v17 }
 0x167   : > { %v824_v25 = vpop.f32.mrf.mxu0  ;;  %v937_v26 = vpop.f32.mrf.mxu1 }
 0x168   : > { %v825_v39 = vadd.f32 %v824_v25, %v4384_v29  ;;  %v938_v40 = vadd.f32 %v937_v26, %v4388_v30  ;;  %v3801_v25 = vld [vmem:[#allocation8 + $0x3fc] ss:$24 sps:$4 sm:$0xff]  }
 0x169   : > { %v826_v31 = vpop.f32.mrf.mxu0  ;;  %v939_v32 = vpop.f32.mrf.mxu1 }
 0x16a   : > { %v827_v35 = vadd.f32 %v826_v31, %v4376_v27  ;;  %v940_v36 = vadd.f32 %v939_v32, %v4380_v28  ;;  %v1016_v53 = vmax.f32 %v825_v39, 0.0  ;;  %v1018_v54 = vmax.f32 %v938_v40, 0.0  ;;  %v3796_v39 = vld [vmem:[#allocation8 + $0xf8] ss:$24 sps:$4 sm:$0xff]  }
 0x16b   : > { %v828_v33 = vpop.f32.mrf.mxu0  ;;  %v941_v34 = vpop.f32.mrf.mxu1 }
 0x16c   : > { %v829_v37 = vadd.f32 %v828_v33, %v4384_v29  ;;  %v942_v38 = vadd.f32 %v941_v34, %v4388_v30  ;;  %v1017_v49 = vmax.f32 %v827_v35, 0.0  ;;  %v1019_v50 = vmax.f32 %v940_v36, 0.0 }
 0x16d   : > { %v830_v41 = vpop.f32.mrf.mxu0  ;;  %v943_v42 = vpop.f32.mrf.mxu1 }
 0x16e   : > { %v831_v43 = vadd.f32 %v830_v41, %v4376_v27  ;;  %v944_v44 = vadd.f32 %v943_v42, %v4380_v28  ;;  %v1020_v45 = vmax.f32 %v829_v37, 0.0  ;;  %v1022_v46 = vmax.f32 %v942_v38, 0.0 }
 0x16f   : > { %v834_v47 = vpop.f32.mrf.mxu0  ;;  %v947_v48 = vpop.f32.mrf.mxu1 }
 0x170   : > { %v1021_v51 = vmax.f32 %v831_v43, 0.0  ;;  %v1023_v52 = vmax.f32 %v944_v44, 0.0  ;;  %v4402_v61 = vpack.c.bf16 %v1020_v45, %v1016_v53  ;;  %v4404_v62 = vpack.c.bf16 %v1022_v46, %v1018_v54  ;;  %v3799_v45 = vld [vmem:[#allocation8 + $0x3f8] ss:$24 sps:$4 sm:$0xff]   ;;  %v3804_v46 = vld [vmem:[#allocation8 + $0xcc] ss:$24 sps:$4 sm:$0xff]  }
 0x171   : > { %v836_v55 = vpop.f32.mrf.mxu0  ;;  %v949_v56 = vpop.f32.mrf.mxu1  ;;  %v835_v6 = vadd.f32 %v834_v47, %v4384_v29  ;;  %v948_v7 = vadd.f32 %v947_v48, %v4388_v30 }
 0x172   : > { %v4398_v57 = vpack.c.bf16 %v1021_v51, %v1017_v49  ;;  %v4400_v58 = vpack.c.bf16 %v1023_v52, %v1019_v50  ;;  %v837_v3 = vadd.f32 %v836_v55, %v4376_v27  ;;  %v950_v8 = vadd.f32 %v949_v56, %v4380_v28  ;;  %v3807_v51 = vld [vmem:[#allocation8 + $0x3cc] ss:$24 sps:$4 sm:$0xff]  }
 0x173   : > { %v838_v63 = vpop.f32.mrf.mxu0  ;;  %v951_v0 = vpop.f32.mrf.mxu1  ;;  %v1024_v33 = vmax.f32 %v835_v6, 0.0  ;;  %v1026_v34 = vmax.f32 %v948_v7, 0.0 }
 0x174   : > { %v839_v4 = vadd.f32 %v838_v63, %v4384_v29  ;;  %v952_v5 = vadd.f32 %v951_v0, %v4388_v30  ;;  %2328 = vmatprep.mubr.bf16.mxu0 %v4398_v57  ;;  %2441 = vmatprep.mubr.bf16.mxu1 %v4400_v58  ;;  %v1025_v26 = vmax.f32 %v837_v3, 0.0  ;;  %v1027_v35 = vmax.f32 %v950_v8, 0.0  ;;  %v3805_v3 = vld [vmem:[#allocation8 + $0x3c8] ss:$24 sps:$4 sm:$0xff]  }
 0x175   : > { %v840_v9 = vpop.f32.mrf.mxu0  ;;  %v953_v10 = vpop.f32.mrf.mxu1  ;;  %2329 = vmatmul.mubr.bf16.vlgmr.msra.gmra.mxu0 %v4402_v61  ;;  %2442 = vmatmul.mubr.bf16.vlgmr.msra.gmra.mxu1 %v4404_v62 }
 0x176   : > { %v841_v11 = vadd.f32 %v840_v9, %v4376_v27  ;;  %v954_v12 = vadd.f32 %v953_v10, %v4380_v28  ;;  %2523 = vmatpush1.bf16.msra.mxu0 %v3784_v59  ;;  %2636 = vmatpush1.bf16.msra.mxu1 %v3787_v60  ;;  %v1028_v15 = vmax.f32 %v839_v4, 0.0  ;;  %v1030_v16 = vmax.f32 %v952_v5, 0.0  ;;  %v3802_v60 = vld [vmem:[#allocation8 + $0xc8] ss:$24 sps:$4 sm:$0xff]   ;;  %v3810_v4 = vld [vmem:[#allocation8 + $0x9c] ss:$24 sps:$4 sm:$0xff]  }
 0x177   : > { %v844_v17 = vpop.f32.mrf.mxu0  ;;  %v957_v18 = vpop.f32.mrf.mxu1  ;;  %2524 = vmatprep.subr.bf16.mxu0 %v3792_v1  ;;  %2637 = vmatprep.subr.bf16.mxu1 %v3795_v2 }
 0x178   : > { %v1029_v31 = vmax.f32 %v841_v11, 0.0  ;;  %v1031_v32 = vmax.f32 %v954_v12, 0.0  ;;  %v4420_v40 = vpack.c.bf16 %v1028_v15, %v1024_v33  ;;  %v4422_v41 = vpack.c.bf16 %v1030_v16, %v1026_v34  ;;  %v3808_v16 = vld [vmem:[#allocation8 + $0x98] ss:$24 sps:$4 sm:$0xff]  }
 0x179   : > { %v846_v36 = vpop.f32.mrf.mxu0  ;;  %v959_v37 = vpop.f32.mrf.mxu1  ;;  %v845_v52 = vadd.f32 %v844_v17, %v4384_v29  ;;  %v958_v53 = vadd.f32 %v957_v18, %v4388_v30 }
 0x17a   : > { %2525 = vmatpush1.bf16.msra.mxu0 %v3790_v13  ;;  %2638 = vmatpush1.bf16.msra.mxu1 %v3793_v14  ;;  %v4418_v38 = vpack.c.bf16 %v1029_v31, %v1025_v26  ;;  %v4424_v44 = vpack.c.bf16 %v1031_v32, %v1027_v35  ;;  %v847_v47 = vadd.f32 %v846_v36, %v4376_v27  ;;  %v3813_v13 = vld [vmem:[#allocation8 + $0x39c] ss:$24 sps:$4 sm:$0xff]   ;;  %v3811_v31 = vld [vmem:[#allocation8 + $0x398] ss:$24 sps:$4 sm:$0xff]   ;;  %v3816_v32 = vld [vmem:[#allocation8 + $0x6c] ss:$24 sps:$4 sm:$0xff]  }
 0x17b   : > { %v848_v42 = vpop.f32.mrf.mxu0  ;;  %v961_v43 = vpop.f32.mrf.mxu1  ;;  %2526 = vmatprep.subr.bf16.mxu0 %v3798_v24  ;;  %2639 = vmatprep.subr.bf16.mxu1 %v3801_v25  ;;  %v960_v48 = vadd.f32 %v959_v37, %v4380_v28  ;;  %v1032_v9 = vmax.f32 %v845_v52, 0.0  ;;  %v1034_v10 = vmax.f32 %v958_v53, 0.0  ;;  %v3819_v36 = vld [vmem:[#allocation8 + $0x36c] ss:$24 sps:$4 sm:$0xff]   ;;  %v3817_v52 = vld [vmem:[#allocation8 + $0x368] ss:$24 sps:$4 sm:$0xff]  }
 0x17c   : > { %v849_v49 = vadd.f32 %v848_v42, %v4384_v29  ;;  %v962_v50 = vadd.f32 %v961_v43, %v4388_v30  ;;  %2338 = vmatprep.mubr.bf16.mxu0 %v4418_v38  ;;  %2451 = vmatprep.mubr.bf16.mxu1 %v4424_v44  ;;  %v1033_v5 = vmax.f32 %v847_v47, 0.0  ;;  %v3814_v47 = vld [vmem:[#allocation8 + $0x68] ss:$24 sps:$4 sm:$0xff]   ;;  %v3822_v53 = vld [vmem:[#allocation8 + $0x3c] ss:$24 sps:$4 sm:$0xff]  }
 0x17d   : > { %v850_v54 = vpop.f32.mrf.mxu0  ;;  %v963_v55 = vpop.f32.mrf.mxu1  ;;  %2339 = vmatmul.mubr.bf16.gmra.mxu0 %v4420_v40  ;;  %2452 = vmatmul.mubr.bf16.gmra.mxu1 %v4422_v41  ;;  %v1035_v6 = vmax.f32 %v960_v48, 0.0 }
 0x17e   : > { %v851_v56 = vadd.f32 %v850_v54, %v4376_v27  ;;  %v964_v59 = vadd.f32 %v963_v55, %v4380_v28  ;;  %2527 = vmatpush1.bf16.msra.mxu0 %v3796_v39  ;;  %v1036_v63 = vmax.f32 %v849_v49, 0.0  ;;  %v1038_v0 = vmax.f32 %v962_v50, 0.0  ;;  %2640 = vmatpush1.bf16.msra.mxu1 %v3799_v45 }
 0x17f   : > { %v854_v1 = vpop.f32.mrf.mxu0  ;;  %v967_v2 = vpop.f32.mrf.mxu1  ;;  %2528 = vmatprep.subr.bf16.mxu0 %v3804_v46  ;;  %2641 = vmatprep.subr.bf16.mxu1 %v3807_v51 }
 0x180   : > { %v1037_v7 = vmax.f32 %v851_v56, 0.0  ;;  %v1039_v8 = vmax.f32 %v964_v59, 0.0  ;;  %v4442_v17 = vpack.c.bf16 %v1036_v63, %v1032_v9  ;;  %v4444_v18 = vpack.c.bf16 %v1038_v0, %v1034_v10 }
 0x181   : > { %v856_v11 = vpop.f32.mrf.mxu0  ;;  %v969_v12 = vpop.f32.mrf.mxu1  ;;  %v855_v37 = vadd.f32 %v854_v1, %v4384_v29  ;;  %v968_v39 = vadd.f32 %v967_v2, %v4388_v30  ;;  %v3825_v2 = vld [vmem:[#allocation8 + $0x33c] ss:$24 sps:$4 sm:$0xff]  }
 0x182   : > { %2529 = vmatpush1.bf16.msra.mxu0 %v3802_v60  ;;  %v4438_v14 = vpack.c.bf16 %v1037_v7, %v1033_v5  ;;  %v4440_v15 = vpack.c.bf16 %v1039_v8, %v1035_v6  ;;  %v857_v24 = vadd.f32 %v856_v11, %v4376_v27  ;;  %2642 = vmatpush1.bf16.msra.mxu1 %v3805_v3  ;;  %v3820_v5 = vld [vmem:[#allocation8 + $0x38] ss:$24 sps:$4 sm:$0xff]  }
 0x183   : > { %v858_v25 = vpop.f32.mrf.mxu0  ;;  %v971_v26 = vpop.f32.mrf.mxu1  ;;  %2530 = vmatprep.subr.bf16.mxu0 %v3810_v4  ;;  %v970_v33 = vadd.f32 %v969_v12, %v4380_v28  ;;  %2643 = vmatprep.subr.bf16.mxu1 %v3813_v13  ;;  %v1040_v60 = vmax.f32 %v855_v37, 0.0  ;;  %v1042_v63 = vmax.f32 %v968_v39, 0.0  ;;  %v3823_v11 = vld [vmem:[#allocation8 + $0x338] ss:$24 sps:$4 sm:$0xff]   ;;  %v3828_v12 = vld [vmem:[#allocation8 + $0xc] ss:$24 sps:$4 sm:$0xff]  }
 0x184   : > { %v859_v34 = vadd.f32 %v858_v25, %v4384_v29  ;;  %v972_v35 = vadd.f32 %v971_v26, %v4388_v30  ;;  %2348 = vmatprep.mubr.bf16.mxu0 %v4438_v14  ;;  %2461 = vmatprep.mubr.bf16.mxu1 %v4440_v15  ;;  %v1041_v54 = vmax.f32 %v857_v24, 0.0  ;;  %v3831_v25 = vld [vmem:[#allocation8 + $0x30c] ss:$24 sps:$4 sm:$0xff]  }
 0x185   : > { %v860_v42 = vpop.f32.mrf.mxu0  ;;  %v973_v43 = vpop.f32.mrf.mxu1  ;;  %2349 = vmatmul.mubr.bf16.gmra.mxu0 %v4442_v17  ;;  %2462 = vmatmul.mubr.bf16.gmra.mxu1 %v4444_v18  ;;  %v1043_v55 = vmax.f32 %v970_v33, 0.0 }
 0x186   : > { %v861_v45 = vadd.f32 %v860_v42, %v4376_v27  ;;  %v974_v46 = vadd.f32 %v973_v43, %v4380_v28  ;;  %2531 = vmatpush1.bf16.msra.mxu0 %v3808_v16  ;;  %v1044_v48 = vmax.f32 %v859_v34, 0.0  ;;  %v1046_v49 = vmax.f32 %v972_v35, 0.0  ;;  %2644 = vmatpush1.bf16.msra.mxu1 %v3811_v31 }
 0x187   : > { %v864_v50 = vpop.f32.mrf.mxu0  ;;  %v977_v51 = vpop.f32.mrf.mxu1  ;;  %2532 = vmatprep.subr.bf16.mxu0 %v3816_v32  ;;  %2645 = vmatprep.subr.bf16.mxu1 %v3819_v36  ;;  %v3826_v36 = vld [vmem:[#allocation8 + $0x8] ss:$24 sps:$4 sm:$0xff]  }
 0x188   : > { %v1045_v56 = vmax.f32 %v861_v45, 0.0  ;;  %v1047_v59 = vmax.f32 %v974_v46, 0.0  ;;  %v4462_v6 = vpack.c.bf16 %v1044_v48, %v1040_v60  ;;  %v4464_v7 = vpack.c.bf16 %v1046_v49, %v1042_v63  ;;  %v3829_v45 = vld [vmem:[#allocation8 + $0x308] ss:$24 sps:$4 sm:$0xff]   ;;  %v3834_v46 = vld [vmem:[#allocation8 + $0x2dc] ss:$24 sps:$4 sm:$0xff]  }
 0x189   : > { %v866_v0 = vpop.f32.mrf.mxu0  ;;  %v979_v1 = vpop.f32.mrf.mxu1  ;;  %v865_v26 = vadd.f32 %v864_v50, %v4384_v29  ;;  %v978_v31 = vadd.f32 %v977_v51, %v4388_v30  ;;  %v3832_v60 = vld [vmem:[#allocation8 + $0x2d8] ss:$24 sps:$4 sm:$0xff]  }
 0x18a   : > { %2533 = vmatpush1.bf16.msra.mxu0 %v3814_v47  ;;  %v4458_v3 = vpack.c.bf16 %v1045_v56, %v1041_v54  ;;  %v4460_v4 = vpack.c.bf16 %v1047_v59, %v1043_v55  ;;  %v867_v8 = vadd.f32 %v866_v0, %v4376_v27  ;;  %2646 = vmatpush1.bf16.msra.mxu1 %v3817_v52  ;;  %v3837_v55 = vld [vmem:[#allocation8 + $0x5dc] ss:$24 sps:$4 sm:$0xff]  }
 0x18b   : > { %v868_v9 = vpop.f32.mrf.mxu0  ;;  %v981_v10 = vpop.f32.mrf.mxu1  ;;  %2534 = vmatprep.subr.bf16.mxu0 %v3822_v53  ;;  %v980_v13 = vadd.f32 %v979_v1, %v4380_v28  ;;  %2647 = vmatprep.subr.bf16.mxu1 %v3825_v2  ;;  %v1048_v51 = vmax.f32 %v865_v26, 0.0  ;;  %v1050_v52 = vmax.f32 %v978_v31, 0.0 }
 0x18c   : > { %v869_v16 = vadd.f32 %v868_v9, %v4384_v29  ;;  %v982_v24 = vadd.f32 %v981_v10, %v4388_v30  ;;  %2358 = vmatprep.mubr.bf16.mxu0 %v4458_v3  ;;  %2471 = vmatprep.mubr.bf16.mxu1 %v4460_v4  ;;  %v1049_v47 = vmax.f32 %v867_v8, 0.0  ;;  %v3835_v8 = vld [vmem:[#allocation8 + $0x5d8] ss:$24 sps:$4 sm:$0xff]   ;;  %v3840_v9 = vld [vmem:[#allocation8 + $0x2ac] ss:$24 sps:$4 sm:$0xff]  }
 0x18d   : > { %v870_v32 = vpop.f32.mrf.mxu0  ;;  %v983_v33 = vpop.f32.mrf.mxu1  ;;  %2359 = vmatmul.mubr.bf16.gmra.mxu0 %v4462_v6  ;;  %2472 = vmatmul.mubr.bf16.gmra.mxu1 %v4464_v7  ;;  %v1051_v48 = vmax.f32 %v980_v13, 0.0  ;;  %v3843_v13 = vld [vmem:[#allocation8 + $0x5ac] ss:$24 sps:$4 sm:$0xff]  }
 0x18e   : > { %v871_v34 = vadd.f32 %v870_v32, %v4376_v27  ;;  %v984_v35 = vadd.f32 %v983_v33, %v4380_v28  ;;  %2535 = vmatpush1.bf16.msra.mxu0 %v3820_v5  ;;  %v1052_v37 = vmax.f32 %v869_v16, 0.0  ;;  %v1054_v39 = vmax.f32 %v982_v24, 0.0  ;;  %2648 = vmatpush1.bf16.msra.mxu1 %v3823_v11  ;;  %v3838_v33 = vld [vmem:[#allocation8 + $0x2a8] ss:$24 sps:$4 sm:$0xff]  }
 0x18f   : > { %v874_v42 = vpop.f32.mrf.mxu0  ;;  %v987_v43 = vpop.f32.mrf.mxu1  ;;  %2536 = vmatprep.subr.bf16.mxu0 %v3828_v12  ;;  %2649 = vmatprep.subr.bf16.mxu1 %v3831_v25 }
 0x190   : > { %v1053_v49 = vmax.f32 %v871_v34, 0.0  ;;  %v1055_v50 = vmax.f32 %v984_v35, 0.0  ;;  %v4482_v63 = vpack.c.bf16 %v1052_v37, %v1048_v51  ;;  %v4484_v0 = vpack.c.bf16 %v1054_v39, %v1050_v52  ;;  %v3841_v39 = vld [vmem:[#allocation8 + $0x5a8] ss:$24 sps:$4 sm:$0xff]   ;;  %v3849_v52 = vld [vmem:[#allocation8 + $0x57c] ss:$24 sps:$4 sm:$0xff]  }
 0x191   : > { %v876_v53 = vpop.f32.mrf.mxu0  ;;  %v989_v54 = vpop.f32.mrf.mxu1  ;;  %v875_v16 = vadd.f32 %v874_v42, %v4384_v29  ;;  %v988_v24 = vadd.f32 %v987_v43, %v4388_v30  ;;  %v3846_v42 = vld [vmem:[#allocation8 + $0x27c] ss:$24 sps:$4 sm:$0xff]  }
 0x192   : > { %v4478_v56 = vpack.c.bf16 %v1053_v49, %v1049_v47  ;;  %v4480_v59 = vpack.c.bf16 %v1055_v50, %v1051_v48  ;;  %2537 = vmatpush1.bf16.msra.mxu0 %v3826_v36  ;;  %v877_v1 = vadd.f32 %v876_v53, %v4376_v27  ;;  %2650 = vmatpush1.bf16.msra.mxu1 %v3829_v45 }
 0x193   : > { %v878_v2 = vpop.f32.mrf.mxu0  ;;  %v991_v5 = vpop.f32.mrf.mxu1  ;;  %2538 = vmatprep.subr.bf16.mxu0 %v3834_v46  ;;  %v990_v10 = vadd.f32 %v989_v54, %v4380_v28  ;;  %2651 = vmatprep.subr.bf16.mxu1 %v3837_v55  ;;  %v1056_v48 = vmax.f32 %v875_v16, 0.0  ;;  %v1058_v49 = vmax.f32 %v988_v24, 0.0  ;;  %v3844_v55 = vld [vmem:[#allocation8 + $0x278] ss:$24 sps:$4 sm:$0xff]   ;;  %v3855_v16 = vld [vmem:[#allocation8 + $0x54c] ss:$24 sps:$4 sm:$0xff]  }
 0x194   : > { %v879_v11 = vadd.f32 %v878_v2, %v4384_v29  ;;  %v992_v12 = vadd.f32 %v991_v5, %v4388_v30  ;;  %2368 = vmatprep.mubr.bf16.mxu0 %v4478_v56  ;;  %2481 = vmatprep.mubr.bf16.mxu1 %v4480_v59  ;;  %v1057_v43 = vmax.f32 %v877_v1, 0.0 }
 0x195   : > { %v880_v25 = vpop.f32.mrf.mxu0  ;;  %v993_v26 = vpop.f32.mrf.mxu1  ;;  %2369 = vmatmul.mubr.bf16.gmra.mxu0 %v4482_v63  ;;  %2482 = vmatmul.mubr.bf16.gmra.mxu1 %v4484_v0  ;;  %v1059_v45 = vmax.f32 %v990_v10, 0.0  ;;  %v3852_v10 = vld [vmem:[#allocation8 + $0x24c] ss:$24 sps:$4 sm:$0xff]  }
 0x196   : > { %v881_v31 = vadd.f32 %v880_v25, %v4376_v27  ;;  %v994_v32 = vadd.f32 %v993_v26, %v4380_v28  ;;  %2539 = vmatpush2.bf16.msra.mxu0 %v3832_v60  ;;  %v1060_v34 = vmax.f32 %v879_v11, 0.0  ;;  %v1062_v35 = vmax.f32 %v992_v12, 0.0  ;;  %2652 = vmatpush2.bf16.msra.mxu1 %v3835_v8 }
 0x197   : > { %v884_v36 = vpop.f32.mrf.mxu0  ;;  %v997_v37 = vpop.f32.mrf.mxu1  ;;  %2540 = vmatprep.subr.bf16.mxu0 %v3840_v9  ;;  %2653 = vmatprep.subr.bf16.mxu1 %v3843_v13  ;;  %v3847_v9 = vld [vmem:[#allocation8 + $0x578] ss:$24 sps:$4 sm:$0xff]  }
 0x198   : > { %v1061_v46 = vmax.f32 %v881_v31, 0.0  ;;  %v1063_v47 = vmax.f32 %v994_v32, 0.0  ;;  %v4502_v60 = vpack.c.bf16 %v1060_v34, %v1056_v48  ;;  %v4504_v2 = vpack.c.bf16 %v1062_v35, %v1058_v49  ;;  %v3850_v34 = vld [vmem:[#allocation8 + $0x248] ss:$24 sps:$4 sm:$0xff]  }
 0x199   : > { %v886_v50 = vpop.f32.mrf.mxu0  ;;  %v999_v51 = vpop.f32.mrf.mxu1  ;;  %v885_v24 = vadd.f32 %v884_v36, %v4384_v29  ;;  %v998_v25 = vadd.f32 %v997_v37, %v4388_v30  ;;  %v3853_v37 = vld [vmem:[#allocation8 + $0x548] ss:$24 sps:$4 sm:$0xff]  }
 0x19a   : > { %v4498_v53 = vpack.c.bf16 %v1061_v46, %v1057_v43  ;;  %v4500_v54 = vpack.c.bf16 %v1063_v47, %v1059_v45  ;;  %2541 = vmatpush2.bf16.msra.mxu0 %v3838_v33  ;;  %v887_v1 = vadd.f32 %v886_v50, %v4376_v27  ;;  %2654 = vmatpush2.bf16.msra.mxu1 %v3841_v39  ;;  %v3858_v43 = vld [vmem:[#allocation8 + $0x21c] ss:$24 sps:$4 sm:$0xff]  }
 0x19b   : > { %v888_v5 = vpop.f32.mrf.mxu0  ;;  %v1001_v8 = vpop.f32.mrf.mxu1  ;;  %2542 = vmatprep.subr.bf16.mxu0 %v3846_v42  ;;  %v1000_v11 = vadd.f32 %v999_v51, %v4380_v28  ;;  %2655 = vmatprep.subr.bf16.mxu1 %v3849_v52  ;;  %v1064_v49 = vmax.f32 %v885_v24, 0.0  ;;  %v1066_v50 = vmax.f32 %v998_v25, 0.0  ;;  %v3864_v24 = vld [vmem:[#allocation8 + $0x1ec] ss:$24 sps:$4 sm:$0xff]  }
 0x19c   : > { %v889_v12 = vadd.f32 %v888_v5, %v4384_v29  ;;  %v1002_v13 = vadd.f32 %v1001_v8, %v4388_v30  ;;  %2378 = vmatprep.mubr.bf16.mxu0 %v4498_v53  ;;  %2491 = vmatprep.mubr.bf16.mxu1 %v4500_v54  ;;  %v1065_v45 = vmax.f32 %v887_v1, 0.0  ;;  %v3861_v5 = vld [vmem:[#allocation8 + $0x51c] ss:$24 sps:$4 sm:$0xff]  }
 0x19d   : > { %v890_v26 = vpop.f32.mrf.mxu0  ;;  %v1003_v31 = vpop.f32.mrf.mxu1  ;;  %2379 = vmatmul.mubr.bf16.gmra.mxu0 %v4502_v60  ;;  %2492 = vmatmul.mubr.bf16.gmra.mxu1 %v4504_v2  ;;  %v1067_v46 = vmax.f32 %v1000_v11, 0.0 }
 0x19e   : > { %v891_v32 = vadd.f32 %v890_v26, %v4376_v27  ;;  %v1004_v33 = vadd.f32 %v1003_v31, %v4380_v28  ;;  %2543 = vmatpush2.bf16.msra.mxu0 %v3844_v55  ;;  %v1068_v35 = vmax.f32 %v889_v12, 0.0  ;;  %v1070_v39 = vmax.f32 %v1002_v13, 0.0  ;;  %2656 = vmatpush2.bf16.msra.mxu1 %v3847_v9  ;;  %v3856_v9 = vld [vmem:[#allocation8 + $0x218] ss:$24 sps:$4 sm:$0xff]  }
 0x19f   : > { %v894_v42 = vpop.f32.mrf.mxu0  ;;  %v1007_v36 = vpop.f32.mrf.mxu1  ;;  %2544 = vmatprep.subr.bf16.mxu0 %v3852_v10  ;;  %2657 = vmatprep.subr.bf16.mxu1 %v3855_v16  ;;  %v3859_v16 = vld [vmem:[#allocation8 + $0x518] ss:$24 sps:$4 sm:$0xff]  }
 0x1a0   : > { %v1069_v47 = vmax.f32 %v891_v32, 0.0  ;;  %v1071_v48 = vmax.f32 %v1004_v33, 0.0  ;;  %v4522_v12 = vpack.c.bf16 %v1068_v35, %v1064_v49  ;;  %v4524_v10 = vpack.c.bf16 %v1070_v39, %v1066_v50  ;;  %v3867_v32 = vld [vmem:[#allocation8 + $0x4ec] ss:$24 sps:$4 sm:$0xff]  }
 0x1a1   : > { %v896_v51 = vpop.f32.mrf.mxu0  ;;  %v1009_v52 = vpop.f32.mrf.mxu1  ;;  %v895_v33 = vadd.f32 %v894_v42, %v4384_v29  ;;  %v1008_v39 = vadd.f32 %v1007_v36, %v4388_v30  ;;  %v3870_v42 = vld [vmem:[#allocation8 + $0x1bc] ss:$24 sps:$4 sm:$0xff]  }
 0x1a2   : > { %v4518_v55 = vpack.c.bf16 %v1069_v47, %v1065_v45  ;;  %v4520_v8 = vpack.c.bf16 %v1071_v48, %v1067_v46  ;;  %2545 = vmatpush2.bf16.msra.mxu0 %v3850_v34  ;;  %v897_v1 = vadd.f32 %v896_v51, %v4376_v27  ;;  %2658 = vmatpush2.bf16.msra.mxu1 %v3853_v37  ;;  %v3862_v45 = vld [vmem:[#allocation8 + $0x1e8] ss:$24 sps:$4 sm:$0xff]   ;;  %v3873_v36 = vld [vmem:[#allocation8 + $0x4bc] ss:$24 sps:$4 sm:$0xff]  }
 0x1a3   : > { %v898_v11 = vpop.f32.mrf.mxu0  ;;  %v1011_v13 = vpop.f32.mrf.mxu1  ;;  %2546 = vmatprep.subr.bf16.mxu0 %v3858_v43  ;;  %v1010_v25 = vadd.f32 %v1009_v52, %v4380_v28  ;;  %2659 = vmatprep.subr.bf16.mxu1 %v3861_v5  ;;  %v3868_v5 = vld [vmem:[#allocation8 + $0x1b8] ss:$24 sps:$4 sm:$0xff]  }
 0x1a4   : > { %v899_v26 = vadd.f32 %v898_v11, %v4384_v29  ;;  %v1012_v31 = vadd.f32 %v1011_v13, %v4388_v30  ;;  %2388 = vmatprep.mubr.bf16.mxu0 %v4518_v55  ;;  %2501 = vmatprep.mubr.bf16.mxu1 %v4520_v8  ;;  %v1073_v46 = vmax.f32 %v897_v1, 0.0  ;;  %v3865_v29 = vld [vmem:[#allocation8 + $0x4e8] ss:$24 sps:$4 sm:$0xff]   ;;  %v1072_v30 = vmax.f32 %v895_v33, 0.0  ;;  %v3871_v1 = vld [vmem:[#allocation8 + $0x4b8] ss:$24 sps:$4 sm:$0xff]  }
 0x1a5   : > { %v900_v34 = vpop.f32.mrf.mxu0  ;;  %v1013_v35 = vpop.f32.mrf.mxu1  ;;  %2389 = vmatmul.mubr.bf16.gmra.mxu0 %v4522_v12  ;;  %2502 = vmatmul.mubr.bf16.gmra.mxu1 %v4524_v10  ;;  %v1075_v48 = vmax.f32 %v1010_v25, 0.0  ;;  %v3876_v13 = vld [vmem:[#allocation8 + $0x18c] ss:$24 sps:$4 sm:$0xff]   ;;  %v3877_v25 = vld [vmem:[#allocation8 + $0x488] ss:$24 sps:$4 sm:$0xff]  }
 0x1a6   : > { %v901_v37 = vadd.f32 %v900_v34, %v4376_v27  ;;  %v1014_v43 = vadd.f32 %v1013_v35, %v4380_v28  ;;  %2547 = vmatpush2.bf16.msra.mxu0 %v3856_v9  ;;  %v1076_v47 = vmax.f32 %v899_v26, 0.0  ;;  %2660 = vmatpush2.bf16.msra.mxu1 %v3859_v16  ;;  %v1078_v49 = vmax.f32 %v1012_v31, 0.0  ;;  %v3879_v16 = vld [vmem:[#allocation8 + $0x48c] ss:$24 sps:$4 sm:$0xff]   ;;  %v3883_v33 = vld [vmem:[#allocation8 + $0x460] ss:$24 sps:$4 sm:$0xff]  }
 0x1a7   : > { %2548 = vmatprep.subr.bf16.mxu0 %v3864_v24  ;;  %2661 = vmatprep.subr.bf16.mxu1 %v3867_v32  ;;  %v1074_v27 = vmax.f32 %v1008_v39, 0.0  ;;  %v3874_v24 = vld [vmem:[#allocation8 + $0x188] ss:$24 sps:$4 sm:$0xff]   ;;  %v3882_v26 = vld [vmem:[#allocation8 + $0x164] ss:$24 sps:$4 sm:$0xff]  }
 0x1a8   : > { %v1077_v50 = vmax.f32 %v901_v37, 0.0  ;;  %v1079_v51 = vmax.f32 %v1014_v43, 0.0  ;;  %v4542_v9 = vpack.c.bf16 %v1076_v47, %v1072_v30  ;;  %v3885_v31 = vld [vmem:[#allocation8 + $0x464] ss:$24 sps:$4 sm:$0xff]   ;;  %v3880_v32 = vld [vmem:[#allocation8 + $0x160] ss:$24 sps:$4 sm:$0xff]  }
 0x1a9   : > { %v4544_v11 = vpack.c.bf16 %v1078_v49, %v1074_v27  ;;  %v3888_v34 = vld [vmem:[#allocation8 + $0x134] ss:$24 sps:$4 sm:$0xff]   ;;  %v3886_v39 = vld [vmem:[#allocation8 + $0x130] ss:$24 sps:$4 sm:$0xff]   ;;  %v3894_v37 = vld [vmem:[#allocation8 + $0x104] ss:$24 sps:$4 sm:$0xff]  }
 0x1aa   : > { %v4538_v52 = vpack.c.bf16 %v1077_v50, %v1073_v46  ;;  %v4540_v28 = vpack.c.bf16 %v1079_v51, %v1075_v48  ;;  %2549 = vmatpush2.bf16.msra.mxu0 %v3862_v45  ;;  %2662 = vmatpush2.bf16.msra.mxu1 %v3865_v29  ;;  %v3891_v35 = vld [vmem:[#allocation8 + $0x434] ss:$24 sps:$4 sm:$0xff]   ;;  %v3889_v43 = vld [vmem:[#allocation8 + $0x430] ss:$24 sps:$4 sm:$0xff]   ;;  %v3897_v45 = vld [vmem:[#allocation8 + $0x404] ss:$24 sps:$4 sm:$0xff]  }
 0x1ab   : > { %2550 = vmatprep.subr.bf16.mxu0 %v3870_v42  ;;  %2663 = vmatprep.subr.bf16.mxu1 %v3873_v36  ;;  %v3892_v46 = vld [vmem:[#allocation8 + $0x100] ss:$24 sps:$4 sm:$0xff]   ;;  %v3900_v29 = vld [vmem:[#allocation8 + $0xd4] ss:$24 sps:$4 sm:$0xff]   ;;  %v3898_v48 = vld [vmem:[#allocation8 + $0xd0] ss:$24 sps:$4 sm:$0xff]  }
 0x1ac   : > { %2398 = vmatprep.mubr.bf16.mxu0 %v4538_v52  ;;  %2511 = vmatprep.mubr.bf16.mxu1 %v4540_v28  ;;  %v3895_v47 = vld [vmem:[#allocation8 + $0x400] ss:$24 sps:$4 sm:$0xff]   ;;  %v3903_v42 = vld [vmem:[#allocation8 + $0x3d4] ss:$24 sps:$4 sm:$0xff]   ;;  %v3906_v49 = vld [vmem:[#allocation8 + $0xa4] ss:$24 sps:$4 sm:$0xff]  }
 0x1ad   : > { %2399 = vmatmul.mubr.bf16.gmra.mxu0 %v4542_v9  ;;  %2512 = vmatmul.mubr.bf16.gmra.mxu1 %v4544_v11  ;;  %v3901_v50 = vld [vmem:[#allocation8 + $0x3d0] ss:$24 sps:$4 sm:$0xff]   ;;  %v3909_v51 = vld [vmem:[#allocation8 + $0x3a4] ss:$24 sps:$4 sm:$0xff]   ;;  %v3904_v30 = vld [vmem:[#allocation8 + $0xa0] ss:$24 sps:$4 sm:$0xff]  }
 0x1ae   : > { %2551 = vmatpush2.bf16.msra.mxu0 %v3868_v5  ;;  %2554 = vmatprep.mubr.bf16.mxu0 %v4398_v57  ;;  %v3907_v36 = vld [vmem:[#allocation8 + $0x3a0] ss:$24 sps:$4 sm:$0xff]   ;;  %v3912_v27 = vld [vmem:[#allocation8 + $0x74] ss:$24 sps:$4 sm:$0xff]  }
 0x1af   : > { %2664 = vmatpush2.bf16.msra.mxu1 %v3871_v1  ;;  %2667 = vmatprep.mubr.bf16.mxu1 %v4400_v58  ;;  %v3915_v5 = vld [vmem:[#allocation8 + $0x374] ss:$24 sps:$4 sm:$0xff]   ;;  %v3910_v1 = vld [vmem:[#allocation8 + $0x70] ss:$24 sps:$4 sm:$0xff]  }
 0x1b0   : > { %2552 = vmatprep.subr.bf16.mxu0 %v3876_v13  ;;  %2665 = vmatprep.subr.bf16.mxu1 %v3879_v16  ;;  %v3918_v13 = vld [vmem:[#allocation8 + $0x44] ss:$24 sps:$4 sm:$0xff]   ;;  %v3913_v16 = vld [vmem:[#allocation8 + $0x370] ss:$24 sps:$4 sm:$0xff]  }
 0x1b2   : > { %2553 = vmatpush2.bf16.msra.mxu0 %v3874_v24  ;;  %v3921_v24 = vld [vmem:[#allocation8 + $0x344] ss:$24 sps:$4 sm:$0xff]  }
 0x1b3   : > { %2666 = vmatpush2.bf16.msra.mxu1 %v3877_v25  ;;  %2748 = vmatprep.subr.bf16.mxu0 %v3882_v26  ;;  %v3916_v25 = vld [vmem:[#allocation8 + $0x40] ss:$24 sps:$4 sm:$0xff]  }
 0x1b4   : > { %2861 = vmatprep.subr.bf16.mxu1 %v3885_v31  ;;  %v3919_v26 = vld [vmem:[#allocation8 + $0x340] ss:$24 sps:$4 sm:$0xff]   ;;  %v3924_v31 = vld [vmem:[#allocation8 + $0x14] ss:$24 sps:$4 sm:$0xff]  }
 0x1b5   : > { %2555 = vmatmul.mubr.bf16.vlgmr.msra.gmra.mxu0 %v4402_v61 }
 0x1b6   : > { %2668 = vmatmul.mubr.bf16.vlgmr.msra.gmra.mxu1 %v4404_v62  ;;  %2749 = vmatpush1.bf16.msra.mxu0 %v3880_v32  ;;  %v3927_v32 = vld [vmem:[#allocation8 + $0x314] ss:$24 sps:$4 sm:$0xff]  }
 0x1b7   : > { %2564 = vmatprep.mubr.bf16.mxu0 %v4418_v38  ;;  %2677 = vmatprep.mubr.bf16.mxu1 %v4424_v44 }
 0x1b8   : > { %2862 = vmatpush1.bf16.msra.mxu1 %v3883_v33  ;;  %2750 = vmatprep.subr.bf16.mxu0 %v3888_v34  ;;  %v3922_v33 = vld [vmem:[#allocation8 + $0x10] ss:$24 sps:$4 sm:$0xff]   ;;  %v3930_v34 = vld [vmem:[#allocation8 + $0x2e4] ss:$24 sps:$4 sm:$0xff]  }
 0x1b9   : > { %2863 = vmatprep.subr.bf16.mxu1 %v3891_v35  ;;  %v3925_v35 = vld [vmem:[#allocation8 + $0x310] ss:$24 sps:$4 sm:$0xff]  }
 0x1ba   : > { %2751 = vmatpush1.bf16.msra.mxu0 %v3886_v39  ;;  %v3933_v39 = vld [vmem:[#allocation8 + $0x5e4] ss:$24 sps:$4 sm:$0xff]  }
 0x1bb   : > { %2752 = vmatprep.subr.bf16.mxu0 %v3894_v37  ;;  %v3928_v37 = vld [vmem:[#allocation8 + $0x2e0] ss:$24 sps:$4 sm:$0xff]  }
 0x1bc   : > { %2864 = vmatpush1.bf16.msra.mxu1 %v3889_v43  ;;  %v3931_v43 = vld [vmem:[#allocation8 + $0x5e0] ss:$24 sps:$4 sm:$0xff]  }
 0x1bd   : > { %2565 = vmatmul.mubr.bf16.gmra.mxu0 %v4420_v40  ;;  %2865 = vmatprep.subr.bf16.mxu1 %v3897_v45  ;;  %v3936_v45 = vld [vmem:[#allocation8 + $0x2b4] ss:$24 sps:$4 sm:$0xff]  }
 0x1be   : > { %2678 = vmatmul.mubr.bf16.gmra.mxu1 %v4422_v41  ;;  %2753 = vmatpush1.bf16.msra.mxu0 %v3892_v46  ;;  %v3939_v46 = vld [vmem:[#allocation8 + $0x5b4] ss:$24 sps:$4 sm:$0xff]  }
 0x1bf   : > { %2574 = vmatprep.mubr.bf16.mxu0 %v4438_v14  ;;  %2687 = vmatprep.mubr.bf16.mxu1 %v4440_v15 }
 0x1c0   : > { %2866 = vmatpush1.bf16.msra.mxu1 %v3895_v47  ;;  %2754 = vmatprep.subr.bf16.mxu0 %v3900_v29  ;;  %v3934_v47 = vld [vmem:[#allocation8 + $0x2b0] ss:$24 sps:$4 sm:$0xff]   ;;  %v3942_v29 = vld [vmem:[#allocation8 + $0x284] ss:$24 sps:$4 sm:$0xff]  }
 0x1c1   : > { %2867 = vmatprep.subr.bf16.mxu1 %v3903_v42  ;;  %v3937_v42 = vld [vmem:[#allocation8 + $0x5b0] ss:$24 sps:$4 sm:$0xff]  }
 0x1c2   : > { %2755 = vmatpush1.bf16.msra.mxu0 %v3898_v48  ;;  %v3945_v48 = vld [vmem:[#allocation8 + $0x584] ss:$24 sps:$4 sm:$0xff]  }
 0x1c3   : > { %2756 = vmatprep.subr.bf16.mxu0 %v3906_v49  ;;  %v3940_v49 = vld [vmem:[#allocation8 + $0x280] ss:$24 sps:$4 sm:$0xff]  }
 0x1c4   : > { %2868 = vmatpush1.bf16.msra.mxu1 %v3901_v50  ;;  %v3943_v50 = vld [vmem:[#allocation8 + $0x580] ss:$24 sps:$4 sm:$0xff]  }
 0x1c5   : > { %2575 = vmatmul.mubr.bf16.gmra.mxu0 %v4442_v17  ;;  %2869 = vmatprep.subr.bf16.mxu1 %v3909_v51  ;;  %v3948_v51 = vld [vmem:[#allocation8 + $0x254] ss:$24 sps:$4 sm:$0xff]  }
 0x1c6   : > { %2688 = vmatmul.mubr.bf16.gmra.mxu1 %v4444_v18  ;;  %2757 = vmatpush1.bf16.msra.mxu0 %v3904_v30  ;;  %v3951_v30 = vld [vmem:[#allocation8 + $0x554] ss:$24 sps:$4 sm:$0xff]  }
 0x1c7   : > { %2584 = vmatprep.mubr.bf16.mxu0 %v4458_v3  ;;  %2697 = vmatprep.mubr.bf16.mxu1 %v4460_v4 }
 0x1c8   : > { %2870 = vmatpush1.bf16.msra.mxu1 %v3907_v36  ;;  %2758 = vmatprep.subr.bf16.mxu0 %v3912_v27  ;;  %v3946_v36 = vld [vmem:[#allocation8 + $0x250] ss:$24 sps:$4 sm:$0xff]   ;;  %v3954_v27 = vld [vmem:[#allocation8 + $0x224] ss:$24 sps:$4 sm:$0xff]  }
 0x1c9   : > { %2871 = vmatprep.subr.bf16.mxu1 %v3915_v5  ;;  %v3949_v5 = vld [vmem:[#allocation8 + $0x550] ss:$24 sps:$4 sm:$0xff]  }
 0x1ca   : > { %2759 = vmatpush1.bf16.msra.mxu0 %v3910_v1  ;;  %v3957_v1 = vld [vmem:[#allocation8 + $0x524] ss:$24 sps:$4 sm:$0xff]  }
 0x1cb   : > { %2760 = vmatprep.subr.bf16.mxu0 %v3918_v13  ;;  %v3952_v13 = vld [vmem:[#allocation8 + $0x220] ss:$24 sps:$4 sm:$0xff]  }
 0x1cc   : > { %2872 = vmatpush1.bf16.msra.mxu1 %v3913_v16  ;;  %v3955_v16 = vld [vmem:[#allocation8 + $0x520] ss:$24 sps:$4 sm:$0xff]  }
 0x1cd   : > { %2585 = vmatmul.mubr.bf16.gmra.mxu0 %v4462_v6  ;;  %2873 = vmatprep.subr.bf16.mxu1 %v3921_v24  ;;  %v3960_v24 = vld [vmem:[#allocation8 + $0x1f4] ss:$24 sps:$4 sm:$0xff]  }
 0x1ce   : > { %2698 = vmatmul.mubr.bf16.gmra.mxu1 %v4464_v7  ;;  %2761 = vmatpush1.bf16.msra.mxu0 %v3916_v25  ;;  %v3963_v25 = vld [vmem:[#allocation8 + $0x4f4] ss:$24 sps:$4 sm:$0xff]  }
 0x1cf   : > { %2594 = vmatprep.mubr.bf16.mxu0 %v4478_v56  ;;  %2707 = vmatprep.mubr.bf16.mxu1 %v4480_v59 }
 0x1d0   : > { %2874 = vmatpush1.bf16.msra.mxu1 %v3919_v26  ;;  %2762 = vmatprep.subr.bf16.mxu0 %v3924_v31  ;;  %v3958_v26 = vld [vmem:[#allocation8 + $0x1f0] ss:$24 sps:$4 sm:$0xff]   ;;  %v3966_v31 = vld [vmem:[#allocation8 + $0x1c4] ss:$24 sps:$4 sm:$0xff]  }
 0x1d1   : > { %2875 = vmatprep.subr.bf16.mxu1 %v3927_v32  ;;  %v3961_v32 = vld [vmem:[#allocation8 + $0x4f0] ss:$24 sps:$4 sm:$0xff]  }
 0x1d2   : > { %2763 = vmatpush1.bf16.msra.mxu0 %v3922_v33  ;;  %v3969_v33 = vld [vmem:[#allocation8 + $0x4c4] ss:$24 sps:$4 sm:$0xff]  }
 0x1d3   : > { %2764 = vmatprep.subr.bf16.mxu0 %v3930_v34  ;;  %v3964_v34 = vld [vmem:[#allocation8 + $0x1c0] ss:$24 sps:$4 sm:$0xff]  }
 0x1d4   : > { %2876 = vmatpush1.bf16.msra.mxu1 %v3925_v35  ;;  %v3967_v35 = vld [vmem:[#allocation8 + $0x4c0] ss:$24 sps:$4 sm:$0xff]  }
 0x1d5   : > { %2595 = vmatmul.mubr.bf16.gmra.mxu0 %v4482_v63  ;;  %2877 = vmatprep.subr.bf16.mxu1 %v3933_v39  ;;  %v3972_v39 = vld [vmem:[#allocation8 + $0x194] ss:$24 sps:$4 sm:$0xff]  }
 0x1d6   : > { %2708 = vmatmul.mubr.bf16.gmra.mxu1 %v4484_v0  ;;  %2765 = vmatpush2.bf16.msra.mxu0 %v3928_v37  ;;  %v3975_v37 = vld [vmem:[#allocation8 + $0x494] ss:$24 sps:$4 sm:$0xff]  }
 0x1d7   : > { %2604 = vmatprep.mubr.bf16.mxu0 %v4498_v53  ;;  %2717 = vmatprep.mubr.bf16.mxu1 %v4500_v54 }
 0x1d8   : > { %2878 = vmatpush2.bf16.msra.mxu1 %v3931_v43  ;;  %2766 = vmatprep.subr.bf16.mxu0 %v3936_v45  ;;  %v3970_v43 = vld [vmem:[#allocation8 + $0x190] ss:$24 sps:$4 sm:$0xff]  }
 0x1d9   : > { %2879 = vmatprep.subr.bf16.mxu1 %v3939_v46  ;;  %v3973_v45 = vld [vmem:[#allocation8 + $0x490] ss:$24 sps:$4 sm:$0xff]  }
 0x1da   : > { %2767 = vmatpush2.bf16.msra.mxu0 %v3934_v47 }
 0x1db   : > { %2768 = vmatprep.subr.bf16.mxu0 %v3942_v29 }
 0x1dc   : > { %2880 = vmatpush2.bf16.msra.mxu1 %v3937_v42 }
 0x1dd   : > { %2605 = vmatmul.mubr.bf16.gmra.mxu0 %v4502_v60  ;;  %2881 = vmatprep.subr.bf16.mxu1 %v3945_v48 }
 0x1de   : > { %2718 = vmatmul.mubr.bf16.gmra.mxu1 %v4504_v2  ;;  %2769 = vmatpush2.bf16.msra.mxu0 %v3940_v49 }
 0x1df   : > { %2614 = vmatprep.mubr.bf16.mxu0 %v4518_v55  ;;  %2727 = vmatprep.mubr.bf16.mxu1 %v4520_v8 }
 0x1e0   : > { %2882 = vmatpush2.bf16.msra.mxu1 %v3943_v50  ;;  %2770 = vmatprep.subr.bf16.mxu0 %v3948_v51 }
 0x1e1   : > { %2883 = vmatprep.subr.bf16.mxu1 %v3951_v30 }
 0x1e2   : > { %2771 = vmatpush2.bf16.msra.mxu0 %v3946_v36 }
 0x1e3   : > { %2772 = vmatprep.subr.bf16.mxu0 %v3954_v27 }
 0x1e4   : > { %2884 = vmatpush2.bf16.msra.mxu1 %v3949_v5 }
 0x1e5   : > { %2615 = vmatmul.mubr.bf16.gmra.mxu0 %v4522_v12  ;;  %2885 = vmatprep.subr.bf16.mxu1 %v3957_v1 }
 0x1e6   : > { %2728 = vmatmul.mubr.bf16.gmra.mxu1 %v4524_v10  ;;  %2773 = vmatpush2.bf16.msra.mxu0 %v3952_v13 }
 0x1e7   : > { %2624 = vmatprep.mubr.bf16.mxu0 %v4538_v52  ;;  %2737 = vmatprep.mubr.bf16.mxu1 %v4540_v28 }
 0x1e8   : > { %2886 = vmatpush2.bf16.msra.mxu1 %v3955_v16  ;;  %2774 = vmatprep.subr.bf16.mxu0 %v3960_v24 }
 0x1e9   : > { %2887 = vmatprep.subr.bf16.mxu1 %v3963_v25 }
 0x1ea   : > { %2775 = vmatpush2.bf16.msra.mxu0 %v3958_v26 }
 0x1eb   : > { %2776 = vmatprep.subr.bf16.mxu0 %v3966_v31 }
 0x1ec   : > { %2888 = vmatpush2.bf16.msra.mxu1 %v3961_v32 }
 0x1ed   : > { %2625 = vmatmul.mubr.bf16.gmra.mxu0 %v4542_v9  ;;  %2889 = vmatprep.subr.bf16.mxu1 %v3969_v33 }
 0x1ee   : > { %2738 = vmatmul.mubr.bf16.gmra.mxu1 %v4544_v11  ;;  %2777 = vmatpush2.bf16.msra.mxu0 %v3964_v34 }
 0x1ef   : > { %2780 = vmatprep.mubr.bf16.mxu0 %v4398_v57  ;;  %2893 = vmatprep.mubr.bf16.mxu1 %v4400_v58  ;;  %v4617_v57 = vld [vmem:[%s4896_s4] sm:$0x3f] }
 0x1f0   : > { %2890 = vmatpush2.bf16.msra.mxu1 %v3967_v35  ;;  %2778 = vmatprep.subr.bf16.mxu0 %v3972_v39  ;;  %v4622_v58 = vrot.slane %v4617_v57, %v372_v22 }
 0x1f1   : > { %2891 = vmatprep.subr.bf16.mxu1 %v3975_v37 }
 0x1f2   : > { %2779 = vmatpush2.bf16.msra.mxu0 %v3970_v43 }
 0x1f4   : > { %2892 = vmatpush2.bf16.msra.mxu1 %v3973_v45 }
 0x1f5   : > { %2781 = vmatmul.mubr.bf16.vlgmr.msra.gmra.mxu0 %v4402_v61  ;;  %v4628_v61 = vrot.slane %v4617_v57, %v376_v20 }
 0x1f6   : > { %2790 = vmatprep.mubr.bf16.mxu0 %v4418_v38 }
 0x1f7   : > { %2894 = vmatmul.mubr.bf16.vlgmr.msra.gmra.mxu1 %v4404_v62 }
 0x1f8   : > { %2903 = vmatprep.mubr.bf16.mxu1 %v4424_v44 }
 0x1fd   : > { %2791 = vmatmul.mubr.bf16.gmra.mxu0 %v4420_v40 }
 0x1fe   : > { %2800 = vmatprep.mubr.bf16.mxu0 %v4438_v14 }
 0x1ff   : > { %2904 = vmatmul.mubr.bf16.gmra.mxu1 %v4422_v41 }
 0x200   : > { %2913 = vmatprep.mubr.bf16.mxu1 %v4440_v15 }
 0x205   : > { %2801 = vmatmul.mubr.bf16.gmra.mxu0 %v4442_v17 }
 0x206   : > { %2810 = vmatprep.mubr.bf16.mxu0 %v4458_v3 }
 0x207   : > { %2914 = vmatmul.mubr.bf16.gmra.mxu1 %v4444_v18 }
 0x208   : > { %2923 = vmatprep.mubr.bf16.mxu1 %v4460_v4 }
 0x20d   : > { %2811 = vmatmul.mubr.bf16.gmra.mxu0 %v4462_v6 }
 0x20e   : > { %2820 = vmatprep.mubr.bf16.mxu0 %v4478_v56 }
 0x20f   : > { %2924 = vmatmul.mubr.bf16.gmra.mxu1 %v4464_v7 }
 0x210   : > { %2933 = vmatprep.mubr.bf16.mxu1 %v4480_v59 }
 0x215   : > { %2821 = vmatmul.mubr.bf16.gmra.mxu0 %v4482_v63 }
 0x216   : > { %2830 = vmatprep.mubr.bf16.mxu0 %v4498_v53 }
 0x217   : > { %2934 = vmatmul.mubr.bf16.gmra.mxu1 %v4484_v0 }
 0x218   : > { %2943 = vmatprep.mubr.bf16.mxu1 %v4500_v54 }
 0x21d   : > { %2831 = vmatmul.mubr.bf16.gmra.mxu0 %v4502_v60 }
 0x21e   : > { %2840 = vmatprep.mubr.bf16.mxu0 %v4518_v55 }
 0x21f   : > { %2944 = vmatmul.mubr.bf16.gmra.mxu1 %v4504_v2 }
 0x220   : > { %2953 = vmatprep.mubr.bf16.mxu1 %v4520_v8 }
 0x225   : > { %2841 = vmatmul.mubr.bf16.gmra.mxu0 %v4522_v12 }
 0x226   : > { %2850 = vmatprep.mubr.bf16.mxu0 %v4538_v52 }
 0x227   : > { %2954 = vmatmul.mubr.bf16.gmra.mxu1 %v4524_v10 }
 0x228   : > { %2963 = vmatprep.mubr.bf16.mxu1 %v4540_v28 }
 0x22d   : > { %2851 = vmatmul.mubr.bf16.gmra.mxu0 %v4542_v9 }
 0x22f   : > { %2964 = vmatmul.mubr.bf16.gmra.mxu1 %v4544_v11 }
 0x235   : > { %v2330_v62 = vpop.f32.mrf.mxu0  ;;  %v2443_v38 = vpop.f32.mrf.mxu1 }
 0x236   : > { %v2331_v40 = vadd.f32 %v2330_v62, %v4622_v58 }
 0x237   : > { %v2332_v41 = vpop.f32.mrf.mxu0  ;;  %v2445_v44 = vpop.f32.mrf.mxu1 }
 0x238   : > { %v2444_v14 = vadd.f32 %v2443_v38, %v2331_v40  ;;  %v2333_v15 = vadd.f32 %v2332_v41, %v4628_v61 }
 0x239   : > { %v2334_v17 = vpop.f32.mrf.mxu0  ;;  %v2447_v18 = vpop.f32.mrf.mxu1 }
 0x23a   : > { %2974 = vst [vmem:[%s4632_s17] sm:$0xff] %v2444_v14  ;;  %v2446_v20 = vadd.f32 %v2445_v44, %v2333_v15  ;;  %v2335_v22 = vadd.f32 %v2334_v17, %v4622_v58 }
 0x23b   : > { %v2336_v3 = vpop.f32.mrf.mxu0  ;;  %v2449_v4 = vpop.f32.mrf.mxu1 }
 0x23c   : > { %2975 = vst [vmem:[%s4632_s17 + $0x8] sm:$0xff] %v2446_v20  ;;  %v2448_v6 = vadd.f32 %v2447_v18, %v2335_v22  ;;  %v2337_v7 = vadd.f32 %v2336_v3, %v4628_v61 }
 0x23d   : > { %v2340_v56 = vpop.f32.mrf.mxu0  ;;  %v2453_v0 = vpop.f32.mrf.mxu1 }
 0x23e   : > { %2980 = vst [vmem:[%s4632_s17 + $0x30] sm:$0xff] %v2448_v6  ;;  %v2450_v59 = vadd.f32 %v2449_v4, %v2337_v7  ;;  %v2341_v63 = vadd.f32 %v2340_v56, %v4622_v58 }
 0x23f   : > { %v2342_v53 = vpop.f32.mrf.mxu0  ;;  %v2455_v2 = vpop.f32.mrf.mxu1 }
 0x240   : > { %2981 = vst [vmem:[%s4632_s17 + $0x38] sm:$0xff] %v2450_v59  ;;  %v2454_v54 = vadd.f32 %v2453_v0, %v2341_v63  ;;  %v2343_v60 = vadd.f32 %v2342_v53, %v4628_v61 }
 0x241   : > { %v2344_v55 = vpop.f32.mrf.mxu0  ;;  %v2457_v10 = vpop.f32.mrf.mxu1 }
 0x242   : > { %2986 = vst [vmem:[%s4632_s17 + $0x60] sm:$0xff] %v2454_v54  ;;  %v2456_v8 = vadd.f32 %v2455_v2, %v2343_v60  ;;  %v2345_v12 = vadd.f32 %v2344_v55, %v4622_v58 }
 0x243   : > { %v2346_v52 = vpop.f32.mrf.mxu0  ;;  %v2459_v11 = vpop.f32.mrf.mxu1 }
 0x244   : > { %2987 = vst [vmem:[%s4632_s17 + $0x68] sm:$0xff] %v2456_v8  ;;  %v2458_v28 = vadd.f32 %v2457_v10, %v2345_v12  ;;  %v2347_v9 = vadd.f32 %v2346_v52, %v4628_v61 }
 0x245   : > { %v2350_v46 = vpop.f32.mrf.mxu0  ;;  %v2463_v42 = vpop.f32.mrf.mxu1 }
 0x246   : > { %2992 = vst [vmem:[%s4632_s17 + $0x90] sm:$0xff] %v2458_v28  ;;  %v2460_v47 = vadd.f32 %v2459_v11, %v2347_v9  ;;  %v2351_v29 = vadd.f32 %v2350_v46, %v4622_v58 }
 0x247   : > { %v2352_v48 = vpop.f32.mrf.mxu0  ;;  %v2465_v51 = vpop.f32.mrf.mxu1 }
 0x248   : > { %2993 = vst [vmem:[%s4632_s17 + $0x98] sm:$0xff] %v2460_v47  ;;  %v2464_v49 = vadd.f32 %v2463_v42, %v2351_v29  ;;  %v2353_v50 = vadd.f32 %v2352_v48, %v4628_v61 }
 0x249   : > { %v2354_v30 = vpop.f32.mrf.mxu0  ;;  %v2467_v5 = vpop.f32.mrf.mxu1 }
 0x24a   : > { %2998 = vst [vmem:[%s4632_s17 + $0xc0] sm:$0xff] %v2464_v49  ;;  %v2466_v36 = vadd.f32 %v2465_v51, %v2353_v50  ;;  %v2355_v27 = vadd.f32 %v2354_v30, %v4622_v58 }
 0x24b   : > { %v2356_v1 = vpop.f32.mrf.mxu0  ;;  %v2469_v24 = vpop.f32.mrf.mxu1 }
 0x24c   : > { %2999 = vst [vmem:[%s4632_s17 + $0xc8] sm:$0xff] %v2466_v36  ;;  %v2468_v13 = vadd.f32 %v2467_v5, %v2355_v27  ;;  %v2357_v16 = vadd.f32 %v2356_v1, %v4628_v61 }
 0x24d   : > { %v2360_v25 = vpop.f32.mrf.mxu0  ;;  %v2473_v32 = vpop.f32.mrf.mxu1 }
 0x24e   : > { %3004 = vst [vmem:[%s4632_s17 + $0xf0] sm:$0xff] %v2468_v13  ;;  %v2470_v26 = vadd.f32 %v2469_v24, %v2357_v16  ;;  %v2361_v31 = vadd.f32 %v2360_v25, %v4622_v58 }
 0x24f   : > { %v2362_v33 = vpop.f32.mrf.mxu0  ;;  %v2475_v39 = vpop.f32.mrf.mxu1 }
 0x250   : > { %3005 = vst [vmem:[%s4632_s17 + $0xf8] sm:$0xff] %v2470_v26  ;;  %v2474_v34 = vadd.f32 %v2473_v32, %v2361_v31  ;;  %v2363_v35 = vadd.f32 %v2362_v33, %v4628_v61 }
 0x251   : > { %v2364_v37 = vpop.f32.mrf.mxu0  ;;  %v2477_v62 = vpop.f32.mrf.mxu1 }
 0x252   : > { %3010 = vst [vmem:[%s4632_s17 + $0x120] sm:$0xff] %v2474_v34  ;;  %v2476_v43 = vadd.f32 %v2475_v39, %v2363_v35  ;;  %v2365_v45 = vadd.f32 %v2364_v37, %v4622_v58 }
 0x253   : > { %v2366_v38 = vpop.f32.mrf.mxu0  ;;  %v2479_v44 = vpop.f32.mrf.mxu1 }
 0x254   : > { %3011 = vst [vmem:[%s4632_s17 + $0x128] sm:$0xff] %v2476_v43  ;;  %v2478_v40 = vadd.f32 %v2477_v62, %v2365_v45  ;;  %v2367_v41 = vadd.f32 %v2366_v38, %v4628_v61 }
 0x255   : > { %v2370_v14 = vpop.f32.mrf.mxu0  ;;  %v2483_v18 = vpop.f32.mrf.mxu1 }
 0x256   : > { %3016 = vst [vmem:[%s4632_s17 + $0x150] sm:$0xff] %v2478_v40  ;;  %v2480_v15 = vadd.f32 %v2479_v44, %v2367_v41  ;;  %v2371_v17 = vadd.f32 %v2370_v14, %v4622_v58 }
 0x257   : > { %v2372_v20 = vpop.f32.mrf.mxu0  ;;  %v2485_v4 = vpop.f32.mrf.mxu1 }
 0x258   : > { %3017 = vst [vmem:[%s4632_s17 + $0x158] sm:$0xff] %v2480_v15  ;;  %v2484_v22 = vadd.f32 %v2483_v18, %v2371_v17  ;;  %v2373_v3 = vadd.f32 %v2372_v20, %v4628_v61  ;;  %v4695_v17 = vrot.slane %v4617_v57, %v380_v23 }
 0x259   : > { %v2374_v6 = vpop.f32.mrf.mxu0  ;;  %v2487_v59 = vpop.f32.mrf.mxu1 }
 0x25a   : > { %3022 = vst [vmem:[%s4632_s17 + $0x180] sm:$0xff] %v2484_v22  ;;  %v2486_v7 = vadd.f32 %v2485_v4, %v2373_v3  ;;  %v2375_v56 = vadd.f32 %v2374_v6, %v4622_v58  ;;  %v4702_v4 = vrot.slane %v4617_v57, %v384_v21 }
 0x25b   : > { %v2376_v63 = vpop.f32.mrf.mxu0  ;;  %v2489_v54 = vpop.f32.mrf.mxu1 }
 0x25c   : > { %3023 = vst [vmem:[%s4632_s17 + $0x188] sm:$0xff] %v2486_v7  ;;  %v2488_v0 = vadd.f32 %v2487_v59, %v2375_v56  ;;  %v2377_v53 = vadd.f32 %v2376_v63, %v4628_v61 }
 0x25d   : > { %v2380_v60 = vpop.f32.mrf.mxu0  ;;  %v2493_v8 = vpop.f32.mrf.mxu1 }
 0x25e   : > { %3028 = vst [vmem:[%s4632_s17 + $0x1b0] sm:$0xff] %v2488_v0  ;;  %v2490_v2 = vadd.f32 %v2489_v54, %v2377_v53  ;;  %v2381_v55 = vadd.f32 %v2380_v60, %v4622_v58 }
 0x25f   : > { %v2382_v12 = vpop.f32.mrf.mxu0  ;;  %v2495_v28 = vpop.f32.mrf.mxu1 }
 0x260   : > { %3029 = vst [vmem:[%s4632_s17 + $0x1b8] sm:$0xff] %v2490_v2  ;;  %v2494_v10 = vadd.f32 %v2493_v8, %v2381_v55  ;;  %v2383_v52 = vadd.f32 %v2382_v12, %v4628_v61 }
 0x261   : > { %v2384_v9 = vpop.f32.mrf.mxu0  ;;  %v2497_v47 = vpop.f32.mrf.mxu1 }
 0x262   : > { %3034 = vst [vmem:[%s4632_s17 + $0x1e0] sm:$0xff] %v2494_v10  ;;  %v2496_v11 = vadd.f32 %v2495_v28, %v2383_v52  ;;  %v2385_v46 = vadd.f32 %v2384_v9, %v4622_v58 }
 0x263   : > { %v2386_v29 = vpop.f32.mrf.mxu0  ;;  %v2499_v49 = vpop.f32.mrf.mxu1 }
 0x264   : > { %3035 = vst [vmem:[%s4632_s17 + $0x1e8] sm:$0xff] %v2496_v11  ;;  %v2498_v42 = vadd.f32 %v2497_v47, %v2385_v46  ;;  %v2387_v48 = vadd.f32 %v2386_v29, %v4628_v61 }
 0x265   : > { %v2390_v50 = vpop.f32.mrf.mxu0  ;;  %v2503_v36 = vpop.f32.mrf.mxu1 }
 0x266   : > { %3040 = vst [vmem:[%s4632_s17 + $0x210] sm:$0xff] %v2498_v42  ;;  %v2500_v51 = vadd.f32 %v2499_v49, %v2387_v48  ;;  %v2391_v30 = vadd.f32 %v2390_v50, %v4622_v58 }
 0x267   : > { %v2392_v27 = vpop.f32.mrf.mxu0  ;;  %v2505_v13 = vpop.f32.mrf.mxu1 }
 0x268   : > { %3041 = vst [vmem:[%s4632_s17 + $0x218] sm:$0xff] %v2500_v51  ;;  %v2504_v5 = vadd.f32 %v2503_v36, %v2391_v30  ;;  %v2393_v1 = vadd.f32 %v2392_v27, %v4628_v61 }
 0x269   : > { %v2394_v16 = vpop.f32.mrf.mxu0  ;;  %v2507_v26 = vpop.f32.mrf.mxu1 }
 0x26a   : > { %3046 = vst [vmem:[%s4632_s17 + $0x240] sm:$0xff] %v2504_v5  ;;  %v2506_v24 = vadd.f32 %v2505_v13, %v2393_v1  ;;  %v2395_v25 = vadd.f32 %v2394_v16, %v4622_v58 }
 0x26b   : > { %v2396_v31 = vpop.f32.mrf.mxu0  ;;  %v2509_v34 = vpop.f32.mrf.mxu1 }
 0x26c   : > { %3047 = vst [vmem:[%s4632_s17 + $0x248] sm:$0xff] %v2506_v24  ;;  %v2508_v32 = vadd.f32 %v2507_v26, %v2395_v25  ;;  %v2397_v33 = vadd.f32 %v2396_v31, %v4628_v61 }
 0x26d   : > { %v2400_v35 = vpop.f32.mrf.mxu0  ;;  %v2513_v43 = vpop.f32.mrf.mxu1 }
 0x26e   : > { %3052 = vst [vmem:[%s4632_s17 + $0x270] sm:$0xff] %v2508_v32  ;;  %v2510_v39 = vadd.f32 %v2509_v34, %v2397_v33  ;;  %v2401_v37 = vadd.f32 %v2400_v35, %v4622_v58 }
 0x26f   : > { %v2402_v45 = vpop.f32.mrf.mxu0  ;;  %v2515_v40 = vpop.f32.mrf.mxu1 }
 0x270   : > { %3053 = vst [vmem:[%s4632_s17 + $0x278] sm:$0xff] %v2510_v39  ;;  %v2514_v62 = vadd.f32 %v2513_v43, %v2401_v37  ;;  %v2403_v38 = vadd.f32 %v2402_v45, %v4628_v61 }
 0x271   : > { %v2404_v41 = vpop.f32.mrf.mxu0  ;;  %v2517_v15 = vpop.f32.mrf.mxu1 }
 0x272   : > { %3058 = vst [vmem:[%s4632_s17 + $0x2a0] sm:$0xff] %v2514_v62  ;;  %v2516_v44 = vadd.f32 %v2515_v40, %v2403_v38  ;;  %v2405_v14 = vadd.f32 %v2404_v41, %v4622_v58 }
 0x273   : > { %v2406_v18 = vpop.f32.mrf.mxu0  ;;  %v2519_v3 = vpop.f32.mrf.mxu1 }
 0x274   : > { %3059 = vst [vmem:[%s4632_s17 + $0x2a8] sm:$0xff] %v2516_v44  ;;  %v2518_v20 = vadd.f32 %v2517_v15, %v2405_v14  ;;  %v2407_v22 = vadd.f32 %v2406_v18, %v4628_v61 }
 0x275   : > { %v2556_v6 = vpop.f32.mrf.mxu0 }
 0x276   : > { %3064 = vst [vmem:[%s4632_s17 + $0x2d0] sm:$0xff] %v2518_v20  ;;  %v2520_v58 = vadd.f32 %v2519_v3, %v2407_v22  ;;  %v2557_v7 = vadd.f32 %v2556_v6, %v4695_v17  ;;  %v2669_v23 = vpop.f32.mrf.mxu1 }
 0x277   : > { %v2558_v56 = vpop.f32.mrf.mxu0 }
 0x278   : > { %3065 = vst [vmem:[%s4632_s17 + $0x2d8] sm:$0xff] %v2520_v58  ;;  %v2670_v59 = vadd.f32 %v2669_v23, %v2557_v7  ;;  %v2559_v63 = vadd.f32 %v2558_v56, %v4702_v4  ;;  %v2671_v61 = vpop.f32.mrf.mxu1 }
 0x279   : > { %v2560_v0 = vpop.f32.mrf.mxu0 }
 0x27a   : > { %2976 = vst [vmem:[%s4632_s17 + $0x10] sm:$0xff] %v2670_v59  ;;  %v2672_v53 = vadd.f32 %v2671_v61, %v2559_v63  ;;  %v2561_v21 = vadd.f32 %v2560_v0, %v4695_v17  ;;  %v2673_v54 = vpop.f32.mrf.mxu1 }
 0x27b   : > { %v2562_v60 = vpop.f32.mrf.mxu0 }
 0x27c   : > { %2977 = vst [vmem:[%s4632_s17 + $0x18] sm:$0xff] %v2672_v53  ;;  %v2674_v2 = vadd.f32 %v2673_v54, %v2561_v21  ;;  %v2563_v55 = vadd.f32 %v2562_v60, %v4702_v4  ;;  %v2675_v8 = vpop.f32.mrf.mxu1 }
 0x27d   : > { %v2566_v12 = vpop.f32.mrf.mxu0 }
 0x27e   : > { %2982 = vst [vmem:[%s4632_s17 + $0x40] sm:$0xff] %v2674_v2  ;;  %v2676_v10 = vadd.f32 %v2675_v8, %v2563_v55  ;;  %v2567_v52 = vadd.f32 %v2566_v12, %v4695_v17  ;;  %v2679_v28 = vpop.f32.mrf.mxu1 }
 0x27f   : > { %v2568_v9 = vpop.f32.mrf.mxu0 }
 0x280   : > { %2983 = vst [vmem:[%s4632_s17 + $0x48] sm:$0xff] %v2676_v10  ;;  %v2680_v11 = vadd.f32 %v2679_v28, %v2567_v52  ;;  %v2569_v46 = vadd.f32 %v2568_v9, %v4702_v4  ;;  %v2681_v47 = vpop.f32.mrf.mxu1 }
 0x281   : > { %v2570_v29 = vpop.f32.mrf.mxu0 }
 0x282   : > { %2988 = vst [vmem:[%s4632_s17 + $0x70] sm:$0xff] %v2680_v11  ;;  %v2682_v42 = vadd.f32 %v2681_v47, %v2569_v46  ;;  %v2571_v48 = vadd.f32 %v2570_v29, %v4695_v17  ;;  %v2683_v49 = vpop.f32.mrf.mxu1 }
 0x283   : > { %v2572_v50 = vpop.f32.mrf.mxu0 }
 0x284   : > { %2989 = vst [vmem:[%s4632_s17 + $0x78] sm:$0xff] %v2682_v42  ;;  %v2684_v51 = vadd.f32 %v2683_v49, %v2571_v48  ;;  %v2573_v30 = vadd.f32 %v2572_v50, %v4702_v4  ;;  %v2685_v36 = vpop.f32.mrf.mxu1 }
 0x285   : > { %v2576_v27 = vpop.f32.mrf.mxu0 }
 0x286   : > { %2994 = vst [vmem:[%s4632_s17 + $0xa0] sm:$0xff] %v2684_v51  ;;  %v2686_v5 = vadd.f32 %v2685_v36, %v2573_v30  ;;  %v2577_v1 = vadd.f32 %v2576_v27, %v4695_v17  ;;  %v2689_v13 = vpop.f32.mrf.mxu1 }
 0x287   : > { %v2578_v16 = vpop.f32.mrf.mxu0 }
 0x288   : > { %2995 = vst [vmem:[%s4632_s17 + $0xa8] sm:$0xff] %v2686_v5  ;;  %v2690_v24 = vadd.f32 %v2689_v13, %v2577_v1  ;;  %v2579_v25 = vadd.f32 %v2578_v16, %v4702_v4  ;;  %v2691_v26 = vpop.f32.mrf.mxu1 }
 0x289   : > { %v2580_v31 = vpop.f32.mrf.mxu0 }
 0x28a   : > { %3000 = vst [vmem:[%s4632_s17 + $0xd0] sm:$0xff] %v2690_v24  ;;  %v2692_v32 = vadd.f32 %v2691_v26, %v2579_v25  ;;  %v2581_v33 = vadd.f32 %v2580_v31, %v4695_v17  ;;  %v2693_v34 = vpop.f32.mrf.mxu1 }
 0x28b   : > { %v2582_v35 = vpop.f32.mrf.mxu0 }
 0x28c   : > { %3001 = vst [vmem:[%s4632_s17 + $0xd8] sm:$0xff] %v2692_v32  ;;  %v2694_v39 = vadd.f32 %v2693_v34, %v2581_v33  ;;  %v2583_v37 = vadd.f32 %v2582_v35, %v4702_v4  ;;  %v2695_v43 = vpop.f32.mrf.mxu1 }
 0x28d   : > { %v2586_v45 = vpop.f32.mrf.mxu0 }
 0x28e   : > { %3006 = vst [vmem:[%s4632_s17 + $0x100] sm:$0xff] %v2694_v39  ;;  %v2696_v62 = vadd.f32 %v2695_v43, %v2583_v37  ;;  %v2587_v38 = vadd.f32 %v2586_v45, %v4695_v17  ;;  %v2699_v40 = vpop.f32.mrf.mxu1 }
 0x28f   : > { %v2588_v41 = vpop.f32.mrf.mxu0 }
 0x290   : > { %3007 = vst [vmem:[%s4632_s17 + $0x108] sm:$0xff] %v2696_v62  ;;  %v2700_v44 = vadd.f32 %v2699_v40, %v2587_v38  ;;  %v2589_v14 = vadd.f32 %v2588_v41, %v4702_v4  ;;  %v2701_v15 = vpop.f32.mrf.mxu1 }
 0x291   : > { %v2590_v18 = vpop.f32.mrf.mxu0 }
 0x292   : > { %3012 = vst [vmem:[%s4632_s17 + $0x130] sm:$0xff] %v2700_v44  ;;  %v2702_v20 = vadd.f32 %v2701_v15, %v2589_v14  ;;  %v2591_v22 = vadd.f32 %v2590_v18, %v4695_v17  ;;  %v2703_v3 = vpop.f32.mrf.mxu1  ;;  %v1324_v18 = vsub.s32 4, %v4368_v19 }
 0x293   : > { %v2592_v6 = vpop.f32.mrf.mxu0 }
 0x294   : > { %3013 = vst [vmem:[%s4632_s17 + $0x138] sm:$0xff] %v2702_v20  ;;  %v2704_v58 = vadd.f32 %v2703_v3, %v2591_v22  ;;  %v2593_v7 = vadd.f32 %v2592_v6, %v4702_v4  ;;  %v2705_v23 = vpop.f32.mrf.mxu1 }
 0x295   : > { %v2596_v56 = vpop.f32.mrf.mxu0 }
 0x296   : > { %3018 = vst [vmem:[%s4632_s17 + $0x160] sm:$0xff] %v2704_v58  ;;  %v2706_v59 = vadd.f32 %v2705_v23, %v2593_v7  ;;  %v2597_v63 = vadd.f32 %v2596_v56, %v4695_v17  ;;  %v2709_v61 = vpop.f32.mrf.mxu1  ;;  %v1328_v58 = vsub.s32 5, %v4368_v19 }
 0x297   : > { %v2598_v0 = vpop.f32.mrf.mxu0 }
 0x298   : > { %3019 = vst [vmem:[%s4632_s17 + $0x168] sm:$0xff] %v2706_v59  ;;  %v2710_v53 = vadd.f32 %v2709_v61, %v2597_v63  ;;  %v2599_v21 = vadd.f32 %v2598_v0, %v4702_v4  ;;  %v2711_v54 = vpop.f32.mrf.mxu1  ;;  %v4769_v63 = vrot.slane %v4617_v57, %v1324_v18 }
 0x299   : > { %v2600_v60 = vpop.f32.mrf.mxu0 }
 0x29a   : > { %3024 = vst [vmem:[%s4632_s17 + $0x190] sm:$0xff] %v2710_v53  ;;  %v2712_v2 = vadd.f32 %v2711_v54, %v2599_v21  ;;  %v2601_v55 = vadd.f32 %v2600_v60, %v4695_v17  ;;  %v2713_v8 = vpop.f32.mrf.mxu1  ;;  %v4774_v54 = vrot.slane %v4617_v57, %v1328_v58 }
 0x29b   : > { %v2602_v12 = vpop.f32.mrf.mxu0 }
 0x29c   : > { %3025 = vst [vmem:[%s4632_s17 + $0x198] sm:$0xff] %v2712_v2  ;;  %v2714_v10 = vadd.f32 %v2713_v8, %v2601_v55  ;;  %v2603_v52 = vadd.f32 %v2602_v12, %v4702_v4  ;;  %v2715_v28 = vpop.f32.mrf.mxu1 }
 0x29d   : > { %v2606_v9 = vpop.f32.mrf.mxu0 }
 0x29e   : > { %3030 = vst [vmem:[%s4632_s17 + $0x1c0] sm:$0xff] %v2714_v10  ;;  %v2716_v11 = vadd.f32 %v2715_v28, %v2603_v52  ;;  %v2607_v46 = vadd.f32 %v2606_v9, %v4695_v17  ;;  %v2719_v47 = vpop.f32.mrf.mxu1 }
 0x29f   : > { %v2608_v29 = vpop.f32.mrf.mxu0 }
 0x2a0   : > { %3031 = vst [vmem:[%s4632_s17 + $0x1c8] sm:$0xff] %v2716_v11  ;;  %v2720_v42 = vadd.f32 %v2719_v47, %v2607_v46  ;;  %v2609_v48 = vadd.f32 %v2608_v29, %v4702_v4  ;;  %v2721_v49 = vpop.f32.mrf.mxu1 }
 0x2a1   : > { %v2610_v50 = vpop.f32.mrf.mxu0 }
 0x2a2   : > { %3036 = vst [vmem:[%s4632_s17 + $0x1f0] sm:$0xff] %v2720_v42  ;;  %v2722_v51 = vadd.f32 %v2721_v49, %v2609_v48  ;;  %v2611_v30 = vadd.f32 %v2610_v50, %v4695_v17  ;;  %v2723_v36 = vpop.f32.mrf.mxu1 }
 0x2a3   : > { %v2612_v27 = vpop.f32.mrf.mxu0 }
 0x2a4   : > { %3037 = vst [vmem:[%s4632_s17 + $0x1f8] sm:$0xff] %v2722_v51  ;;  %v2724_v5 = vadd.f32 %v2723_v36, %v2611_v30  ;;  %v2613_v1 = vadd.f32 %v2612_v27, %v4702_v4  ;;  %v2725_v13 = vpop.f32.mrf.mxu1 }
 0x2a5   : > { %v2616_v16 = vpop.f32.mrf.mxu0 }
 0x2a6   : > { %3042 = vst [vmem:[%s4632_s17 + $0x220] sm:$0xff] %v2724_v5  ;;  %v2726_v24 = vadd.f32 %v2725_v13, %v2613_v1  ;;  %v2617_v25 = vadd.f32 %v2616_v16, %v4695_v17  ;;  %v2729_v26 = vpop.f32.mrf.mxu1 }
 0x2a7   : > { %v2618_v31 = vpop.f32.mrf.mxu0 }
 0x2a8   : > { %3043 = vst [vmem:[%s4632_s17 + $0x228] sm:$0xff] %v2726_v24  ;;  %v2730_v32 = vadd.f32 %v2729_v26, %v2617_v25  ;;  %v2619_v33 = vadd.f32 %v2618_v31, %v4702_v4  ;;  %v2731_v34 = vpop.f32.mrf.mxu1 }
 0x2a9   : > { %v2620_v35 = vpop.f32.mrf.mxu0 }
 0x2aa   : > { %3048 = vst [vmem:[%s4632_s17 + $0x250] sm:$0xff] %v2730_v32  ;;  %v2732_v39 = vadd.f32 %v2731_v34, %v2619_v33  ;;  %v2621_v37 = vadd.f32 %v2620_v35, %v4695_v17  ;;  %v2733_v43 = vpop.f32.mrf.mxu1 }
 0x2ab   : > { %v2622_v45 = vpop.f32.mrf.mxu0 }
 0x2ac   : > { %3049 = vst [vmem:[%s4632_s17 + $0x258] sm:$0xff] %v2732_v39  ;;  %v2734_v62 = vadd.f32 %v2733_v43, %v2621_v37  ;;  %v2623_v38 = vadd.f32 %v2622_v45, %v4702_v4  ;;  %v2735_v40 = vpop.f32.mrf.mxu1 }
 0x2ad   : > { %v2626_v41 = vpop.f32.mrf.mxu0 }
 0x2ae   : > { %3054 = vst [vmem:[%s4632_s17 + $0x280] sm:$0xff] %v2734_v62  ;;  %v2736_v44 = vadd.f32 %v2735_v40, %v2623_v38  ;;  %v2627_v14 = vadd.f32 %v2626_v41, %v4695_v17  ;;  %v2739_v15 = vpop.f32.mrf.mxu1 }
 0x2af   : > { %v2628_v20 = vpop.f32.mrf.mxu0 }
 0x2b0   : > { %3055 = vst [vmem:[%s4632_s17 + $0x288] sm:$0xff] %v2736_v44  ;;  %v2740_v22 = vadd.f32 %v2739_v15, %v2627_v14  ;;  %v2629_v3 = vadd.f32 %v2628_v20, %v4702_v4  ;;  %v2741_v6 = vpop.f32.mrf.mxu1 }
 0x2b1   : > { %v2630_v7 = vpop.f32.mrf.mxu0 }
 0x2b2   : > { %3060 = vst [vmem:[%s4632_s17 + $0x2b0] sm:$0xff] %v2740_v22  ;;  %v2742_v23 = vadd.f32 %v2741_v6, %v2629_v3  ;;  %v2631_v56 = vadd.f32 %v2630_v7, %v4695_v17  ;;  %v2743_v59 = vpop.f32.mrf.mxu1 }
 0x2b3   : > { %v2632_v61 = vpop.f32.mrf.mxu0 }
 0x2b4   : > { %3061 = vst [vmem:[%s4632_s17 + $0x2b8] sm:$0xff] %v2742_v23  ;;  %v2744_v0 = vadd.f32 %v2743_v59, %v2631_v56  ;;  %v2633_v53 = vadd.f32 %v2632_v61, %v4702_v4  ;;  %v2745_v21 = vpop.f32.mrf.mxu1 }
 0x2b5   : > { %v2782_v19 = vpop.f32.mrf.mxu0 }
 0x2b6   : > { %3066 = vst [vmem:[%s4632_s17 + $0x2e0] sm:$0xff] %v2744_v0  ;;  %v2746_v60 = vadd.f32 %v2745_v21, %v2633_v53  ;;  %v2783_v17 = vadd.f32 %v2782_v19, %v4769_v63 }
 0x2b7   : > { %v2895_v2 = vpop.f32.mrf.mxu1  ;;  %v2784_v55 = vpop.f32.mrf.mxu0 }
 0x2b8   : > { %3067 = vst [vmem:[%s4632_s17 + $0x2e8] sm:$0xff] %v2746_v60  ;;  %v2896_v8 = vadd.f32 %v2895_v2, %v2783_v17  ;;  %v2785_v12 = vadd.f32 %v2784_v55, %v4774_v54 }
 0x2b9   : > { %v2897_v10 = vpop.f32.mrf.mxu1  ;;  %v2786_v52 = vpop.f32.mrf.mxu0 }
 0x2ba   : > { %2978 = vst [vmem:[%s4632_s17 + $0x20] sm:$0xff] %v2896_v8  ;;  %v2898_v4 = vadd.f32 %v2897_v10, %v2785_v12  ;;  %v2787_v57 = vadd.f32 %v2786_v52, %v4769_v63 }
 0x2bb   : > { %v2899_v28 = vpop.f32.mrf.mxu1  ;;  %v2788_v9 = vpop.f32.mrf.mxu0 }
 0x2bc   : > { %2979 = vst [vmem:[%s4632_s17 + $0x28] sm:$0xff] %v2898_v4  ;;  %v2900_v11 = vadd.f32 %v2899_v28, %v2787_v57  ;;  %v2789_v46 = vadd.f32 %v2788_v9, %v4774_v54 }
 0x2bd   : > { %v2901_v47 = vpop.f32.mrf.mxu1  ;;  %v2792_v29 = vpop.f32.mrf.mxu0 }
 0x2be   : > { %2984 = vst [vmem:[%s4632_s17 + $0x50] sm:$0xff] %v2900_v11  ;;  %v2902_v42 = vadd.f32 %v2901_v47, %v2789_v46  ;;  %v2793_v48 = vadd.f32 %v2792_v29, %v4769_v63 }
 0x2bf   : > { %v2905_v49 = vpop.f32.mrf.mxu1  ;;  %v2794_v50 = vpop.f32.mrf.mxu0 }
 0x2c0   : > { %2985 = vst [vmem:[%s4632_s17 + $0x58] sm:$0xff] %v2902_v42  ;;  %v2906_v51 = vadd.f32 %v2905_v49, %v2793_v48  ;;  %v2795_v30 = vadd.f32 %v2794_v50, %v4774_v54 }
 0x2c1   : > { %v2907_v36 = vpop.f32.mrf.mxu1  ;;  %v2796_v27 = vpop.f32.mrf.mxu0 }
 0x2c2   : > { %2990 = vst [vmem:[%s4632_s17 + $0x80] sm:$0xff] %v2906_v51  ;;  %v2908_v5 = vadd.f32 %v2907_v36, %v2795_v30  ;;  %v2797_v1 = vadd.f32 %v2796_v27, %v4769_v63 }
 0x2c3   : > { %v2909_v13 = vpop.f32.mrf.mxu1  ;;  %v2798_v16 = vpop.f32.mrf.mxu0 }
 0x2c4   : > { %2991 = vst [vmem:[%s4632_s17 + $0x88] sm:$0xff] %v2908_v5  ;;  %v2910_v24 = vadd.f32 %v2909_v13, %v2797_v1  ;;  %v2799_v25 = vadd.f32 %v2798_v16, %v4774_v54 }
 0x2c5   : > { %v2911_v26 = vpop.f32.mrf.mxu1  ;;  %v2802_v31 = vpop.f32.mrf.mxu0 }
 0x2c6   : > { %2996 = vst [vmem:[%s4632_s17 + $0xb0] sm:$0xff] %v2910_v24  ;;  %v2912_v32 = vadd.f32 %v2911_v26, %v2799_v25  ;;  %v2803_v33 = vadd.f32 %v2802_v31, %v4769_v63 }
 0x2c7   : > { %v2915_v34 = vpop.f32.mrf.mxu1  ;;  %v2804_v35 = vpop.f32.mrf.mxu0 }
 0x2c8   : > { %2997 = vst [vmem:[%s4632_s17 + $0xb8] sm:$0xff] %v2912_v32  ;;  %v2916_v39 = vadd.f32 %v2915_v34, %v2803_v33  ;;  %v2805_v37 = vadd.f32 %v2804_v35, %v4774_v54 }
 0x2c9   : > { %v2917_v43 = vpop.f32.mrf.mxu1  ;;  %v2806_v45 = vpop.f32.mrf.mxu0 }
 0x2ca   : > { %3002 = vst [vmem:[%s4632_s17 + $0xe0] sm:$0xff] %v2916_v39  ;;  %v2918_v62 = vadd.f32 %v2917_v43, %v2805_v37  ;;  %v2807_v38 = vadd.f32 %v2806_v45, %v4769_v63 }
 0x2cb   : > { %v2919_v40 = vpop.f32.mrf.mxu1  ;;  %v2808_v41 = vpop.f32.mrf.mxu0 }
 0x2cc   : > { %3003 = vst [vmem:[%s4632_s17 + $0xe8] sm:$0xff] %v2918_v62  ;;  %v2920_v44 = vadd.f32 %v2919_v40, %v2807_v38  ;;  %v2809_v14 = vadd.f32 %v2808_v41, %v4774_v54 }
 0x2cd   : > { %v2921_v15 = vpop.f32.mrf.mxu1  ;;  %v2812_v18 = vpop.f32.mrf.mxu0 }
 0x2ce   : > { %3008 = vst [vmem:[%s4632_s17 + $0x110] sm:$0xff] %v2920_v44  ;;  %v2922_v20 = vadd.f32 %v2921_v15, %v2809_v14  ;;  %v2813_v22 = vadd.f32 %v2812_v18, %v4769_v63 }
 0x2cf   : > { %v2925_v3 = vpop.f32.mrf.mxu1  ;;  %v2814_v6 = vpop.f32.mrf.mxu0 }
 0x2d0   : > { %3009 = vst [vmem:[%s4632_s17 + $0x118] sm:$0xff] %v2922_v20  ;;  %v2926_v58 = vadd.f32 %v2925_v3, %v2813_v22  ;;  %v2815_v7 = vadd.f32 %v2814_v6, %v4774_v54 }
 0x2d1   : > { %v2927_v23 = vpop.f32.mrf.mxu1  ;;  %v2816_v56 = vpop.f32.mrf.mxu0 }
 0x2d2   : > { %3014 = vst [vmem:[%s4632_s17 + $0x140] sm:$0xff] %v2926_v58  ;;  %v2928_v59 = vadd.f32 %v2927_v23, %v2815_v7  ;;  %v2817_v61 = vadd.f32 %v2816_v56, %v4769_v63 }
 0x2d3   : > { %v2929_v0 = vpop.f32.mrf.mxu1  ;;  %v2818_v53 = vpop.f32.mrf.mxu0 }
 0x2d4   : > { %3015 = vst [vmem:[%s4632_s17 + $0x148] sm:$0xff] %v2928_v59  ;;  %v2930_v21 = vadd.f32 %v2929_v0, %v2817_v61  ;;  %v2819_v19 = vadd.f32 %v2818_v53, %v4774_v54 }
 0x2d5   : > { %v2931_v60 = vpop.f32.mrf.mxu1  ;;  %v2822_v17 = vpop.f32.mrf.mxu0 }
 0x2d6   : > { %3020 = vst [vmem:[%s4632_s17 + $0x170] sm:$0xff] %v2930_v21  ;;  %v2932_v2 = vadd.f32 %v2931_v60, %v2819_v19  ;;  %v2823_v55 = vadd.f32 %v2822_v17, %v4769_v63 }
 0x2d7   : > { %v2935_v8 = vpop.f32.mrf.mxu1  ;;  %v2824_v12 = vpop.f32.mrf.mxu0 }
 0x2d8   : > { %3021 = vst [vmem:[%s4632_s17 + $0x178] sm:$0xff] %v2932_v2  ;;  %v2936_v10 = vadd.f32 %v2935_v8, %v2823_v55  ;;  %v2825_v52 = vadd.f32 %v2824_v12, %v4774_v54 }
 0x2d9   : > { %v2937_v4 = vpop.f32.mrf.mxu1  ;;  %v2826_v57 = vpop.f32.mrf.mxu0 }
 0x2da   : > { %3026 = vst [vmem:[%s4632_s17 + $0x1a0] sm:$0xff] %v2936_v10  ;;  %v2938_v28 = vadd.f32 %v2937_v4, %v2825_v52  ;;  %v2827_v9 = vadd.f32 %v2826_v57, %v4769_v63 }
 0x2db   : > { %v2939_v11 = vpop.f32.mrf.mxu1  ;;  %v2828_v46 = vpop.f32.mrf.mxu0 }
 0x2dc   : > { %3027 = vst [vmem:[%s4632_s17 + $0x1a8] sm:$0xff] %v2938_v28  ;;  %v2940_v47 = vadd.f32 %v2939_v11, %v2827_v9  ;;  %v2829_v29 = vadd.f32 %v2828_v46, %v4774_v54 }
 0x2dd   : > { %v2941_v42 = vpop.f32.mrf.mxu1  ;;  %v2832_v48 = vpop.f32.mrf.mxu0 }
 0x2de   : > { %3032 = vst [vmem:[%s4632_s17 + $0x1d0] sm:$0xff] %v2940_v47  ;;  %v2942_v49 = vadd.f32 %v2941_v42, %v2829_v29  ;;  %v2833_v50 = vadd.f32 %v2832_v48, %v4769_v63 }
 0x2df   : > { %v2945_v51 = vpop.f32.mrf.mxu1  ;;  %v2834_v30 = vpop.f32.mrf.mxu0 }
 0x2e0   : > { %3033 = vst [vmem:[%s4632_s17 + $0x1d8] sm:$0xff] %v2942_v49  ;;  %v2946_v36 = vadd.f32 %v2945_v51, %v2833_v50  ;;  %v2835_v27 = vadd.f32 %v2834_v30, %v4774_v54 }
 0x2e1   : > { %v2947_v5 = vpop.f32.mrf.mxu1  ;;  %v2836_v1 = vpop.f32.mrf.mxu0 }
 0x2e2   : > { %3038 = vst [vmem:[%s4632_s17 + $0x200] sm:$0xff] %v2946_v36  ;;  %v2948_v13 = vadd.f32 %v2947_v5, %v2835_v27  ;;  %v2837_v16 = vadd.f32 %v2836_v1, %v4769_v63 }
 0x2e3   : > { %v2949_v24 = vpop.f32.mrf.mxu1  ;;  %v2838_v25 = vpop.f32.mrf.mxu0 }
 0x2e4   : > { %3039 = vst [vmem:[%s4632_s17 + $0x208] sm:$0xff] %v2948_v13  ;;  %v2950_v26 = vadd.f32 %v2949_v24, %v2837_v16  ;;  %v2839_v31 = vadd.f32 %v2838_v25, %v4774_v54 }
 0x2e5   : > { %v2951_v32 = vpop.f32.mrf.mxu1  ;;  %v2842_v33 = vpop.f32.mrf.mxu0 }
 0x2e6   : > { %3044 = vst [vmem:[%s4632_s17 + $0x230] sm:$0xff] %v2950_v26  ;;  %v2952_v34 = vadd.f32 %v2951_v32, %v2839_v31  ;;  %v2843_v35 = vadd.f32 %v2842_v33, %v4769_v63 }
 0x2e7   : > { %v2955_v39 = vpop.f32.mrf.mxu1  ;;  %v2844_v37 = vpop.f32.mrf.mxu0 }
 0x2e8   : > { %3045 = vst [vmem:[%s4632_s17 + $0x238] sm:$0xff] %v2952_v34  ;;  %v2956_v43 = vadd.f32 %v2955_v39, %v2843_v35  ;;  %v2845_v45 = vadd.f32 %v2844_v37, %v4774_v54 }
 0x2e9   : > { %v2957_v62 = vpop.f32.mrf.mxu1  ;;  %v2846_v38 = vpop.f32.mrf.mxu0 }
 0x2ea   : > { %3050 = vst [vmem:[%s4632_s17 + $0x260] sm:$0xff] %v2956_v43  ;;  %v2958_v40 = vadd.f32 %v2957_v62, %v2845_v45  ;;  %v2847_v41 = vadd.f32 %v2846_v38, %v4769_v63 }
 0x2eb   : > { %v2959_v44 = vpop.f32.mrf.mxu1  ;;  %v2848_v14 = vpop.f32.mrf.mxu0 }
 0x2ec   : > { %3051 = vst [vmem:[%s4632_s17 + $0x268] sm:$0xff] %v2958_v40  ;;  %v2960_v15 = vadd.f32 %v2959_v44, %v2847_v41  ;;  %v2849_v18 = vadd.f32 %v2848_v14, %v4774_v54 }
 0x2ed   : > { %v2961_v20 = vpop.f32.mrf.mxu1  ;;  %v2852_v22 = vpop.f32.mrf.mxu0 }
 0x2ee   : > { %3056 = vst [vmem:[%s4632_s17 + $0x290] sm:$0xff] %v2960_v15  ;;  %v2962_v3 = vadd.f32 %v2961_v20, %v2849_v18  ;;  %v2853_v6 = vadd.f32 %v2852_v22, %v4769_v63 }
 0x2ef   : > { %v2965_v58 = vpop.f32.mrf.mxu1  ;;  %v2854_v7 = vpop.f32.mrf.mxu0 }
 0x2f0   : > { %3057 = vst [vmem:[%s4632_s17 + $0x298] sm:$0xff] %v2962_v3  ;;  %v2966_v23 = vadd.f32 %v2965_v58, %v2853_v6  ;;  %v2855_v56 = vadd.f32 %v2854_v7, %v4774_v54 }
 0x2f1   : > { %v2967_v59 = vpop.f32.mrf.mxu1  ;;  %v2856_v61 = vpop.f32.mrf.mxu0 }
 0x2f2   : > { %3062 = vst [vmem:[%s4632_s17 + $0x2c0] sm:$0xff] %v2966_v23  ;;  %v2968_v0 = vadd.f32 %v2967_v59, %v2855_v56  ;;  %v2857_v53 = vadd.f32 %v2856_v61, %v4769_v63 }
 0x2f3   : > { %v2969_v21 = vpop.f32.mrf.mxu1  ;;  %v2858_v19 = vpop.f32.mrf.mxu0 }
 0x2f4   : > { %3063 = vst [vmem:[%s4632_s17 + $0x2c8] sm:$0xff] %v2968_v0  ;;  %v2970_v60 = vadd.f32 %v2969_v21, %v2857_v53  ;;  %v2859_v17 = vadd.f32 %v2858_v19, %v4774_v54 }
 0x2f5   : > { %v2971_v2 = vpop.f32.mrf.mxu1 }
 0x2f6   : > { %3068 = vst [vmem:[%s4632_s17 + $0x2f0] sm:$0xff] %v2970_v60  ;;  %v2972_v55 = vadd.f32 %v2971_v2, %v2859_v17 }
 0x2f8   : > { %3069 = vst [vmem:[%s4632_s17 + $0x2f8] sm:$0xff] %v2972_v55 }
 0x2f9   : > { %4095 = shalt.err (!%p4092_p9)
}
 0x2fa   : > { %s4096_s12 = scalar_lea.hbm %s4845_s14, 12288  ;;  %s4100_s26 = scalar_lea.hbm %s4897_s5, 24576 }
 0x2fb   : > { %p4097_p1 = scmp.ne.s32.totalorder %s4845_s14, %s4096_s12  ;;  %p4101_p11 = scmp.lt.s32.totalorder %s4845_s14, %s4897_s5 }
 0x2fc   : > { %p4102_p13 = scmp.lt.s32.totalorder %s4100_s26, %s4096_s12 }
 0x2fd   : > { %p4098_p8 = pnand %p4097_p1, %p4915_p6 }
 0x2fe   : > { %p4103_p2 = por %p4102_p13, %p4101_p11 }
 0x2ff   : > { %p4099_p10 = pneg %p4098_p8 }
 0x301   : > { %p4104_p4 = pnand %p4103_p2, %p4099_p10 }
 0x303   : > { %4107 = shalt.err (!%p4104_p4)
}
 0x304   : > { %s4167_s23 = smov 768   ;;  %s4168_s29 = smov 48  }
 0x305   : > { %3497 = dma.vmem_to_hbm [thread:$0]  (%p4915_p6), %s4848_s27, 12288, %s4845_s14, %s3071_s22, %s4167_s23, %s4167_s23, %s4168_s29  }
 0x306 PF: > { %s3100_s13 = sand.u32 1, %s4142_s18   ;;  %p4916_p12 = scmp.ne.s32.totalorder %s4903_s25, 0 }
 0x307   : > { %p4917_p0 = scmp.ge.s32.totalorder %s4154_s21, 2  ;;  %s3101_s16 = scalar_lea.sflag [#allocation4], %s3100_s13 }
 0x309   : > { %p3514_p5 = pnand %p4917_p0, %p4916_p12 }
 0x30b   : > { %p3515_p3 = pneg %p3514_p5 }
 0x30d   : > { %4137 = dma.done.wait (%p3515_p3), %s3101_s16, 12288  }
 0x30e   : > { %4139 = vsyncadd (%p3515_p3), %s3101_s16, 4294955008  ;;  %p20_p7 = scmp.ge.s32.totalorder %s4279_s6, 4   ;;  %s4918_s18 = smov %s4146_s19 }
 0x30f   : > { %s4919_s19 = smov %s4150_s20  ;;  %s4920_s20 = smov %s4289_s10 }
 0x310   : > { %s4921_s21 = smov %s4279_s6  ;;  %22 = sbr.rel (!%p20_p7) target bundleno = 7 (0x7), region = 97 }
 0x315   :  { %3106 = vsyncpa [#allocation3], 1 }
 0x316   :  { %3108 = vsyncpa [#allocation3 + $0x1], 1 }
 0x317   :  { %3109 = vsyncpa [#allocation6], 1 }
 0x318   :  { %3110 = vsyncpa [#allocation9], 1 }
 0x319   :  { %3111 = vsyncpa [#allocation4], 1 }
 0x31a   :  { %3113 = vsyncpa [#allocation4 + $0x1], 1 }

// kernel: tpu_custom_call.1
= control target key start
LH: loop header
LB: loop body
LE: loop exit
PB: predicated region body
PF: predicated region fallthrough
CT: control target
= control target key end

     0   :  { %10 = vsyncpa [#allocation3], 0  ;;  %s4892_s0 = inlined_call_operand.hbm [shape: bf16[256,256], index: 0, kind: input, shape index: {}]   ;;  %s4893_s1 = inlined_call_operand.hbm [shape: bf16[256,512], index: 1, kind: input, shape index: {}]   ;;  %s4894_s2 = inlined_call_operand.hbm [shape: f32[1,512], index: 2, kind: input, shape index: {}]   ;;  %s4895_s3 = inlined_call_operand.hbm [shape: bf16[512,768], index: 3, kind: input, shape index: {}]   ;;  %s4896_s4 = inlined_call_operand.vmem [shape: f32[1,768], index: 4, kind: input, shape index: {}]   ;;  %s4897_s5 = inlined_call_operand.hbm [shape: f32[256,768], index: 5, kind: output, shape index: {}]  }
   0x1   :  { %12 = vsyncpa [#allocation3 + $0x1], 0 }
   0x2   :  { %13 = vsyncpa [#allocation6], 0 }
   0x3   :  { %14 = vsyncpa [#allocation9], 0 }
   0x4   :  { %15 = vsyncpa [#allocation4], 0 }
   0x5   :  { %17 = vsyncpa [#allocation4 + $0x1], 0  ;;  %s4199_s18 = smov 0   ;;  %s4201_s19 = smov 0  }
   0x6   :  { %s4203_s20 = smov 0   ;;  %s4205_s21 = smov 0  }
   0x7 LB: > { %s4220_s22 = sadd.s32 4294967295, %s4154_s21   ;;  %s3187_s23 = sadd.s32 4294967294, %s4154_s21   ;;  %s4154_s21 = sphi %s4205_s21, %s4921_s21   ;;  %s4150_s20 = sphi %s4203_s20, %s4920_s20   ;;  %s4146_s19 = sphi %s4201_s19, %s4919_s19   ;;  %s4142_s18 = sphi %s4199_s18, %s4918_s18  }
   0x8   : > { %p43_p0 = scmp.ne.s32.totalorder %s4146_s19, %s4142_s18  ;;  %p4898_p1 = scmp.eq.s32.totalorder %s4220_s22, 0 }
   0x9   : > { %p157_p3 = scmp.eq.s32.totalorder %s3187_s23, 1  ;;  %p3188_p5 = scmp.ge.s32.totalorder %s4154_s21, 1 }
   0xa   : > { %p4229_p4 = por %p4898_p1, %p43_p0  ;;  %p164_p7 = scmp.lt.s32.totalorder %s4154_s21, 3 }
   0xb   : > { %p4234_p6 = por %p157_p3, %p43_p0  ;;  %s4156_s27 = smov [#allocation5]  }
   0xc   : > { %s4902_s24 = scalar_select %p4229_p4, 1, 0 }
   0xd   : > { %s4903_s25 = scalar_select %p4234_p6, 1, 0 }
   0xe   : > { %p4239_p8 = pnand %p3188_p5, %p164_p7  ;;  %s176_s28 = sshll.u32 %s4156_s27, 4  ;;  %s177_s28 = int_to_ptr.vmem [resolvable:$true] %s176_s28 }
   0xf   : > { %s4157_s30 = smov [#allocation7]   ;;  %s4158_s7 = smov [#allocation8]  }
  0x10   : > { %s4904_s26 = scalar_select %p4239_p8, 1, 0 }
  0x11   : > { %p3499_p9 = pneg %p4239_p8  ;;  %s190_s6 = sshll.u32 %s4157_s30, 4  ;;  %s191_s6 = int_to_ptr.vmem [resolvable:$true] %s190_s6 }
  0x12   : > { %s200_s8 = sshll.u32 %s4158_s7, 4  ;;  %s3987_s9 = scalar_lea.vmem %s177_s28, 8192  ;;  %s201_s8 = int_to_ptr.vmem [resolvable:$true] %s200_s8 }
  0x13   : > { %p4248_p11 = pnand %p3499_p9, %p4898_p1  ;;  %p3988_p13 = scmp.ne.s32.totalorder %s177_s28, %s3987_s9 }
  0x14   : > { %p3995_p5 = scmp.lt.s32.totalorder %s177_s28, %s177_s28  ;;  %p3996_p7 = scmp.lt.s32.totalorder %s3987_s9, %s3987_s9 }
  0x15   : > { %p3978_p12 = pneg %p4248_p11 }
  0x16   : > { %p3997_p9 = por %p3996_p7, %p3995_p5 }
  0x17   : > { %p3990_p0 = pnand %p3988_p13, %p3978_p12 }
  0x19   : > { %p3991_p3 = pneg %p3990_p0 }
  0x1b   : > { %p3998_p10 = pnand %p3997_p9, %p3991_p3 }
  0x1d   : > { %4001 = shalt.err (!%p3998_p10)
}
  0x1e   : > { %s4159_s10 = smov 256   ;;  %s4160_s11 = smov 16  }
  0x1f   : > { %3502 = dma.hbm_to_vmem [thread:$0]  (!%p4248_p11), %s4893_s1, 8192, %s177_s28, [#allocation6], %s4159_s10, %s4159_s10, %s4160_s11  }
  0x20   : > { %s4013_s14 = scalar_lea.vmem %s191_s6, 64  ;;  %p4021_p2 = scmp.lt.s32.totalorder %s191_s6, %s191_s6 }
  0x21   : > { %p4014_p1 = scmp.ne.s32.totalorder %s191_s6, %s4013_s14  ;;  %p4022_p6 = scmp.lt.s32.totalorder %s4013_s14, %s4013_s14 }
  0x23   : > { %p4016_p13 = pnand %p4014_p1, %p3978_p12  ;;  %p4023_p5 = por %p4022_p6, %p4021_p2 }
  0x25   : > { %p4017_p0 = pneg %p4016_p13 }
  0x27   : > { %p4024_p3 = pnand %p4023_p5, %p4017_p0 }
  0x29   : > { %4027 = shalt.err (!%p4024_p3)
}
  0x2a   : > { %3505 = dma.hbm_to_vmem [thread:$0]  (!%p4248_p11), %s4894_s2, 64, %s191_s6, [#allocation6]  }
  0x2b   : > { %s4039_s17 = scalar_lea.vmem %s201_s8, 24576  ;;  %p4047_p9 = scmp.lt.s32.totalorder %s201_s8, %s201_s8 }
  0x2c   : > { %p4040_p10 = scmp.ne.s32.totalorder %s201_s8, %s4039_s17  ;;  %p4048_p13 = scmp.lt.s32.totalorder %s4039_s17, %s4039_s17 }
  0x2e   : > { %p4042_p7 = pnand %p4040_p10, %p3978_p12  ;;  %p4049_p4 = por %p4048_p13, %p4047_p9 }
  0x30   : > { %p4043_p1 = pneg %p4042_p7 }
  0x32   : > { %p4050_p2 = pnand %p4049_p4, %p4043_p1 }
  0x34   : > { %4053 = shalt.err (!%p4050_p2)
}
  0x35   : > { %s4161_s23 = smov 384   ;;  %s4162_s27 = smov 24  }
  0x36   : > { %3508 = dma.hbm_to_vmem [thread:$0]  (!%p4248_p11), %s4895_s3, 24576, %s201_s8, [#allocation9], %s4161_s23, %s4161_s23, %s4162_s27  }
  0x37   : > { %s4279_s6 = sadd.s32 1, %s4154_s21   ;;  %s30_s9 = sadd.s32 1, %s4150_s20 }
  0x38   : > { %s27_s7 = ssub.s32 %s4154_s21, %s4279_s6  ;;  %p37_p6 = scmp.ne.s32.totalorder %s4150_s20, %s4146_s19 }
  0x39   : > { %p28_p4 = scmp.eq.s32.totalorder %s27_s7, 0  ;;  %p38_p12 = scmp.eq.s32.totalorder %s4154_s21, 0 }
  0x3a   : > { %p3520_p0 = scmp.lt.s32.totalorder %s4154_s21, 2  ;;  %p4906_p3 = scmp.eq.s32.totalorder %s4220_s22, 1 }
  0x3b   : > { %s4289_s10 = scalar_select %p28_p4, %s4150_s20, %s30_s9  }
  0x3c   : > { %p39_p5 = por %p38_p12, %p37_p6  ;;  %p4293_p10 = por %p4906_p3, %p37_p6 }
  0x3d   : > { %s217_s29 = sand.u32 1, %s4150_s20   ;;  %s3480_s12 = sshll.u32 %s4154_s21, 11 }
  0x3e   : > { %s4907_s11 = scalar_select %p4293_p10, 1, 0 }
  0x3f   : > { %s3193_s8 = sshll.u32 %s217_s29, 7  ;;  %s4302_s15 = scalar_lea.hbm %s4892_s0, %s3480_s12 }
  0x40   : > { %s221_s16 = scalar_lea.vmem [#allocation2], %s3193_s8  ;;  %p4304_p11 = pnand %p3520_p0, %p39_p5 }
  0x41   : > { %s229_s17 = sshll.u32 %s221_s16, 4  ;;  %s4310_s27 = scalar_lea.sflag [#allocation3], %s217_s29  ;;  %s4308_s17 = int_to_ptr.vmem [resolvable:$true] %s229_s17 }
  0x42   : > { %s4054_s28 = scalar_lea.hbm %s4302_s15, 2048  ;;  %p4056_p1 = pneg %p4304_p11 }
  0x43   : > { %p4055_p7 = scmp.ne.s32.totalorder %s4302_s15, %s4054_s28  ;;  %s4059_s9 = scalar_lea.hbm %s4892_s0, 4096 }
  0x44   : > { %p4060_p2 = scmp.lt.s32.totalorder %s4302_s15, %s4892_s0  ;;  %p4061_p4 = scmp.lt.s32.totalorder %s4059_s9, %s4054_s28 }
  0x45   : > { %p4057_p9 = pnand %p4056_p1, %p4055_p7 }
  0x46   : > { %p4062_p6 = por %p4061_p4, %p4060_p2 }
  0x47   : > { %p4058_p13 = pneg %p4057_p9 }
  0x49   : > { %p4063_p12 = pnand %p4062_p6, %p4058_p13 }
  0x4b   : > { %4066 = shalt.err (!%p4063_p12)
}
  0x4c   : > { %s4067_s29 = scalar_lea.vmem %s4308_s17, 2048  ;;  %s4163_s13 = smov [#allocation2]  }
  0x4d   : > { %p4068_p0 = scmp.ne.s32.totalorder %s4308_s17, %s4067_s29  ;;  %s4072_s14 = sshll.u32 %s4163_s13, 4  ;;  %s4073_s14 = int_to_ptr.vmem [resolvable:$false] %s4072_s14 }
  0x4e   : > { %s4074_s16 = scalar_lea.vmem %s4073_s14, 4096  ;;  %p4075_p7 = scmp.lt.s32.totalorder %s4308_s17, %s4073_s14 }
  0x4f   : > { %p4070_p5 = pnand %p4068_p0, %p4056_p1  ;;  %p4076_p9 = scmp.lt.s32.totalorder %s4074_s16, %s4067_s29 }
  0x51   : > { %p4071_p3 = pneg %p4070_p5  ;;  %p4077_p10 = por %p4076_p9, %p4075_p7 }
  0x53   : > { %p4078_p8 = pnand %p4077_p10, %p4071_p3 }
  0x55   : > { %4081 = shalt.err (!%p4078_p8)
}
  0x56   : > { %s4164_s28 = smov 128   ;;  %s4165_s30 = smov 8  }
  0x57   : > { %3512 = dma.hbm_to_vmem [thread:$0]  (!%p4304_p11), %s4302_s15, 2048, %s4308_s17, %s4310_s27, %s4164_s28, %s4164_s28, %s4165_s30  }
  0x58   : > { %p4909_p1 = scmp.ne.s32.totalorder %s4904_s26, 0 }
  0x59   : > { %s4334_s7 = sand.u32 (!%p4909_p1), 1, %s4146_s19   ;;  %p4910_p8 = scmp.ne.s32.totalorder (!%p4909_p1), %s4902_s24, 0 }
  0x5a   : > { %241 = sbr.rel (%p4909_p1) target bundleno = 774 (0x306), region = 40  ;;  %s3198_s9 = sshll.u32 (!%p4909_p1), %s4334_s7, 7 }
  0x5b   : > { %s244_s12 = scalar_lea.sflag (!%p4909_p1), [#allocation3], %s4334_s7  ;;  %s4338_s8 = scalar_lea.vmem (!%p4909_p1), [#allocation2], %s3198_s9 }
  0x5f   : > { %4125 = dma.done.wait (%p4910_p8), %s244_s12, 2048  }
  0x60   : > { %4127 = vsyncadd (%p4910_p8), %s244_s12, 4294965248  ;;  %p4911_p10 = scmp.eq.s32.totalorder %s4220_s22, 0 }
  0x62   : > { %4129 = dma.done.wait (%p4911_p10), [#allocation6], 8256   ;;  %p4912_p11 = pmov %p4911_p10 }
  0x63   : > { %p4913_p13 = pmov %p4911_p10 }
  0x64   : > { %4131 = vsyncadd (%p4912_p11), [#allocation6], 4294959040 }
  0x65   : > { %4133 = dma.done.wait (%p4913_p13), [#allocation9], 24576   ;;  %p4914_p2 = pmov %p4911_p10 }
  0x66   : > { %v3568_v0 = vld [vmem:[#allocation5 + $0xe4] ss:$16 sps:$4 sm:$0xff]   ;;  %v3570_v1 = vld [vmem:[#allocation5 + $0xec] ss:$16 sps:$4 sm:$0xff]   ;;  %v3572_v2 = vld [vmem:[#allocation5 + $0xe0] ss:$16 sps:$4 sm:$0xff]  }
  0x67   : > { %4135 = vsyncadd (%p4914_p2), [#allocation9], 4294942720  ;;  %790 = vmatprep.subr.bf16.mxu0 %v3568_v0  ;;  %v3573_v3 = vld [vmem:[#allocation5 + $0xe8] ss:$16 sps:$4 sm:$0xff]   ;;  %903 = vmatprep.subr.bf16.mxu1 %v3570_v1  ;;  %v3574_v4 = vld [vmem:[#allocation5 + $0xc4] ss:$16 sps:$4 sm:$0xff]  }
  0x68   : > { %791 = vmatpush1.bf16.msra.mxu0 %v3572_v2  ;;  %904 = vmatpush1.bf16.msra.mxu1 %v3573_v3  ;;  %v3576_v5 = vld [vmem:[#allocation5 + $0xcc] ss:$16 sps:$4 sm:$0xff]   ;;  %v3578_v6 = vld [vmem:[#allocation5 + $0xc0] ss:$16 sps:$4 sm:$0xff]   ;;  %v3579_v7 = vld [vmem:[#allocation5 + $0xc8] ss:$16 sps:$4 sm:$0xff]  }
  0x69   : > { %792 = vmatprep.subr.bf16.mxu0 %v3574_v4  ;;  %905 = vmatprep.subr.bf16.mxu1 %v3576_v5  ;;  %v3580_v8 = vld [vmem:[#allocation5 + $0xa4] ss:$16 sps:$4 sm:$0xff]   ;;  %v3582_v9 = vld [vmem:[#allocation5 + $0xac] ss:$16 sps:$4 sm:$0xff]   ;;  %v3584_v10 = vld [vmem:[#allocation5 + $0xa0] ss:$16 sps:$4 sm:$0xff]  }
  0x6a   : > { %v3585_v11 = vld [vmem:[#allocation5 + $0xa8] ss:$16 sps:$4 sm:$0xff]   ;;  %v3586_v12 = vld [vmem:[#allocation5 + $0x84] ss:$16 sps:$4 sm:$0xff]   ;;  %v3588_v13 = vld [vmem:[#allocation5 + $0x8c] ss:$16 sps:$4 sm:$0xff]  }
  0x6b   : > { %v3590_v14 = vld [vmem:[#allocation5 + $0x80] ss:$16 sps:$4 sm:$0xff]   ;;  %v3591_v15 = vld [vmem:[#allocation5 + $0x88] ss:$16 sps:$4 sm:$0xff]   ;;  %v3592_v16 = vld [vmem:[#allocation5 + $0x64] ss:$16 sps:$4 sm:$0xff]  }
  0x6c   : > { %793 = vmatpush1.bf16.msra.mxu0 %v3578_v6  ;;  %906 = vmatpush1.bf16.msra.mxu1 %v3579_v7  ;;  %v3594_v17 = vld [vmem:[#allocation5 + $0x6c] ss:$16 sps:$4 sm:$0xff]   ;;  %v3596_v18 = vld [vmem:[#allocation5 + $0x60] ss:$16 sps:$4 sm:$0xff]   ;;  %v3597_v19 = vld [vmem:[#allocation5 + $0x68] ss:$16 sps:$4 sm:$0xff]  }
  0x6d   : > { %794 = vmatprep.subr.bf16.mxu0 %v3580_v8  ;;  %907 = vmatprep.subr.bf16.mxu1 %v3582_v9  ;;  %v3598_v20 = vld [vmem:[#allocation5 + $0x44] ss:$16 sps:$4 sm:$0xff]   ;;  %v3600_v21 = vld [vmem:[#allocation5 + $0x4c] ss:$16 sps:$4 sm:$0xff]   ;;  %v3602_v22 = vld [vmem:[#allocation5 + $0x40] ss:$16 sps:$4 sm:$0xff]  }
  0x6e   : > { %v3603_v23 = vld [vmem:[#allocation5 + $0x48] ss:$16 sps:$4 sm:$0xff]   ;;  %v3604_v24 = vld [vmem:[#allocation5 + $0x24] ss:$16 sps:$4 sm:$0xff]   ;;  %v3606_v25 = vld [vmem:[#allocation5 + $0x2c] ss:$16 sps:$4 sm:$0xff]  }
  0x6f   : > { %v3608_v26 = vld [vmem:[#allocation5 + $0x20] ss:$16 sps:$4 sm:$0xff]   ;;  %v3609_v27 = vld [vmem:[#allocation5 + $0x28] ss:$16 sps:$4 sm:$0xff]   ;;  %v3610_v28 = vld [vmem:[#allocation5 + $0x4] ss:$16 sps:$4 sm:$0xff]  }
  0x70   : > { %795 = vmatpush1.bf16.msra.mxu0 %v3584_v10  ;;  %908 = vmatpush1.bf16.msra.mxu1 %v3585_v11  ;;  %v3612_v29 = vld [vmem:[#allocation5 + $0xc] ss:$16 sps:$4 sm:$0xff]   ;;  %v3614_v30 = vld [vmem:[#allocation5] ss:$16 sps:$4 sm:$0xff]   ;;  %v3615_v31 = vld [vmem:[#allocation5 + $0x8] ss:$16 sps:$4 sm:$0xff]  }
  0x71   : > { %796 = vmatprep.subr.bf16.mxu0 %v3586_v12  ;;  %909 = vmatprep.subr.bf16.mxu1 %v3588_v13  ;;  %v3616_v32 = vld [vmem:[#allocation5 + $0x1e4] ss:$16 sps:$4 sm:$0xff]   ;;  %v3618_v33 = vld [vmem:[#allocation5 + $0x1ec] ss:$16 sps:$4 sm:$0xff]   ;;  %v3620_v34 = vld [vmem:[#allocation5 + $0x1e0] ss:$16 sps:$4 sm:$0xff]  }
  0x72   : > { %v3621_v35 = vld [vmem:[#allocation5 + $0x1e8] ss:$16 sps:$4 sm:$0xff]   ;;  %v3622_v36 = vld [vmem:[#allocation5 + $0x1c4] ss:$16 sps:$4 sm:$0xff]   ;;  %v3624_v37 = vld [vmem:[#allocation5 + $0x1cc] ss:$16 sps:$4 sm:$0xff]  }
  0x73   : > { %v3626_v38 = vld [vmem:[#allocation5 + $0x1c0] ss:$16 sps:$4 sm:$0xff]   ;;  %v3627_v39 = vld [vmem:[#allocation5 + $0x1c8] ss:$16 sps:$4 sm:$0xff]   ;;  %v3628_v40 = vld [vmem:[#allocation5 + $0x1a4] ss:$16 sps:$4 sm:$0xff]  }
  0x74   : > { %797 = vmatpush1.bf16.msra.mxu0 %v3590_v14  ;;  %910 = vmatpush1.bf16.msra.mxu1 %v3591_v15  ;;  %v3630_v41 = vld [vmem:[#allocation5 + $0x1ac] ss:$16 sps:$4 sm:$0xff]   ;;  %v3632_v42 = vld [vmem:[#allocation5 + $0x1a0] ss:$16 sps:$4 sm:$0xff]   ;;  %v3633_v43 = vld [vmem:[#allocation5 + $0x1a8] ss:$16 sps:$4 sm:$0xff]  }
  0x75   : > { %798 = vmatprep.subr.bf16.mxu0 %v3592_v16  ;;  %911 = vmatprep.subr.bf16.mxu1 %v3594_v17  ;;  %v3634_v44 = vld [vmem:[#allocation5 + $0x184] ss:$16 sps:$4 sm:$0xff]   ;;  %v3636_v45 = vld [vmem:[#allocation5 + $0x18c] ss:$16 sps:$4 sm:$0xff]   ;;  %v3638_v46 = vld [vmem:[#allocation5 + $0x180] ss:$16 sps:$4 sm:$0xff]  }
  0x76   : > { %v3639_v47 = vld [vmem:[#allocation5 + $0x188] ss:$16 sps:$4 sm:$0xff]   ;;  %v3666_v48 = vld [vmem:[%s4338_s8 + $0x4] ss:$8 sps:$4 sm:$0xff]   ;;  %v3644_v51 = vld [vmem:[#allocation5 + $0x160] ss:$16 sps:$4 sm:$0xff]  }
  0x77   : > { %v3640_v49 = vld [vmem:[#allocation5 + $0x164] ss:$16 sps:$4 sm:$0xff]   ;;  %v3642_v50 = vld [vmem:[#allocation5 + $0x16c] ss:$16 sps:$4 sm:$0xff]   ;;  %822 = vmatprep.mubr.bf16.mxu0 %v3666_v48  ;;  %935 = vmatprep.mubr.bf16.mxu1 %v3666_v48  ;;  %v3645_v52 = vld [vmem:[#allocation5 + $0x168] ss:$16 sps:$4 sm:$0xff]  }
  0x78   : > { %799 = vmatpush1.bf16.msra.mxu0 %v3596_v18  ;;  %912 = vmatpush1.bf16.msra.mxu1 %v3597_v19  ;;  %v3646_v53 = vld [vmem:[#allocation5 + $0x144] ss:$16 sps:$4 sm:$0xff]   ;;  %v3648_v54 = vld [vmem:[#allocation5 + $0x14c] ss:$16 sps:$4 sm:$0xff]   ;;  %v3650_v55 = vld [vmem:[#allocation5 + $0x140] ss:$16 sps:$4 sm:$0xff]  }
  0x79   : > { %800 = vmatprep.subr.bf16.mxu0 %v3598_v20  ;;  %913 = vmatprep.subr.bf16.mxu1 %v3600_v21  ;;  %v3651_v56 = vld [vmem:[#allocation5 + $0x148] ss:$16 sps:$4 sm:$0xff]   ;;  %v3652_v57 = vld [vmem:[#allocation5 + $0x124] ss:$16 sps:$4 sm:$0xff]   ;;  %v3654_v58 = vld [vmem:[#allocation5 + $0x12c] ss:$16 sps:$4 sm:$0xff]  }
  0x7a   : > { %v3656_v59 = vld [vmem:[#allocation5 + $0x120] ss:$16 sps:$4 sm:$0xff]   ;;  %v3657_v60 = vld [vmem:[#allocation5 + $0x128] ss:$16 sps:$4 sm:$0xff]   ;;  %v3658_v61 = vld [vmem:[#allocation5 + $0x104] ss:$16 sps:$4 sm:$0xff]  }
  0x7b   : > { %v3660_v62 = vld [vmem:[#allocation5 + $0x10c] ss:$16 sps:$4 sm:$0xff]   ;;  %v3662_v63 = vld [vmem:[#allocation5 + $0x100] ss:$16 sps:$4 sm:$0xff]   ;;  %v3663_v0 = vld [vmem:[#allocation5 + $0x108] ss:$16 sps:$4 sm:$0xff]  }
  0x7c   : > { %801 = vmatpush1.bf16.msra.mxu0 %v3602_v22  ;;  %914 = vmatpush1.bf16.msra.mxu1 %v3603_v23  ;;  %v3690_v1 = vld [vmem:[#allocation8 + $0x154] ss:$24 sps:$4 sm:$0xff]   ;;  %v3664_v3 = vld [vmem:[%s4338_s8] ss:$8 sps:$4 sm:$0xff]   ;;  %v3667_v4 = vld [vmem:[%s4338_s8 + $0x14] ss:$8 sps:$4 sm:$0xff]  }
  0x7d   : > { %802 = vmatprep.subr.bf16.mxu0 %v3604_v24  ;;  %915 = vmatprep.subr.bf16.mxu1 %v3606_v25  ;;  %v3693_v2 = vld [vmem:[#allocation8 + $0x454] ss:$24 sps:$4 sm:$0xff]   ;;  %v3688_v5 = vld [vmem:[#allocation8 + $0x150] ss:$24 sps:$4 sm:$0xff]   ;;  %v3696_v7 = vld [vmem:[#allocation8 + $0x124] ss:$24 sps:$4 sm:$0xff]  }
  0x7e   : > { %v3691_v6 = vld [vmem:[#allocation8 + $0x450] ss:$24 sps:$4 sm:$0xff]   ;;  %v3699_v8 = vld [vmem:[#allocation8 + $0x424] ss:$24 sps:$4 sm:$0xff]   ;;  %v3694_v9 = vld [vmem:[#allocation8 + $0x120] ss:$24 sps:$4 sm:$0xff]  }
  0x7f   : > { %v3697_v10 = vld [vmem:[#allocation8 + $0x420] ss:$24 sps:$4 sm:$0xff]   ;;  %v3702_v11 = vld [vmem:[#allocation8 + $0xf4] ss:$24 sps:$4 sm:$0xff]   ;;  %v3700_v15 = vld [vmem:[#allocation8 + $0xf0] ss:$24 sps:$4 sm:$0xff]  }
  0x80   : > { %803 = vmatpush1.bf16.msra.mxu0 %v3608_v26  ;;  %916 = vmatpush1.bf16.msra.mxu1 %v3609_v27  ;;  %v3705_v12 = vld [vmem:[#allocation8 + $0x3f4] ss:$24 sps:$4 sm:$0xff]   ;;  %v3670_v14 = vld [vmem:[%s4338_s8 + $0x24] ss:$8 sps:$4 sm:$0xff]   ;;  %v3708_v17 = vld [vmem:[#allocation8 + $0xc4] ss:$24 sps:$4 sm:$0xff]  }
  0x81   : > { %804 = vmatprep.subr.bf16.mxu0 %v3610_v28  ;;  %917 = vmatprep.subr.bf16.mxu1 %v3612_v29  ;;  %v3669_v13 = vld [vmem:[%s4338_s8 + $0x10] ss:$8 sps:$4 sm:$0xff]   ;;  %v3703_v16 = vld [vmem:[#allocation8 + $0x3f0] ss:$24 sps:$4 sm:$0xff]   ;;  %v3711_v18 = vld [vmem:[#allocation8 + $0x3c4] ss:$24 sps:$4 sm:$0xff]  }
  0x82   : > { %v3706_v19 = vld [vmem:[#allocation8 + $0xc0] ss:$24 sps:$4 sm:$0xff]   ;;  %v3714_v21 = vld [vmem:[#allocation8 + $0x94] ss:$24 sps:$4 sm:$0xff]   ;;  %v3672_v23 = vld [vmem:[%s4338_s8 + $0x20] ss:$8 sps:$4 sm:$0xff]  }
  0x83   : > { %v3709_v20 = vld [vmem:[#allocation8 + $0x3c0] ss:$24 sps:$4 sm:$0xff]   ;;  %v3717_v22 = vld [vmem:[#allocation8 + $0x394] ss:$24 sps:$4 sm:$0xff]   ;;  %v3712_v25 = vld [vmem:[#allocation8 + $0x90] ss:$24 sps:$4 sm:$0xff]  }
  0x84   : > { %805 = vmatpush1.bf16.msra.mxu0 %v3614_v30  ;;  %918 = vmatpush1.bf16.msra.mxu1 %v3615_v31  ;;  %v3673_v24 = vld [vmem:[%s4338_s8 + $0x34] ss:$8 sps:$4 sm:$0xff]   ;;  %v3720_v27 = vld [vmem:[#allocation8 + $0x64] ss:$24 sps:$4 sm:$0xff]   ;;  %v3675_v30 = vld [vmem:[%s4338_s8 + $0x30] ss:$8 sps:$4 sm:$0xff]  }
  0x85   : > { %806 = vmatprep.subr.bf16.mxu0 %v3616_v32  ;;  %919 = vmatprep.subr.bf16.mxu1 %v3618_v33  ;;  %v3715_v26 = vld [vmem:[#allocation8 + $0x390] ss:$24 sps:$4 sm:$0xff]   ;;  %v3723_v28 = vld [vmem:[#allocation8 + $0x364] ss:$24 sps:$4 sm:$0xff]   ;;  %v3718_v29 = vld [vmem:[#allocation8 + $0x60] ss:$24 sps:$4 sm:$0xff]  }
  0x86   : > { %v3721_v31 = vld [vmem:[#allocation8 + $0x360] ss:$24 sps:$4 sm:$0xff]   ;;  %v3726_v33 = vld [vmem:[#allocation8 + $0x34] ss:$24 sps:$4 sm:$0xff]   ;;  %v3747_v48 = vld [vmem:[#allocation8 + $0x5a4] ss:$24 sps:$4 sm:$0xff]  }
  0x87   : > { %v3676_v32 = vld [vmem:[%s4338_s8 + $0x44] ss:$8 sps:$4 sm:$0xff]   ;;  %s3481_s15 = smul.u32 768, %s4334_s7  ;;  %p4915_p6 = scmp.ne.s32.totalorder %s4907_s11, 0 }
  0x88   : > { %807 = vmatpush2.bf16.msra.mxu0 %v3620_v34  ;;  %920 = vmatpush2.bf16.msra.mxu1 %v3621_v35  ;;  %v3729_v34 = vld [vmem:[#allocation8 + $0x334] ss:$24 sps:$4 sm:$0xff]   ;;  %v3724_v35 = vld [vmem:[#allocation8 + $0x30] ss:$24 sps:$4 sm:$0xff]   ;;  %s3482_s23 = smul.u32 12288, %s4220_s22  ;;  %s3071_s22 = scalar_lea.sflag [#allocation4], %s4334_s7 }
  0x89   : > { %808 = vmatprep.subr.bf16.mxu0 %v3622_v36  ;;  %921 = vmatprep.subr.bf16.mxu1 %v3624_v37  ;;  %v3727_v36 = vld [vmem:[#allocation8 + $0x330] ss:$24 sps:$4 sm:$0xff]   ;;  %v3732_v37 = vld [vmem:[#allocation8 + $0x4] ss:$24 sps:$4 sm:$0xff]   ;;  %s4632_s17 = scalar_lea.vmem [#allocation10], %s3481_s15  ;;  %s4166_s28 = smov [#allocation10]  }
  0x8a   : > { %s3085_s27 = sshll.u32 %s4632_s17, 4  ;;  %s4845_s14 = scalar_lea.hbm %s4897_s5, %s3482_s23  ;;  %s4848_s27 = int_to_ptr.vmem [resolvable:$true] %s3085_s27 }
  0x8b   : > { %s4082_s16 = scalar_lea.vmem %s4848_s27, 12288  ;;  %s4086_s30 = sshll.u32 %s4166_s28, 4  ;;  %s4087_s30 = int_to_ptr.vmem [resolvable:$false] %s4086_s30 }
  0x8c   : > { %809 = vmatpush2.bf16.msra.mxu0 %v3626_v38  ;;  %922 = vmatpush2.bf16.msra.mxu1 %v3627_v39  ;;  %v3735_v38 = vld [vmem:[#allocation8 + $0x304] ss:$24 sps:$4 sm:$0xff]   ;;  %v3730_v39 = vld [vmem:[#allocation8] ss:$24 sps:$4 sm:$0xff]   ;;  %p4083_p4 = scmp.ne.s32.totalorder %s4848_s27, %s4082_s16  ;;  %s4088_s9 = scalar_lea.vmem %s4087_s30, 24576 }
  0x8d   : > { %810 = vmatprep.subr.bf16.mxu0 %v3628_v40  ;;  %923 = vmatprep.subr.bf16.mxu1 %v3630_v41  ;;  %v3733_v40 = vld [vmem:[#allocation8 + $0x300] ss:$24 sps:$4 sm:$0xff]   ;;  %v3738_v41 = vld [vmem:[#allocation8 + $0x2d4] ss:$24 sps:$4 sm:$0xff]   ;;  %p4089_p5 = scmp.lt.s32.totalorder %s4848_s27, %s4087_s30  ;;  %p4090_p3 = scmp.lt.s32.totalorder %s4088_s9, %s4082_s16 }
  0x8e   : > { %p4084_p12 = pnand %p4083_p4, %p4915_p6 }
  0x8f   : > { %p4091_p7 = por %p4090_p3, %p4089_p5 }
  0x90   : > { %811 = vmatpush2.bf16.msra.mxu0 %v3632_v42  ;;  %924 = vmatpush2.bf16.msra.mxu1 %v3633_v43  ;;  %v3741_v42 = vld [vmem:[#allocation8 + $0x5d4] ss:$24 sps:$4 sm:$0xff]   ;;  %v3678_v43 = vld [vmem:[%s4338_s8 + $0x40] ss:$8 sps:$4 sm:$0xff]   ;;  %p4085_p0 = pneg %p4084_p12 }
  0x91   : > { %812 = vmatprep.subr.bf16.mxu0 %v3634_v44  ;;  %925 = vmatprep.subr.bf16.mxu1 %v3636_v45  ;;  %v3679_v44 = vld [vmem:[%s4338_s8 + $0x54] ss:$8 sps:$4 sm:$0xff]  }
  0x92   : > { %v3736_v45 = vld [vmem:[#allocation8 + $0x2d0] ss:$24 sps:$4 sm:$0xff]   ;;  %p4092_p9 = pnand %p4091_p7, %p4085_p0 }
  0x94   : > { %813 = vmatpush2.bf16.msra.mxu0 %v3638_v46  ;;  %926 = vmatpush2.bf16.msra.mxu1 %v3639_v47  ;;  %v3739_v46 = vld [vmem:[#allocation8 + $0x5d0] ss:$24 sps:$4 sm:$0xff]   ;;  %v3744_v47 = vld [vmem:[#allocation8 + $0x2a4] ss:$24 sps:$4 sm:$0xff]  }
  0x95   : > { %814 = vmatprep.subr.bf16.mxu0 %v3640_v49  ;;  %927 = vmatprep.subr.bf16.mxu1 %v3642_v50  ;;  %v3742_v49 = vld [vmem:[#allocation8 + $0x2a0] ss:$24 sps:$4 sm:$0xff]  }
  0x96   : > { %v3745_v50 = vld [vmem:[#allocation8 + $0x5a0] ss:$24 sps:$4 sm:$0xff]  }
  0x98   : > { %815 = vmatpush2.bf16.msra.mxu0 %v3644_v51  ;;  %928 = vmatpush2.bf16.msra.mxu1 %v3645_v52  ;;  %v3750_v51 = vld [vmem:[#allocation8 + $0x274] ss:$24 sps:$4 sm:$0xff]  }
  0x99   : > { %816 = vmatprep.subr.bf16.mxu0 %v3646_v53  ;;  %929 = vmatprep.subr.bf16.mxu1 %v3648_v54  ;;  %v3753_v52 = vld [vmem:[#allocation8 + $0x574] ss:$24 sps:$4 sm:$0xff]   ;;  %v3682_v54 = vld [vmem:[%s4338_s8 + $0x64] ss:$8 sps:$4 sm:$0xff]  }
  0x9a   : > { %v3681_v53 = vld [vmem:[%s4338_s8 + $0x50] ss:$8 sps:$4 sm:$0xff]  }
  0x9c   : > { %817 = vmatpush2.bf16.msra.mxu0 %v3650_v55  ;;  %930 = vmatpush2.bf16.msra.mxu1 %v3651_v56  ;;  %v3748_v55 = vld [vmem:[#allocation8 + $0x270] ss:$24 sps:$4 sm:$0xff]  }
  0x9d   : > { %818 = vmatprep.subr.bf16.mxu0 %v3652_v57  ;;  %931 = vmatprep.subr.bf16.mxu1 %v3654_v58  ;;  %v3751_v56 = vld [vmem:[#allocation8 + $0x570] ss:$24 sps:$4 sm:$0xff]   ;;  %v3756_v57 = vld [vmem:[#allocation8 + $0x244] ss:$24 sps:$4 sm:$0xff]  }
  0x9e   : > { %v3759_v58 = vld [vmem:[#allocation8 + $0x544] ss:$24 sps:$4 sm:$0xff]  }
  0xa0   : > { %819 = vmatpush2.bf16.msra.mxu0 %v3656_v59  ;;  %932 = vmatpush2.bf16.msra.mxu1 %v3657_v60  ;;  %v3754_v59 = vld [vmem:[#allocation8 + $0x240] ss:$24 sps:$4 sm:$0xff]  }
  0xa1   : > { %820 = vmatprep.subr.bf16.mxu0 %v3658_v61  ;;  %933 = vmatprep.subr.bf16.mxu1 %v3660_v62  ;;  %v3757_v60 = vld [vmem:[#allocation8 + $0x540] ss:$24 sps:$4 sm:$0xff]   ;;  %v3762_v61 = vld [vmem:[#allocation8 + $0x214] ss:$24 sps:$4 sm:$0xff]  }
  0xa2   : > { %v3765_v62 = vld [vmem:[#allocation8 + $0x514] ss:$24 sps:$4 sm:$0xff]  }
  0xa4   : > { %821 = vmatpush2.bf16.msra.mxu0 %v3662_v63  ;;  %934 = vmatpush2.bf16.msra.mxu1 %v3663_v0  ;;  %v3684_v63 = vld [vmem:[%s4338_s8 + $0x60] ss:$8 sps:$4 sm:$0xff]   ;;  %v3685_v0 = vld [vmem:[%s4338_s8 + $0x74] ss:$8 sps:$4 sm:$0xff]  }
  0xa5   : > { %2296 = vmatprep.subr.bf16.mxu0 %v3690_v1  ;;  %2409 = vmatprep.subr.bf16.mxu1 %v3693_v2  ;;  %v3760_v1 = vld [vmem:[#allocation8 + $0x210] ss:$24 sps:$4 sm:$0xff]  }
  0xa6   : > { %v3763_v2 = vld [vmem:[#allocation8 + $0x510] ss:$24 sps:$4 sm:$0xff]  }
  0xa7   : > { %823 = vmatmul.mubr.bf16.vlgmr.msra.gmra.mxu0 %v3664_v3  ;;  %936 = vmatmul.mubr.bf16.vlgmr.msra.gmra.mxu1 %v3664_v3  ;;  %v3687_v3 = vld [vmem:[%s4338_s8 + $0x70] ss:$8 sps:$4 sm:$0xff]  }
  0xa8   : > { %832 = vmatprep.mubr.bf16.mxu0 %v3667_v4  ;;  %945 = vmatprep.mubr.bf16.mxu1 %v3667_v4  ;;  %v3768_v4 = vld [vmem:[#allocation8 + $0x1e4] ss:$24 sps:$4 sm:$0xff]  }
  0xa9   : > { %2297 = vmatpush1.bf16.msra.mxu0 %v3688_v5  ;;  %2410 = vmatpush1.bf16.msra.mxu1 %v3691_v6  ;;  %v3771_v5 = vld [vmem:[#allocation8 + $0x4e4] ss:$24 sps:$4 sm:$0xff]   ;;  %v3766_v6 = vld [vmem:[#allocation8 + $0x1e0] ss:$24 sps:$4 sm:$0xff]  }
  0xaa   : > { %2298 = vmatprep.subr.bf16.mxu0 %v3696_v7  ;;  %2411 = vmatprep.subr.bf16.mxu1 %v3699_v8  ;;  %v3769_v7 = vld [vmem:[#allocation8 + $0x4e0] ss:$24 sps:$4 sm:$0xff]   ;;  %v3774_v8 = vld [vmem:[#allocation8 + $0x1b4] ss:$24 sps:$4 sm:$0xff]  }
  0xad   : > { %2299 = vmatpush1.bf16.msra.mxu0 %v3694_v9  ;;  %2412 = vmatpush1.bf16.msra.mxu1 %v3697_v10  ;;  %v3777_v9 = vld [vmem:[#allocation8 + $0x4b4] ss:$24 sps:$4 sm:$0xff]   ;;  %v3772_v10 = vld [vmem:[#allocation8 + $0x1b0] ss:$24 sps:$4 sm:$0xff]  }
  0xae   : > { %2300 = vmatprep.subr.bf16.mxu0 %v3702_v11  ;;  %2413 = vmatprep.subr.bf16.mxu1 %v3705_v12  ;;  %v3775_v11 = vld [vmem:[#allocation8 + $0x4b0] ss:$24 sps:$4 sm:$0xff]   ;;  %v3780_v12 = vld [vmem:[#allocation8 + $0x184] ss:$24 sps:$4 sm:$0xff]  }
  0xaf   : > { %833 = vmatmul.mubr.bf16.gmra.mxu0 %v3669_v13  ;;  %946 = vmatmul.mubr.bf16.gmra.mxu1 %v3669_v13  ;;  %v3783_v13 = vld [vmem:[#allocation8 + $0x484] ss:$24 sps:$4 sm:$0xff]  }
  0xb0   : > { %842 = vmatprep.mubr.bf16.mxu0 %v3670_v14  ;;  %955 = vmatprep.mubr.bf16.mxu1 %v3670_v14  ;;  %v3778_v14 = vld [vmem:[#allocation8 + $0x180] ss:$24 sps:$4 sm:$0xff]  }
  0xb1   : > { %2301 = vmatpush1.bf16.msra.mxu0 %v3700_v15  ;;  %2414 = vmatpush1.bf16.msra.mxu1 %v3703_v16  ;;  %v3781_v15 = vld [vmem:[#allocation8 + $0x480] ss:$24 sps:$4 sm:$0xff]   ;;  %v3786_v16 = vld [vmem:[#allocation8 + $0x15c] ss:$24 sps:$4 sm:$0xff]  }
  0xb2   : > { %2302 = vmatprep.subr.bf16.mxu0 %v3708_v17  ;;  %2415 = vmatprep.subr.bf16.mxu1 %v3711_v18  ;;  %v3789_v17 = vld [vmem:[#allocation8 + $0x45c] ss:$24 sps:$4 sm:$0xff]   ;;  %v370_v18 = vlaneseq }
  0xb5   : > { %2303 = vmatpush1.bf16.msra.mxu0 %v3706_v19  ;;  %2416 = vmatpush1.bf16.msra.mxu1 %v3709_v20  ;;  %v4368_v19 = vshrl.u32 %v370_v18, 7 }
  0xb6   : > { %2304 = vmatprep.subr.bf16.mxu0 %v3714_v21  ;;  %2417 = vmatprep.subr.bf16.mxu1 %v3717_v22 }
  0xb7   : > { %843 = vmatmul.mubr.bf16.gmra.mxu0 %v3672_v23  ;;  %956 = vmatmul.mubr.bf16.gmra.mxu1 %v3672_v23  ;;  %v376_v20 = vsub.s32 1, %v4368_v19  ;;  %v384_v21 = vsub.s32 3, %v4368_v19  ;;  %v372_v22 = vsub.s32 0, %v4368_v19  ;;  %v380_v23 = vsub.s32 2, %v4368_v19 }
  0xb8   : > { %852 = vmatprep.mubr.bf16.mxu0 %v3673_v24  ;;  %965 = vmatprep.mubr.bf16.mxu1 %v3673_v24  ;;  %v368_v24 = vld [vmem:[#allocation7] sm:$0xf] }
  0xb9   : > { %2305 = vmatpush1.bf16.msra.mxu0 %v3712_v25  ;;  %2418 = vmatpush1.bf16.msra.mxu1 %v3715_v26 }
  0xba   : > { %2306 = vmatprep.subr.bf16.mxu0 %v3720_v27  ;;  %2419 = vmatprep.subr.bf16.mxu1 %v3723_v28  ;;  %v4376_v27 = vrot.slane %v368_v24, %v376_v20  ;;  %v4380_v28 = vrot.slane %v368_v24, %v384_v21 }
  0xbd   : > { %2307 = vmatpush1.bf16.msra.mxu0 %v3718_v29  ;;  %2420 = vmatpush1.bf16.msra.mxu1 %v3721_v31  ;;  %v4384_v29 = vrot.slane %v368_v24, %v372_v22 }
  0xbe   : > { %2308 = vmatprep.subr.bf16.mxu0 %v3726_v33  ;;  %2421 = vmatprep.subr.bf16.mxu1 %v3729_v34 }
  0xbf   : > { %853 = vmatmul.mubr.bf16.gmra.mxu0 %v3675_v30  ;;  %966 = vmatmul.mubr.bf16.gmra.mxu1 %v3675_v30  ;;  %v4388_v30 = vrot.slane %v368_v24, %v380_v23  ;;  %v3798_v24 = vld [vmem:[#allocation8 + $0xfc] ss:$24 sps:$4 sm:$0xff]  }
  0xc0   : > { %862 = vmatprep.mubr.bf16.mxu0 %v3676_v32  ;;  %975 = vmatprep.mubr.bf16.mxu1 %v3676_v32 }
  0xc1   : > { %2309 = vmatpush1.bf16.msra.mxu0 %v3724_v35  ;;  %2422 = vmatpush1.bf16.msra.mxu1 %v3727_v36 }
  0xc2   : > { %2310 = vmatprep.subr.bf16.mxu0 %v3732_v37  ;;  %2423 = vmatprep.subr.bf16.mxu1 %v3735_v38 }
  0xc5   : > { %2311 = vmatpush1.bf16.msra.mxu0 %v3730_v39  ;;  %2424 = vmatpush1.bf16.msra.mxu1 %v3733_v40 }
  0xc6   : > { %2312 = vmatprep.subr.bf16.mxu0 %v3738_v41  ;;  %2425 = vmatprep.subr.bf16.mxu1 %v3741_v42 }
  0xc7   : > { %863 = vmatmul.mubr.bf16.gmra.mxu0 %v3678_v43  ;;  %976 = vmatmul.mubr.bf16.gmra.mxu1 %v3678_v43 }
  0xc8   : > { %872 = vmatprep.mubr.bf16.mxu0 %v3679_v44  ;;  %985 = vmatprep.mubr.bf16.mxu1 %v3679_v44 }
  0xc9   : > { %2313 = vmatpush2.bf16.msra.mxu0 %v3736_v45  ;;  %2426 = vmatpush2.bf16.msra.mxu1 %v3739_v46 }
  0xca   : > { %2314 = vmatprep.subr.bf16.mxu0 %v3744_v47  ;;  %2427 = vmatprep.subr.bf16.mxu1 %v3747_v48 }
  0xcd   : > { %2315 = vmatpush2.bf16.msra.mxu0 %v3742_v49  ;;  %2428 = vmatpush2.bf16.msra.mxu1 %v3745_v50 }
  0xce   : > { %2316 = vmatprep.subr.bf16.mxu0 %v3750_v51  ;;  %2429 = vmatprep.subr.bf16.mxu1 %v3753_v52 }
  0xcf   : > { %873 = vmatmul.mubr.bf16.gmra.mxu0 %v3681_v53  ;;  %986 = vmatmul.mubr.bf16.gmra.mxu1 %v3681_v53 }
  0xd0   : > { %882 = vmatprep.mubr.bf16.mxu0 %v3682_v54  ;;  %995 = vmatprep.mubr.bf16.mxu1 %v3682_v54 }
  0xd1   : > { %2317 = vmatpush2.bf16.msra.mxu0 %v3748_v55  ;;  %2430 = vmatpush2.bf16.msra.mxu1 %v3751_v56 }
  0xd2   : > { %2318 = vmatprep.subr.bf16.mxu0 %v3756_v57  ;;  %2431 = vmatprep.subr.bf16.mxu1 %v3759_v58 }
  0xd5   : > { %2319 = vmatpush2.bf16.msra.mxu0 %v3754_v59  ;;  %2432 = vmatpush2.bf16.msra.mxu1 %v3757_v60  ;;  %v3784_v59 = vld [vmem:[#allocation8 + $0x158] ss:$24 sps:$4 sm:$0xff]  }
  0xd6   : > { %2320 = vmatprep.subr.bf16.mxu0 %v3762_v61  ;;  %2433 = vmatprep.subr.bf16.mxu1 %v3765_v62  ;;  %v3787_v60 = vld [vmem:[#allocation8 + $0x458] ss:$24 sps:$4 sm:$0xff]  }
  0xd7   : > { %883 = vmatmul.mubr.bf16.gmra.mxu0 %v3684_v63  ;;  %996 = vmatmul.mubr.bf16.gmra.mxu1 %v3684_v63 }
  0xd8   : > { %892 = vmatprep.mubr.bf16.mxu0 %v3685_v0  ;;  %1005 = vmatprep.mubr.bf16.mxu1 %v3685_v0 }
  0xd9   : > { %2321 = vmatpush2.bf16.msra.mxu0 %v3760_v1  ;;  %2434 = vmatpush2.bf16.msra.mxu1 %v3763_v2  ;;  %v3792_v1 = vld [vmem:[#allocation8 + $0x12c] ss:$24 sps:$4 sm:$0xff]  }
  0xda   : > { %2322 = vmatprep.subr.bf16.mxu0 %v3768_v4  ;;  %2435 = vmatprep.subr.bf16.mxu1 %v3771_v5  ;;  %v3795_v2 = vld [vmem:[#allocation8 + $0x42c] ss:$24 sps:$4 sm:$0xff]  }
  0xdd   : > { %2323 = vmatpush2.bf16.msra.mxu0 %v3766_v6  ;;  %2436 = vmatpush2.bf16.msra.mxu1 %v3769_v7 }
  0xde   : > { %2324 = vmatprep.subr.bf16.mxu0 %v3774_v8  ;;  %2437 = vmatprep.subr.bf16.mxu1 %v3777_v9 }
  0xdf   : > { %893 = vmatmul.mubr.bf16.gmra.mxu0 %v3687_v3  ;;  %1006 = vmatmul.mubr.bf16.gmra.mxu1 %v3687_v3 }
  0xe1   : > { %2325 = vmatpush2.bf16.msra.mxu0 %v3772_v10  ;;  %2438 = vmatpush2.bf16.msra.mxu1 %v3775_v11 }
  0xe2   : > { %2326 = vmatprep.subr.bf16.mxu0 %v3780_v12  ;;  %2439 = vmatprep.subr.bf16.mxu1 %v3783_v13  ;;  %v3790_v13 = vld [vmem:[#allocation8 + $0x128] ss:$24 sps:$4 sm:$0xff]  }
  0xe5   : > { %2327 = vmatpush2.bf16.msra.mxu0 %v3778_v14  ;;  %2440 = vmatpush2.bf16.msra.mxu1 %v3781_v15  ;;  %v3793_v14 = vld [vmem:[#allocation8 + $0x428] ss:$24 sps:$4 sm:$0xff]  }
  0xe6   : > { %2522 = vmatprep.subr.bf16.mxu0 %v3786_v16  ;;  %2635 = vmatprep.subr.bf16.mxu1 %v3789_v17 }
 0x167   : > { %v824_v25 = vpop.f32.mrf.mxu0  ;;  %v937_v26 = vpop.f32.mrf.mxu1 }
 0x168   : > { %v825_v39 = vadd.f32 %v824_v25, %v4384_v29  ;;  %v938_v40 = vadd.f32 %v937_v26, %v4388_v30  ;;  %v3801_v25 = vld [vmem:[#allocation8 + $0x3fc] ss:$24 sps:$4 sm:$0xff]  }
 0x169   : > { %v826_v31 = vpop.f32.mrf.mxu0  ;;  %v939_v32 = vpop.f32.mrf.mxu1 }
 0x16a   : > { %v827_v35 = vadd.f32 %v826_v31, %v4376_v27  ;;  %v940_v36 = vadd.f32 %v939_v32, %v4380_v28  ;;  %v1016_v53 = vmax.f32 %v825_v39, 0.0  ;;  %v1018_v54 = vmax.f32 %v938_v40, 0.0  ;;  %v3796_v39 = vld [vmem:[#allocation8 + $0xf8] ss:$24 sps:$4 sm:$0xff]  }
 0x16b   : > { %v828_v33 = vpop.f32.mrf.mxu0  ;;  %v941_v34 = vpop.f32.mrf.mxu1 }
 0x16c   : > { %v829_v37 = vadd.f32 %v828_v33, %v4384_v29  ;;  %v942_v38 = vadd.f32 %v941_v34, %v4388_v30  ;;  %v1017_v49 = vmax.f32 %v827_v35, 0.0  ;;  %v1019_v50 = vmax.f32 %v940_v36, 0.0 }
 0x16d   : > { %v830_v41 = vpop.f32.mrf.mxu0  ;;  %v943_v42 = vpop.f32.mrf.mxu1 }
 0x16e   : > { %v831_v43 = vadd.f32 %v830_v41, %v4376_v27  ;;  %v944_v44 = vadd.f32 %v943_v42, %v4380_v28  ;;  %v1020_v45 = vmax.f32 %v829_v37, 0.0  ;;  %v1022_v46 = vmax.f32 %v942_v38, 0.0 }
 0x16f   : > { %v834_v47 = vpop.f32.mrf.mxu0  ;;  %v947_v48 = vpop.f32.mrf.mxu1 }
 0x170   : > { %v1021_v51 = vmax.f32 %v831_v43, 0.0  ;;  %v1023_v52 = vmax.f32 %v944_v44, 0.0  ;;  %v4402_v61 = vpack.c.bf16 %v1020_v45, %v1016_v53  ;;  %v4404_v62 = vpack.c.bf16 %v1022_v46, %v1018_v54  ;;  %v3799_v45 = vld [vmem:[#allocation8 + $0x3f8] ss:$24 sps:$4 sm:$0xff]   ;;  %v3804_v46 = vld [vmem:[#allocation8 + $0xcc] ss:$24 sps:$4 sm:$0xff]  }
 0x171   : > { %v836_v55 = vpop.f32.mrf.mxu0  ;;  %v949_v56 = vpop.f32.mrf.mxu1  ;;  %v835_v6 = vadd.f32 %v834_v47, %v4384_v29  ;;  %v948_v7 = vadd.f32 %v947_v48, %v4388_v30 }
 0x172   : > { %v4398_v57 = vpack.c.bf16 %v1021_v51, %v1017_v49  ;;  %v4400_v58 = vpack.c.bf16 %v1023_v52, %v1019_v50  ;;  %v837_v3 = vadd.f32 %v836_v55, %v4376_v27  ;;  %v950_v8 = vadd.f32 %v949_v56, %v4380_v28  ;;  %v3807_v51 = vld [vmem:[#allocation8 + $0x3cc] ss:$24 sps:$4 sm:$0xff]  }
 0x173   : > { %v838_v63 = vpop.f32.mrf.mxu0  ;;  %v951_v0 = vpop.f32.mrf.mxu1  ;;  %v1024_v33 = vmax.f32 %v835_v6, 0.0  ;;  %v1026_v34 = vmax.f32 %v948_v7, 0.0 }
 0x174   : > { %v839_v4 = vadd.f32 %v838_v63, %v4384_v29  ;;  %v952_v5 = vadd.f32 %v951_v0, %v4388_v30  ;;  %2328 = vmatprep.mubr.bf16.mxu0 %v4398_v57  ;;  %2441 = vmatprep.mubr.bf16.mxu1 %v4400_v58  ;;  %v1025_v26 = vmax.f32 %v837_v3, 0.0  ;;  %v1027_v35 = vmax.f32 %v950_v8, 0.0  ;;  %v3805_v3 = vld [vmem:[#allocation8 + $0x3c8] ss:$24 sps:$4 sm:$0xff]  }
 0x175   : > { %v840_v9 = vpop.f32.mrf.mxu0  ;;  %v953_v10 = vpop.f32.mrf.mxu1  ;;  %2329 = vmatmul.mubr.bf16.vlgmr.msra.gmra.mxu0 %v4402_v61  ;;  %2442 = vmatmul.mubr.bf16.vlgmr.msra.gmra.mxu1 %v4404_v62 }
 0x176   : > { %v841_v11 = vadd.f32 %v840_v9, %v4376_v27  ;;  %v954_v12 = vadd.f32 %v953_v10, %v4380_v28  ;;  %2523 = vmatpush1.bf16.msra.mxu0 %v3784_v59  ;;  %2636 = vmatpush1.bf16.msra.mxu1 %v3787_v60  ;;  %v1028_v15 = vmax.f32 %v839_v4, 0.0  ;;  %v1030_v16 = vmax.f32 %v952_v5, 0.0  ;;  %v3802_v60 = vld [vmem:[#allocation8 + $0xc8] ss:$24 sps:$4 sm:$0xff]   ;;  %v3810_v4 = vld [vmem:[#allocation8 + $0x9c] ss:$24 sps:$4 sm:$0xff]  }
 0x177   : > { %v844_v17 = vpop.f32.mrf.mxu0  ;;  %v957_v18 = vpop.f32.mrf.mxu1  ;;  %2524 = vmatprep.subr.bf16.mxu0 %v3792_v1  ;;  %2637 = vmatprep.subr.bf16.mxu1 %v3795_v2 }
 0x178   : > { %v1029_v31 = vmax.f32 %v841_v11, 0.0  ;;  %v1031_v32 = vmax.f32 %v954_v12, 0.0  ;;  %v4420_v40 = vpack.c.bf16 %v1028_v15, %v1024_v33  ;;  %v4422_v41 = vpack.c.bf16 %v1030_v16, %v1026_v34  ;;  %v3808_v16 = vld [vmem:[#allocation8 + $0x98] ss:$24 sps:$4 sm:$0xff]  }
 0x179   : > { %v846_v36 = vpop.f32.mrf.mxu0  ;;  %v959_v37 = vpop.f32.mrf.mxu1  ;;  %v845_v52 = vadd.f32 %v844_v17, %v4384_v29  ;;  %v958_v53 = vadd.f32 %v957_v18, %v4388_v30 }
 0x17a   : > { %2525 = vmatpush1.bf16.msra.mxu0 %v3790_v13  ;;  %2638 = vmatpush1.bf16.msra.mxu1 %v3793_v14  ;;  %v4418_v38 = vpack.c.bf16 %v1029_v31, %v1025_v26  ;;  %v4424_v44 = vpack.c.bf16 %v1031_v32, %v1027_v35  ;;  %v847_v47 = vadd.f32 %v846_v36, %v4376_v27  ;;  %v3813_v13 = vld [vmem:[#allocation8 + $0x39c] ss:$24 sps:$4 sm:$0xff]   ;;  %v3811_v31 = vld [vmem:[#allocation8 + $0x398] ss:$24 sps:$4 sm:$0xff]   ;;  %v3816_v32 = vld [vmem:[#allocation8 + $0x6c] ss:$24 sps:$4 sm:$0xff]  }
 0x17b   : > { %v848_v42 = vpop.f32.mrf.mxu0  ;;  %v961_v43 = vpop.f32.mrf.mxu1  ;;  %2526 = vmatprep.subr.bf16.mxu0 %v3798_v24  ;;  %2639 = vmatprep.subr.bf16.mxu1 %v3801_v25  ;;  %v960_v48 = vadd.f32 %v959_v37, %v4380_v28  ;;  %v1032_v9 = vmax.f32 %v845_v52, 0.0  ;;  %v1034_v10 = vmax.f32 %v958_v53, 0.0  ;;  %v3819_v36 = vld [vmem:[#allocation8 + $0x36c] ss:$24 sps:$4 sm:$0xff]   ;;  %v3817_v52 = vld [vmem:[#allocation8 + $0x368] ss:$24 sps:$4 sm:$0xff]  }
 0x17c   : > { %v849_v49 = vadd.f32 %v848_v42, %v4384_v29  ;;  %v962_v50 = vadd.f32 %v961_v43, %v4388_v30  ;;  %2338 = vmatprep.mubr.bf16.mxu0 %v4418_v38  ;;  %2451 = vmatprep.mubr.bf16.mxu1 %v4424_v44  ;;  %v1033_v5 = vmax.f32 %v847_v47, 0.0  ;;  %v3814_v47 = vld [vmem:[#allocation8 + $0x68] ss:$24 sps:$4 sm:$0xff]   ;;  %v3822_v53 = vld [vmem:[#allocation8 + $0x3c] ss:$24 sps:$4 sm:$0xff]  }
 0x17d   : > { %v850_v54 = vpop.f32.mrf.mxu0  ;;  %v963_v55 = vpop.f32.mrf.mxu1  ;;  %2339 = vmatmul.mubr.bf16.gmra.mxu0 %v4420_v40  ;;  %2452 = vmatmul.mubr.bf16.gmra.mxu1 %v4422_v41  ;;  %v1035_v6 = vmax.f32 %v960_v48, 0.0 }
 0x17e   : > { %v851_v56 = vadd.f32 %v850_v54, %v4376_v27  ;;  %v964_v59 = vadd.f32 %v963_v55, %v4380_v28  ;;  %2527 = vmatpush1.bf16.msra.mxu0 %v3796_v39  ;;  %v1036_v63 = vmax.f32 %v849_v49, 0.0  ;;  %v1038_v0 = vmax.f32 %v962_v50, 0.0  ;;  %2640 = vmatpush1.bf16.msra.mxu1 %v3799_v45 }
 0x17f   : > { %v854_v1 = vpop.f32.mrf.mxu0  ;;  %v967_v2 = vpop.f32.mrf.mxu1  ;;  %2528 = vmatprep.subr.bf16.mxu0 %v3804_v46  ;;  %2641 = vmatprep.subr.bf16.mxu1 %v3807_v51 }
 0x180   : > { %v1037_v7 = vmax.f32 %v851_v56, 0.0  ;;  %v1039_v8 = vmax.f32 %v964_v59, 0.0  ;;  %v4442_v17 = vpack.c.bf16 %v1036_v63, %v1032_v9  ;;  %v4444_v18 = vpack.c.bf16 %v1038_v0, %v1034_v10 }
 0x181   : > { %v856_v11 = vpop.f32.mrf.mxu0  ;;  %v969_v12 = vpop.f32.mrf.mxu1  ;;  %v855_v37 = vadd.f32 %v854_v1, %v4384_v29  ;;  %v968_v39 = vadd.f32 %v967_v2, %v4388_v30  ;;  %v3825_v2 = vld [vmem:[#allocation8 + $0x33c] ss:$24 sps:$4 sm:$0xff]  }
 0x182   : > { %2529 = vmatpush1.bf16.msra.mxu0 %v3802_v60  ;;  %v4438_v14 = vpack.c.bf16 %v1037_v7, %v1033_v5  ;;  %v4440_v15 = vpack.c.bf16 %v1039_v8, %v1035_v6  ;;  %v857_v24 = vadd.f32 %v856_v11, %v4376_v27  ;;  %2642 = vmatpush1.bf16.msra.mxu1 %v3805_v3  ;;  %v3820_v5 = vld [vmem:[#allocation8 + $0x38] ss:$24 sps:$4 sm:$0xff]  }
 0x183   : > { %v858_v25 = vpop.f32.mrf.mxu0  ;;  %v971_v26 = vpop.f32.mrf.mxu1  ;;  %2530 = vmatprep.subr.bf16.mxu0 %v3810_v4  ;;  %v970_v33 = vadd.f32 %v969_v12, %v4380_v28  ;;  %2643 = vmatprep.subr.bf16.mxu1 %v3813_v13  ;;  %v1040_v60 = vmax.f32 %v855_v37, 0.0  ;;  %v1042_v63 = vmax.f32 %v968_v39, 0.0  ;;  %v3823_v11 = vld [vmem:[#allocation8 + $0x338] ss:$24 sps:$4 sm:$0xff]   ;;  %v3828_v12 = vld [vmem:[#allocation8 + $0xc] ss:$24 sps:$4 sm:$0xff]  }
 0x184   : > { %v859_v34 = vadd.f32 %v858_v25, %v4384_v29  ;;  %v972_v35 = vadd.f32 %v971_v26, %v4388_v30  ;;  %2348 = vmatprep.mubr.bf16.mxu0 %v4438_v14  ;;  %2461 = vmatprep.mubr.bf16.mxu1 %v4440_v15  ;;  %v1041_v54 = vmax.f32 %v857_v24, 0.0  ;;  %v3831_v25 = vld [vmem:[#allocation8 + $0x30c] ss:$24 sps:$4 sm:$0xff]  }
 0x185   : > { %v860_v42 = vpop.f32.mrf.mxu0  ;;  %v973_v43 = vpop.f32.mrf.mxu1  ;;  %2349 = vmatmul.mubr.bf16.gmra.mxu0 %v4442_v17  ;;  %2462 = vmatmul.mubr.bf16.gmra.mxu1 %v4444_v18  ;;  %v1043_v55 = vmax.f32 %v970_v33, 0.0 }
 0x186   : > { %v861_v45 = vadd.f32 %v860_v42, %v4376_v27  ;;  %v974_v46 = vadd.f32 %v973_v43, %v4380_v28  ;;  %2531 = vmatpush1.bf16.msra.mxu0 %v3808_v16  ;;  %v1044_v48 = vmax.f32 %v859_v34, 0.0  ;;  %v1046_v49 = vmax.f32 %v972_v35, 0.0  ;;  %2644 = vmatpush1.bf16.msra.mxu1 %v3811_v31 }
 0x187   : > { %v864_v50 = vpop.f32.mrf.mxu0  ;;  %v977_v51 = vpop.f32.mrf.mxu1  ;;  %2532 = vmatprep.subr.bf16.mxu0 %v3816_v32  ;;  %2645 = vmatprep.subr.bf16.mxu1 %v3819_v36  ;;  %v3826_v36 = vld [vmem:[#allocation8 + $0x8] ss:$24 sps:$4 sm:$0xff]  }
 0x188   : > { %v1045_v56 = vmax.f32 %v861_v45, 0.0  ;;  %v1047_v59 = vmax.f32 %v974_v46, 0.0  ;;  %v4462_v6 = vpack.c.bf16 %v1044_v48, %v1040_v60  ;;  %v4464_v7 = vpack.c.bf16 %v1046_v49, %v1042_v63  ;;  %v3829_v45 = vld [vmem:[#allocation8 + $0x308] ss:$24 sps:$4 sm:$0xff]   ;;  %v3834_v46 = vld [vmem:[#allocation8 + $0x2dc] ss:$24 sps:$4 sm:$0xff]  }
 0x189   : > { %v866_v0 = vpop.f32.mrf.mxu0  ;;  %v979_v1 = vpop.f32.mrf.mxu1  ;;  %v865_v26 = vadd.f32 %v864_v50, %v4384_v29  ;;  %v978_v31 = vadd.f32 %v977_v51, %v4388_v30  ;;  %v3832_v60 = vld [vmem:[#allocation8 + $0x2d8] ss:$24 sps:$4 sm:$0xff]  }
 0x18a   : > { %2533 = vmatpush1.bf16.msra.mxu0 %v3814_v47  ;;  %v4458_v3 = vpack.c.bf16 %v1045_v56, %v1041_v54  ;;  %v4460_v4 = vpack.c.bf16 %v1047_v59, %v1043_v55  ;;  %v867_v8 = vadd.f32 %v866_v0, %v4376_v27  ;;  %2646 = vmatpush1.bf16.msra.mxu1 %v3817_v52  ;;  %v3837_v55 = vld [vmem:[#allocation8 + $0x5dc] ss:$24 sps:$4 sm:$0xff]  }
 0x18b   : > { %v868_v9 = vpop.f32.mrf.mxu0  ;;  %v981_v10 = vpop.f32.mrf.mxu1  ;;  %2534 = vmatprep.subr.bf16.mxu0 %v3822_v53  ;;  %v980_v13 = vadd.f32 %v979_v1, %v4380_v28  ;;  %2647 = vmatprep.subr.bf16.mxu1 %v3825_v2  ;;  %v1048_v51 = vmax.f32 %v865_v26, 0.0  ;;  %v1050_v52 = vmax.f32 %v978_v31, 0.0 }
 0x18c   : > { %v869_v16 = vadd.f32 %v868_v9, %v4384_v29  ;;  %v982_v24 = vadd.f32 %v981_v10, %v4388_v30  ;;  %2358 = vmatprep.mubr.bf16.mxu0 %v4458_v3  ;;  %2471 = vmatprep.mubr.bf16.mxu1 %v4460_v4  ;;  %v1049_v47 = vmax.f32 %v867_v8, 0.0  ;;  %v3835_v8 = vld [vmem:[#allocation8 + $0x5d8] ss:$24 sps:$4 sm:$0xff]   ;;  %v3840_v9 = vld [vmem:[#allocation8 + $0x2ac] ss:$24 sps:$4 sm:$0xff]  }
 0x18d   : > { %v870_v32 = vpop.f32.mrf.mxu0  ;;  %v983_v33 = vpop.f32.mrf.mxu1  ;;  %2359 = vmatmul.mubr.bf16.gmra.mxu0 %v4462_v6  ;;  %2472 = vmatmul.mubr.bf16.gmra.mxu1 %v4464_v7  ;;  %v1051_v48 = vmax.f32 %v980_v13, 0.0  ;;  %v3843_v13 = vld [vmem:[#allocation8 + $0x5ac] ss:$24 sps:$4 sm:$0xff]  }
 0x18e   : > { %v871_v34 = vadd.f32 %v870_v32, %v4376_v27  ;;  %v984_v35 = vadd.f32 %v983_v33, %v4380_v28  ;;  %2535 = vmatpush1.bf16.msra.mxu0 %v3820_v5  ;;  %v1052_v37 = vmax.f32 %v869_v16, 0.0  ;;  %v1054_v39 = vmax.f32 %v982_v24, 0.0  ;;  %2648 = vmatpush1.bf16.msra.mxu1 %v3823_v11  ;;  %v3838_v33 = vld [vmem:[#allocation8 + $0x2a8] ss:$24 sps:$4 sm:$0xff]  }
 0x18f   : > { %v874_v42 = vpop.f32.mrf.mxu0  ;;  %v987_v43 = vpop.f32.mrf.mxu1  ;;  %2536 = vmatprep.subr.bf16.mxu0 %v3828_v12  ;;  %2649 = vmatprep.subr.bf16.mxu1 %v3831_v25 }
 0x190   : > { %v1053_v49 = vmax.f32 %v871_v34, 0.0  ;;  %v1055_v50 = vmax.f32 %v984_v35, 0.0  ;;  %v4482_v63 = vpack.c.bf16 %v1052_v37, %v1048_v51  ;;  %v4484_v0 = vpack.c.bf16 %v1054_v39, %v1050_v52  ;;  %v3841_v39 = vld [vmem:[#allocation8 + $0x5a8] ss:$24 sps:$4 sm:$0xff]   ;;  %v3849_v52 = vld [vmem:[#allocation8 + $0x57c] ss:$24 sps:$4 sm:$0xff]  }
 0x191   : > { %v876_v53 = vpop.f32.mrf.mxu0  ;;  %v989_v54 = vpop.f32.mrf.mxu1  ;;  %v875_v16 = vadd.f32 %v874_v42, %v4384_v29  ;;  %v988_v24 = vadd.f32 %v987_v43, %v4388_v30  ;;  %v3846_v42 = vld [vmem:[#allocation8 + $0x27c] ss:$24 sps:$4 sm:$0xff]  }
 0x192   : > { %v4478_v56 = vpack.c.bf16 %v1053_v49, %v1049_v47  ;;  %v4480_v59 = vpack.c.bf16 %v1055_v50, %v1051_v48  ;;  %2537 = vmatpush1.bf16.msra.mxu0 %v3826_v36  ;;  %v877_v1 = vadd.f32 %v876_v53, %v4376_v27  ;;  %2650 = vmatpush1.bf16.msra.mxu1 %v3829_v45 }
 0x193   : > { %v878_v2 = vpop.f32.mrf.mxu0  ;;  %v991_v5 = vpop.f32.mrf.mxu1  ;;  %2538 = vmatprep.subr.bf16.mxu0 %v3834_v46  ;;  %v990_v10 = vadd.f32 %v989_v54, %v4380_v28  ;;  %2651 = vmatprep.subr.bf16.mxu1 %v3837_v55  ;;  %v1056_v48 = vmax.f32 %v875_v16, 0.0  ;;  %v1058_v49 = vmax.f32 %v988_v24, 0.0  ;;  %v3844_v55 = vld [vmem:[#allocation8 + $0x278] ss:$24 sps:$4 sm:$0xff]   ;;  %v3855_v16 = vld [vmem:[#allocation8 + $0x54c] ss:$24 sps:$4 sm:$0xff]  }
 0x194   : > { %v879_v11 = vadd.f32 %v878_v2, %v4384_v29  ;;  %v992_v12 = vadd.f32 %v991_v5, %v4388_v30  ;;  %2368 = vmatprep.mubr.bf16.mxu0 %v4478_v56  ;;  %2481 = vmatprep.mubr.bf16.mxu1 %v4480_v59  ;;  %v1057_v43 = vmax.f32 %v877_v1, 0.0 }
 0x195   : > { %v880_v25 = vpop.f32.mrf.mxu0  ;;  %v993_v26 = vpop.f32.mrf.mxu1  ;;  %2369 = vmatmul.mubr.bf16.gmra.mxu0 %v4482_v63  ;;  %2482 = vmatmul.mubr.bf16.gmra.mxu1 %v4484_v0  ;;  %v1059_v45 = vmax.f32 %v990_v10, 0.0  ;;  %v3852_v10 = vld [vmem:[#allocation8 + $0x24c] ss:$24 sps:$4 sm:$0xff]  }
 0x196   : > { %v881_v31 = vadd.f32 %v880_v25, %v4376_v27  ;;  %v994_v32 = vadd.f32 %v993_v26, %v4380_v28  ;;  %2539 = vmatpush2.bf16.msra.mxu0 %v3832_v60  ;;  %v1060_v34 = vmax.f32 %v879_v11, 0.0  ;;  %v1062_v35 = vmax.f32 %v992_v12, 0.0  ;;  %2652 = vmatpush2.bf16.msra.mxu1 %v3835_v8 }
 0x197   : > { %v884_v36 = vpop.f32.mrf.mxu0  ;;  %v997_v37 = vpop.f32.mrf.mxu1  ;;  %2540 = vmatprep.subr.bf16.mxu0 %v3840_v9  ;;  %2653 = vmatprep.subr.bf16.mxu1 %v3843_v13  ;;  %v3847_v9 = vld [vmem:[#allocation8 + $0x578] ss:$24 sps:$4 sm:$0xff]  }
 0x198   : > { %v1061_v46 = vmax.f32 %v881_v31, 0.0  ;;  %v1063_v47 = vmax.f32 %v994_v32, 0.0  ;;  %v4502_v60 = vpack.c.bf16 %v1060_v34, %v1056_v48  ;;  %v4504_v2 = vpack.c.bf16 %v1062_v35, %v1058_v49  ;;  %v3850_v34 = vld [vmem:[#allocation8 + $0x248] ss:$24 sps:$4 sm:$0xff]  }
 0x199   : > { %v886_v50 = vpop.f32.mrf.mxu0  ;;  %v999_v51 = vpop.f32.mrf.mxu1  ;;  %v885_v24 = vadd.f32 %v884_v36, %v4384_v29  ;;  %v998_v25 = vadd.f32 %v997_v37, %v4388_v30  ;;  %v3853_v37 = vld [vmem:[#allocation8 + $0x548] ss:$24 sps:$4 sm:$0xff]  }
 0x19a   : > { %v4498_v53 = vpack.c.bf16 %v1061_v46, %v1057_v43  ;;  %v4500_v54 = vpack.c.bf16 %v1063_v47, %v1059_v45  ;;  %2541 = vmatpush2.bf16.msra.mxu0 %v3838_v33  ;;  %v887_v1 = vadd.f32 %v886_v50, %v4376_v27  ;;  %2654 = vmatpush2.bf16.msra.mxu1 %v3841_v39  ;;  %v3858_v43 = vld [vmem:[#allocation8 + $0x21c] ss:$24 sps:$4 sm:$0xff]  }
 0x19b   : > { %v888_v5 = vpop.f32.mrf.mxu0  ;;  %v1001_v8 = vpop.f32.mrf.mxu1  ;;  %2542 = vmatprep.subr.bf16.mxu0 %v3846_v42  ;;  %v1000_v11 = vadd.f32 %v999_v51, %v4380_v28  ;;  %2655 = vmatprep.subr.bf16.mxu1 %v3849_v52  ;;  %v1064_v49 = vmax.f32 %v885_v24, 0.0  ;;  %v1066_v50 = vmax.f32 %v998_v25, 0.0  ;;  %v3864_v24 = vld [vmem:[#allocation8 + $0x1ec] ss:$24 sps:$4 sm:$0xff]  }
 0x19c   : > { %v889_v12 = vadd.f32 %v888_v5, %v4384_v29  ;;  %v1002_v13 = vadd.f32 %v1001_v8, %v4388_v30  ;;  %2378 = vmatprep.mubr.bf16.mxu0 %v4498_v53  ;;  %2491 = vmatprep.mubr.bf16.mxu1 %v4500_v54  ;;  %v1065_v45 = vmax.f32 %v887_v1, 0.0  ;;  %v3861_v5 = vld [vmem:[#allocation8 + $0x51c] ss:$24 sps:$4 sm:$0xff]  }
 0x19d   : > { %v890_v26 = vpop.f32.mrf.mxu0  ;;  %v1003_v31 = vpop.f32.mrf.mxu1  ;;  %2379 = vmatmul.mubr.bf16.gmra.mxu0 %v4502_v60  ;;  %2492 = vmatmul.mubr.bf16.gmra.mxu1 %v4504_v2  ;;  %v1067_v46 = vmax.f32 %v1000_v11, 0.0 }
 0x19e   : > { %v891_v32 = vadd.f32 %v890_v26, %v4376_v27  ;;  %v1004_v33 = vadd.f32 %v1003_v31, %v4380_v28  ;;  %2543 = vmatpush2.bf16.msra.mxu0 %v3844_v55  ;;  %v1068_v35 = vmax.f32 %v889_v12, 0.0  ;;  %v1070_v39 = vmax.f32 %v1002_v13, 0.0  ;;  %2656 = vmatpush2.bf16.msra.mxu1 %v3847_v9  ;;  %v3856_v9 = vld [vmem:[#allocation8 + $0x218] ss:$24 sps:$4 sm:$0xff]  }
 0x19f   : > { %v894_v42 = vpop.f32.mrf.mxu0  ;;  %v1007_v36 = vpop.f32.mrf.mxu1  ;;  %2544 = vmatprep.subr.bf16.mxu0 %v3852_v10  ;;  %2657 = vmatprep.subr.bf16.mxu1 %v3855_v16  ;;  %v3859_v16 = vld [vmem:[#allocation8 + $0x518] ss:$24 sps:$4 sm:$0xff]  }
 0x1a0   : > { %v1069_v47 = vmax.f32 %v891_v32, 0.0  ;;  %v1071_v48 = vmax.f32 %v1004_v33, 0.0  ;;  %v4522_v12 = vpack.c.bf16 %v1068_v35, %v1064_v49  ;;  %v4524_v10 = vpack.c.bf16 %v1070_v39, %v1066_v50  ;;  %v3867_v32 = vld [vmem:[#allocation8 + $0x4ec] ss:$24 sps:$4 sm:$0xff]  }
 0x1a1   : > { %v896_v51 = vpop.f32.mrf.mxu0  ;;  %v1009_v52 = vpop.f32.mrf.mxu1  ;;  %v895_v33 = vadd.f32 %v894_v42, %v4384_v29  ;;  %v1008_v39 = vadd.f32 %v1007_v36, %v4388_v30  ;;  %v3870_v42 = vld [vmem:[#allocation8 + $0x1bc] ss:$24 sps:$4 sm:$0xff]  }
 0x1a2   : > { %v4518_v55 = vpack.c.bf16 %v1069_v47, %v1065_v45  ;;  %v4520_v8 = vpack.c.bf16 %v1071_v48, %v1067_v46  ;;  %2545 = vmatpush2.bf16.msra.mxu0 %v3850_v34  ;;  %v897_v1 = vadd.f32 %v896_v51, %v4376_v27  ;;  %2658 = vmatpush2.bf16.msra.mxu1 %v3853_v37  ;;  %v3862_v45 = vld [vmem:[#allocation8 + $0x1e8] ss:$24 sps:$4 sm:$0xff]   ;;  %v3873_v36 = vld [vmem:[#allocation8 + $0x4bc] ss:$24 sps:$4 sm:$0xff]  }
 0x1a3   : > { %v898_v11 = vpop.f32.mrf.mxu0  ;;  %v1011_v13 = vpop.f32.mrf.mxu1  ;;  %2546 = vmatprep.subr.bf16.mxu0 %v3858_v43  ;;  %v1010_v25 = vadd.f32 %v1009_v52, %v4380_v28  ;;  %2659 = vmatprep.subr.bf16.mxu1 %v3861_v5  ;;  %v3868_v5 = vld [vmem:[#allocation8 + $0x1b8] ss:$24 sps:$4 sm:$0xff]  }
 0x1a4   : > { %v899_v26 = vadd.f32 %v898_v11, %v4384_v29  ;;  %v1012_v31 = vadd.f32 %v1011_v13, %v4388_v30  ;;  %2388 = vmatprep.mubr.bf16.mxu0 %v4518_v55  ;;  %2501 = vmatprep.mubr.bf16.mxu1 %v4520_v8  ;;  %v1073_v46 = vmax.f32 %v897_v1, 0.0  ;;  %v3865_v29 = vld [vmem:[#allocation8 + $0x4e8] ss:$24 sps:$4 sm:$0xff]   ;;  %v1072_v30 = vmax.f32 %v895_v33, 0.0  ;;  %v3871_v1 = vld [vmem:[#allocation8 + $0x4b8] ss:$24 sps:$4 sm:$0xff]  }
 0x1a5   : > { %v900_v34 = vpop.f32.mrf.mxu0  ;;  %v1013_v35 = vpop.f32.mrf.mxu1  ;;  %2389 = vmatmul.mubr.bf16.gmra.mxu0 %v4522_v12  ;;  %2502 = vmatmul.mubr.bf16.gmra.mxu1 %v4524_v10  ;;  %v1075_v48 = vmax.f32 %v1010_v25, 0.0  ;;  %v3876_v13 = vld [vmem:[#allocation8 + $0x18c] ss:$24 sps:$4 sm:$0xff]   ;;  %v3877_v25 = vld [vmem:[#allocation8 + $0x488] ss:$24 sps:$4 sm:$0xff]  }
 0x1a6   : > { %v901_v37 = vadd.f32 %v900_v34, %v4376_v27  ;;  %v1014_v43 = vadd.f32 %v1013_v35, %v4380_v28  ;;  %2547 = vmatpush2.bf16.msra.mxu0 %v3856_v9  ;;  %v1076_v47 = vmax.f32 %v899_v26, 0.0  ;;  %2660 = vmatpush2.bf16.msra.mxu1 %v3859_v16  ;;  %v1078_v49 = vmax.f32 %v1012_v31, 0.0  ;;  %v3879_v16 = vld [vmem:[#allocation8 + $0x48c] ss:$24 sps:$4 sm:$0xff]   ;;  %v3883_v33 = vld [vmem:[#allocation8 + $0x460] ss:$24 sps:$4 sm:$0xff]  }
 0x1a7   : > { %2548 = vmatprep.subr.bf16.mxu0 %v3864_v24  ;;  %2661 = vmatprep.subr.bf16.mxu1 %v3867_v32  ;;  %v1074_v27 = vmax.f32 %v1008_v39, 0.0  ;;  %v3874_v24 = vld [vmem:[#allocation8 + $0x188] ss:$24 sps:$4 sm:$0xff]   ;;  %v3882_v26 = vld [vmem:[#allocation8 + $0x164] ss:$24 sps:$4 sm:$0xff]  }
 0x1a8   : > { %v1077_v50 = vmax.f32 %v901_v37, 0.0  ;;  %v1079_v51 = vmax.f32 %v1014_v43, 0.0  ;;  %v4542_v9 = vpack.c.bf16 %v1076_v47, %v1072_v30  ;;  %v3885_v31 = vld [vmem:[#allocation8 + $0x464] ss:$24 sps:$4 sm:$0xff]   ;;  %v3880_v32 = vld [vmem:[#allocation8 + $0x160] ss:$24 sps:$4 sm:$0xff]  }
 0x1a9   : > { %v4544_v11 = vpack.c.bf16 %v1078_v49, %v1074_v27  ;;  %v3888_v34 = vld [vmem:[#allocation8 + $0x134] ss:$24 sps:$4 sm:$0xff]   ;;  %v3886_v39 = vld [vmem:[#allocation8 + $0x130] ss:$24 sps:$4 sm:$0xff]   ;;  %v3894_v37 = vld [vmem:[#allocation8 + $0x104] ss:$24 sps:$4 sm:$0xff]  }
 0x1aa   : > { %v4538_v52 = vpack.c.bf16 %v1077_v50, %v1073_v46  ;;  %v4540_v28 = vpack.c.bf16 %v1079_v51, %v1075_v48  ;;  %2549 = vmatpush2.bf16.msra.mxu0 %v3862_v45  ;;  %2662 = vmatpush2.bf16.msra.mxu1 %v3865_v29  ;;  %v3891_v35 = vld [vmem:[#allocation8 + $0x434] ss:$24 sps:$4 sm:$0xff]   ;;  %v3889_v43 = vld [vmem:[#allocation8 + $0x430] ss:$24 sps:$4 sm:$0xff]   ;;  %v3897_v45 = vld [vmem:[#allocation8 + $0x404] ss:$24 sps:$4 sm:$0xff]  }
 0x1ab   : > { %2550 = vmatprep.subr.bf16.mxu0 %v3870_v42  ;;  %2663 = vmatprep.subr.bf16.mxu1 %v3873_v36  ;;  %v3892_v46 = vld [vmem:[#allocation8 + $0x100] ss:$24 sps:$4 sm:$0xff]   ;;  %v3900_v29 = vld [vmem:[#allocation8 + $0xd4] ss:$24 sps:$4 sm:$0xff]   ;;  %v3898_v48 = vld [vmem:[#allocation8 + $0xd0] ss:$24 sps:$4 sm:$0xff]  }
 0x1ac   : > { %2398 = vmatprep.mubr.bf16.mxu0 %v4538_v52  ;;  %2511 = vmatprep.mubr.bf16.mxu1 %v4540_v28  ;;  %v3895_v47 = vld [vmem:[#allocation8 + $0x400] ss:$24 sps:$4 sm:$0xff]   ;;  %v3903_v42 = vld [vmem:[#allocation8 + $0x3d4] ss:$24 sps:$4 sm:$0xff]   ;;  %v3906_v49 = vld [vmem:[#allocation8 + $0xa4] ss:$24 sps:$4 sm:$0xff]  }
 0x1ad   : > { %2399 = vmatmul.mubr.bf16.gmra.mxu0 %v4542_v9  ;;  %2512 = vmatmul.mubr.bf16.gmra.mxu1 %v4544_v11  ;;  %v3901_v50 = vld [vmem:[#allocation8 + $0x3d0] ss:$24 sps:$4 sm:$0xff]   ;;  %v3909_v51 = vld [vmem:[#allocation8 + $0x3a4] ss:$24 sps:$4 sm:$0xff]   ;;  %v3904_v30 = vld [vmem:[#allocation8 + $0xa0] ss:$24 sps:$4 sm:$0xff]  }
 0x1ae   : > { %2551 = vmatpush2.bf16.msra.mxu0 %v3868_v5  ;;  %2554 = vmatprep.mubr.bf16.mxu0 %v4398_v57  ;;  %v3907_v36 = vld [vmem:[#allocation8 + $0x3a0] ss:$24 sps:$4 sm:$0xff]   ;;  %v3912_v27 = vld [vmem:[#allocation8 + $0x74] ss:$24 sps:$4 sm:$0xff]  }
 0x1af   : > { %2664 = vmatpush2.bf16.msra.mxu1 %v3871_v1  ;;  %2667 = vmatprep.mubr.bf16.mxu1 %v4400_v58  ;;  %v3915_v5 = vld [vmem:[#allocation8 + $0x374] ss:$24 sps:$4 sm:$0xff]   ;;  %v3910_v1 = vld [vmem:[#allocation8 + $0x70] ss:$24 sps:$4 sm:$0xff]  }
 0x1b0   : > { %2552 = vmatprep.subr.bf16.mxu0 %v3876_v13  ;;  %2665 = vmatprep.subr.bf16.mxu1 %v3879_v16  ;;  %v3918_v13 = vld [vmem:[#allocation8 + $0x44] ss:$24 sps:$4 sm:$0xff]   ;;  %v3913_v16 = vld [vmem:[#allocation8 + $0x370] ss:$24 sps:$4 sm:$0xff]  }
 0x1b2   : > { %2553 = vmatpush2.bf16.msra.mxu0 %v3874_v24  ;;  %v3921_v24 = vld [vmem:[#allocation8 + $0x344] ss:$24 sps:$4 sm:$0xff]  }
 0x1b3   : > { %2666 = vmatpush2.bf16.msra.mxu1 %v3877_v25  ;;  %2748 = vmatprep.subr.bf16.mxu0 %v3882_v26  ;;  %v3916_v25 = vld [vmem:[#allocation8 + $0x40] ss:$24 sps:$4 sm:$0xff]  }
 0x1b4   : > { %2861 = vmatprep.subr.bf16.mxu1 %v3885_v31  ;;  %v3919_v26 = vld [vmem:[#allocation8 + $0x340] ss:$24 sps:$4 sm:$0xff]   ;;  %v3924_v31 = vld [vmem:[#allocation8 + $0x14] ss:$24 sps:$4 sm:$0xff]  }
 0x1b5   : > { %2555 = vmatmul.mubr.bf16.vlgmr.msra.gmra.mxu0 %v4402_v61 }
 0x1b6   : > { %2668 = vmatmul.mubr.bf16.vlgmr.msra.gmra.mxu1 %v4404_v62  ;;  %2749 = vmatpush1.bf16.msra.mxu0 %v3880_v32  ;;  %v3927_v32 = vld [vmem:[#allocation8 + $0x314] ss:$24 sps:$4 sm:$0xff]  }
 0x1b7   : > { %2564 = vmatprep.mubr.bf16.mxu0 %v4418_v38  ;;  %2677 = vmatprep.mubr.bf16.mxu1 %v4424_v44 }
 0x1b8   : > { %2862 = vmatpush1.bf16.msra.mxu1 %v3883_v33  ;;  %2750 = vmatprep.subr.bf16.mxu0 %v3888_v34  ;;  %v3922_v33 = vld [vmem:[#allocation8 + $0x10] ss:$24 sps:$4 sm:$0xff]   ;;  %v3930_v34 = vld [vmem:[#allocation8 + $0x2e4] ss:$24 sps:$4 sm:$0xff]  }
 0x1b9   : > { %2863 = vmatprep.subr.bf16.mxu1 %v3891_v35  ;;  %v3925_v35 = vld [vmem:[#allocation8 + $0x310] ss:$24 sps:$4 sm:$0xff]  }
 0x1ba   : > { %2751 = vmatpush1.bf16.msra.mxu0 %v3886_v39  ;;  %v3933_v39 = vld [vmem:[#allocation8 + $0x5e4] ss:$24 sps:$4 sm:$0xff]  }
 0x1bb   : > { %2752 = vmatprep.subr.bf16.mxu0 %v3894_v37  ;;  %v3928_v37 = vld [vmem:[#allocation8 + $0x2e0] ss:$24 sps:$4 sm:$0xff]  }
 0x1bc   : > { %2864 = vmatpush1.bf16.msra.mxu1 %v3889_v43  ;;  %v3931_v43 = vld [vmem:[#allocation8 + $0x5e0] ss:$24 sps:$4 sm:$0xff]  }
 0x1bd   : > { %2565 = vmatmul.mubr.bf16.gmra.mxu0 %v4420_v40  ;;  %2865 = vmatprep.subr.bf16.mxu1 %v3897_v45  ;;  %v3936_v45 = vld [vmem:[#allocation8 + $0x2b4] ss:$24 sps:$4 sm:$0xff]  }
 0x1be   : > { %2678 = vmatmul.mubr.bf16.gmra.mxu1 %v4422_v41  ;;  %2753 = vmatpush1.bf16.msra.mxu0 %v3892_v46  ;;  %v3939_v46 = vld [vmem:[#allocation8 + $0x5b4] ss:$24 sps:$4 sm:$0xff]  }
 0x1bf   : > { %2574 = vmatprep.mubr.bf16.mxu0 %v4438_v14  ;;  %2687 = vmatprep.mubr.bf16.mxu1 %v4440_v15 }
 0x1c0   : > { %2866 = vmatpush1.bf16.msra.mxu1 %v3895_v47  ;;  %2754 = vmatprep.subr.bf16.mxu0 %v3900_v29  ;;  %v3934_v47 = vld [vmem:[#allocation8 + $0x2b0] ss:$24 sps:$4 sm:$0xff]   ;;  %v3942_v29 = vld [vmem:[#allocation8 + $0x284] ss:$24 sps:$4 sm:$0xff]  }
 0x1c1   : > { %2867 = vmatprep.subr.bf16.mxu1 %v3903_v42  ;;  %v3937_v42 = vld [vmem:[#allocation8 + $0x5b0] ss:$24 sps:$4 sm:$0xff]  }
 0x1c2   : > { %2755 = vmatpush1.bf16.msra.mxu0 %v3898_v48  ;;  %v3945_v48 = vld [vmem:[#allocation8 + $0x584] ss:$24 sps:$4 sm:$0xff]  }
 0x1c3   : > { %2756 = vmatprep.subr.bf16.mxu0 %v3906_v49  ;;  %v3940_v49 = vld [vmem:[#allocation8 + $0x280] ss:$24 sps:$4 sm:$0xff]  }
 0x1c4   : > { %2868 = vmatpush1.bf16.msra.mxu1 %v3901_v50  ;;  %v3943_v50 = vld [vmem:[#allocation8 + $0x580] ss:$24 sps:$4 sm:$0xff]  }
 0x1c5   : > { %2575 = vmatmul.mubr.bf16.gmra.mxu0 %v4442_v17  ;;  %2869 = vmatprep.subr.bf16.mxu1 %v3909_v51  ;;  %v3948_v51 = vld [vmem:[#allocation8 + $0x254] ss:$24 sps:$4 sm:$0xff]  }
 0x1c6   : > { %2688 = vmatmul.mubr.bf16.gmra.mxu1 %v4444_v18  ;;  %2757 = vmatpush1.bf16.msra.mxu0 %v3904_v30  ;;  %v3951_v30 = vld [vmem:[#allocation8 + $0x554] ss:$24 sps:$4 sm:$0xff]  }
 0x1c7   : > { %2584 = vmatprep.mubr.bf16.mxu0 %v4458_v3  ;;  %2697 = vmatprep.mubr.bf16.mxu1 %v4460_v4 }
 0x1c8   : > { %2870 = vmatpush1.bf16.msra.mxu1 %v3907_v36  ;;  %2758 = vmatprep.subr.bf16.mxu0 %v3912_v27  ;;  %v3946_v36 = vld [vmem:[#allocation8 + $0x250] ss:$24 sps:$4 sm:$0xff]   ;;  %v3954_v27 = vld [vmem:[#allocation8 + $0x224] ss:$24 sps:$4 sm:$0xff]  }
 0x1c9   : > { %2871 = vmatprep.subr.bf16.mxu1 %v3915_v5  ;;  %v3949_v5 = vld [vmem:[#allocation8 + $0x550] ss:$24 sps:$4 sm:$0xff]  }
 0x1ca   : > { %2759 = vmatpush1.bf16.msra.mxu0 %v3910_v1  ;;  %v3957_v1 = vld [vmem:[#allocation8 + $0x524] ss:$24 sps:$4 sm:$0xff]  }
 0x1cb   : > { %2760 = vmatprep.subr.bf16.mxu0 %v3918_v13  ;;  %v3952_v13 = vld [vmem:[#allocation8 + $0x220] ss:$24 sps:$4 sm:$0xff]  }
 0x1cc   : > { %2872 = vmatpush1.bf16.msra.mxu1 %v3913_v16  ;;  %v3955_v16 = vld [vmem:[#allocation8 + $0x520] ss:$24 sps:$4 sm:$0xff]  }
 0x1cd   : > { %2585 = vmatmul.mubr.bf16.gmra.mxu0 %v4462_v6  ;;  %2873 = vmatprep.subr.bf16.mxu1 %v3921_v24  ;;  %v3960_v24 = vld [vmem:[#allocation8 + $0x1f4] ss:$24 sps:$4 sm:$0xff]  }
 0x1ce   : > { %2698 = vmatmul.mubr.bf16.gmra.mxu1 %v4464_v7  ;;  %2761 = vmatpush1.bf16.msra.mxu0 %v3916_v25  ;;  %v3963_v25 = vld [vmem:[#allocation8 + $0x4f4] ss:$24 sps:$4 sm:$0xff]  }
 0x1cf   : > { %2594 = vmatprep.mubr.bf16.mxu0 %v4478_v56  ;;  %2707 = vmatprep.mubr.bf16.mxu1 %v4480_v59 }
 0x1d0   : > { %2874 = vmatpush1.bf16.msra.mxu1 %v3919_v26  ;;  %2762 = vmatprep.subr.bf16.mxu0 %v3924_v31  ;;  %v3958_v26 = vld [vmem:[#allocation8 + $0x1f0] ss:$24 sps:$4 sm:$0xff]   ;;  %v3966_v31 = vld [vmem:[#allocation8 + $0x1c4] ss:$24 sps:$4 sm:$0xff]  }
 0x1d1   : > { %2875 = vmatprep.subr.bf16.mxu1 %v3927_v32  ;;  %v3961_v32 = vld [vmem:[#allocation8 + $0x4f0] ss:$24 sps:$4 sm:$0xff]  }
 0x1d2   : > { %2763 = vmatpush1.bf16.msra.mxu0 %v3922_v33  ;;  %v3969_v33 = vld [vmem:[#allocation8 + $0x4c4] ss:$24 sps:$4 sm:$0xff]  }
 0x1d3   : > { %2764 = vmatprep.subr.bf16.mxu0 %v3930_v34  ;;  %v3964_v34 = vld [vmem:[#allocation8 + $0x1c0] ss:$24 sps:$4 sm:$0xff]  }
 0x1d4   : > { %2876 = vmatpush1.bf16.msra.mxu1 %v3925_v35  ;;  %v3967_v35 = vld [vmem:[#allocation8 + $0x4c0] ss:$24 sps:$4 sm:$0xff]  }
 0x1d5   : > { %2595 = vmatmul.mubr.bf16.gmra.mxu0 %v4482_v63  ;;  %2877 = vmatprep.subr.bf16.mxu1 %v3933_v39  ;;  %v3972_v39 = vld [vmem:[#allocation8 + $0x194] ss:$24 sps:$4 sm:$0xff]  }
 0x1d6   : > { %2708 = vmatmul.mubr.bf16.gmra.mxu1 %v4484_v0  ;;  %2765 = vmatpush2.bf16.msra.mxu0 %v3928_v37  ;;  %v3975_v37 = vld [vmem:[#allocation8 + $0x494] ss:$24 sps:$4 sm:$0xff]  }
 0x1d7   : > { %2604 = vmatprep.mubr.bf16.mxu0 %v4498_v53  ;;  %2717 = vmatprep.mubr.bf16.mxu1 %v4500_v54 }
 0x1d8   : > { %2878 = vmatpush2.bf16.msra.mxu1 %v3931_v43  ;;  %2766 = vmatprep.subr.bf16.mxu0 %v3936_v45  ;;  %v3970_v43 = vld [vmem:[#allocation8 + $0x190] ss:$24 sps:$4 sm:$0xff]  }
 0x1d9   : > { %2879 = vmatprep.subr.bf16.mxu1 %v3939_v46  ;;  %v3973_v45 = vld [vmem:[#allocation8 + $0x490] ss:$24 sps:$4 sm:$0xff]  }
 0x1da   : > { %2767 = vmatpush2.bf16.msra.mxu0 %v3934_v47 }
 0x1db   : > { %2768 = vmatprep.subr.bf16.mxu0 %v3942_v29 }
 0x1dc   : > { %2880 = vmatpush2.bf16.msra.mxu1 %v3937_v42 }
 0x1dd   : > { %2605 = vmatmul.mubr.bf16.gmra.mxu0 %v4502_v60  ;;  %2881 = vmatprep.subr.bf16.mxu1 %v3945_v48 }
 0x1de   : > { %2718 = vmatmul.mubr.bf16.gmra.mxu1 %v4504_v2  ;;  %2769 = vmatpush2.bf16.msra.mxu0 %v3940_v49 }
 0x1df   : > { %2614 = vmatprep.mubr.bf16.mxu0 %v4518_v55  ;;  %2727 = vmatprep.mubr.bf16.mxu1 %v4520_v8 }
 0x1e0   : > { %2882 = vmatpush2.bf16.msra.mxu1 %v3943_v50  ;;  %2770 = vmatprep.subr.bf16.mxu0 %v3948_v51 }
 0x1e1   : > { %2883 = vmatprep.subr.bf16.mxu1 %v3951_v30 }
 0x1e2   : > { %2771 = vmatpush2.bf16.msra.mxu0 %v3946_v36 }
 0x1e3   : > { %2772 = vmatprep.subr.bf16.mxu0 %v3954_v27 }
 0x1e4   : > { %2884 = vmatpush2.bf16.msra.mxu1 %v3949_v5 }
 0x1e5   : > { %2615 = vmatmul.mubr.bf16.gmra.mxu0 %v4522_v12  ;;  %2885 = vmatprep.subr.bf16.mxu1 %v3957_v1 }
 0x1e6   : > { %2728 = vmatmul.mubr.bf16.gmra.mxu1 %v4524_v10  ;;  %2773 = vmatpush2.bf16.msra.mxu0 %v3952_v13 }
 0x1e7   : > { %2624 = vmatprep.mubr.bf16.mxu0 %v4538_v52  ;;  %2737 = vmatprep.mubr.bf16.mxu1 %v4540_v28 }
 0x1e8   : > { %2886 = vmatpush2.bf16.msra.mxu1 %v3955_v16  ;;  %2774 = vmatprep.subr.bf16.mxu0 %v3960_v24 }
 0x1e9   : > { %2887 = vmatprep.subr.bf16.mxu1 %v3963_v25 }
 0x1ea   : > { %2775 = vmatpush2.bf16.msra.mxu0 %v3958_v26 }
 0x1eb   : > { %2776 = vmatprep.subr.bf16.mxu0 %v3966_v31 }
 0x1ec   : > { %2888 = vmatpush2.bf16.msra.mxu1 %v3961_v32 }
 0x1ed   : > { %2625 = vmatmul.mubr.bf16.gmra.mxu0 %v4542_v9  ;;  %2889 = vmatprep.subr.bf16.mxu1 %v3969_v33 }
 0x1ee   : > { %2738 = vmatmul.mubr.bf16.gmra.mxu1 %v4544_v11  ;;  %2777 = vmatpush2.bf16.msra.mxu0 %v3964_v34 }
 0x1ef   : > { %2780 = vmatprep.mubr.bf16.mxu0 %v4398_v57  ;;  %2893 = vmatprep.mubr.bf16.mxu1 %v4400_v58  ;;  %v4617_v57 = vld [vmem:[%s4896_s4] sm:$0x3f] }
 0x1f0   : > { %2890 = vmatpush2.bf16.msra.mxu1 %v3967_v35  ;;  %2778 = vmatprep.subr.bf16.mxu0 %v3972_v39  ;;  %v4622_v58 = vrot.slane %v4617_v57, %v372_v22 }
 0x1f1   : > { %2891 = vmatprep.subr.bf16.mxu1 %v3975_v37 }
 0x1f2   : > { %2779 = vmatpush2.bf16.msra.mxu0 %v3970_v43 }
 0x1f4   : > { %2892 = vmatpush2.bf16.msra.mxu1 %v3973_v45 }
 0x1f5   : > { %2781 = vmatmul.mubr.bf16.vlgmr.msra.gmra.mxu0 %v4402_v61  ;;  %v4628_v61 = vrot.slane %v4617_v57, %v376_v20 }
 0x1f6   : > { %2790 = vmatprep.mubr.bf16.mxu0 %v4418_v38 }
 0x1f7   : > { %2894 = vmatmul.mubr.bf16.vlgmr.msra.gmra.mxu1 %v4404_v62 }
 0x1f8   : > { %2903 = vmatprep.mubr.bf16.mxu1 %v4424_v44 }
 0x1fd   : > { %2791 = vmatmul.mubr.bf16.gmra.mxu0 %v4420_v40 }
 0x1fe   : > { %2800 = vmatprep.mubr.bf16.mxu0 %v4438_v14 }
 0x1ff   : > { %2904 = vmatmul.mubr.bf16.gmra.mxu1 %v4422_v41 }
 0x200   : > { %2913 = vmatprep.mubr.bf16.mxu1 %v4440_v15 }
 0x205   : > { %2801 = vmatmul.mubr.bf16.gmra.mxu0 %v4442_v17 }
 0x206   : > { %2810 = vmatprep.mubr.bf16.mxu0 %v4458_v3 }
 0x207   : > { %2914 = vmatmul.mubr.bf16.gmra.mxu1 %v4444_v18 }
 0x208   : > { %2923 = vmatprep.mubr.bf16.mxu1 %v4460_v4 }
 0x20d   : > { %2811 = vmatmul.mubr.bf16.gmra.mxu0 %v4462_v6 }
 0x20e   : > { %2820 = vmatprep.mubr.bf16.mxu0 %v4478_v56 }
 0x20f   : > { %2924 = vmatmul.mubr.bf16.gmra.mxu1 %v4464_v7 }
 0x210   : > { %2933 = vmatprep.mubr.bf16.mxu1 %v4480_v59 }
 0x215   : > { %2821 = vmatmul.mubr.bf16.gmra.mxu0 %v4482_v63 }
 0x216   : > { %2830 = vmatprep.mubr.bf16.mxu0 %v4498_v53 }
 0x217   : > { %2934 = vmatmul.mubr.bf16.gmra.mxu1 %v4484_v0 }
 0x218   : > { %2943 = vmatprep.mubr.bf16.mxu1 %v4500_v54 }
 0x21d   : > { %2831 = vmatmul.mubr.bf16.gmra.mxu0 %v4502_v60 }
 0x21e   : > { %2840 = vmatprep.mubr.bf16.mxu0 %v4518_v55 }
 0x21f   : > { %2944 = vmatmul.mubr.bf16.gmra.mxu1 %v4504_v2 }
 0x220   : > { %2953 = vmatprep.mubr.bf16.mxu1 %v4520_v8 }
 0x225   : > { %2841 = vmatmul.mubr.bf16.gmra.mxu0 %v4522_v12 }
 0x226   : > { %2850 = vmatprep.mubr.bf16.mxu0 %v4538_v52 }
 0x227   : > { %2954 = vmatmul.mubr.bf16.gmra.mxu1 %v4524_v10 }
 0x228   : > { %2963 = vmatprep.mubr.bf16.mxu1 %v4540_v28 }
 0x22d   : > { %2851 = vmatmul.mubr.bf16.gmra.mxu0 %v4542_v9 }
 0x22f   : > { %2964 = vmatmul.mubr.bf16.gmra.mxu1 %v4544_v11 }
 0x235   : > { %v2330_v62 = vpop.f32.mrf.mxu0  ;;  %v2443_v38 = vpop.f32.mrf.mxu1 }
 0x236   : > { %v2331_v40 = vadd.f32 %v2330_v62, %v4622_v58 }
 0x237   : > { %v2332_v41 = vpop.f32.mrf.mxu0  ;;  %v2445_v44 = vpop.f32.mrf.mxu1 }
 0x238   : > { %v2444_v14 = vadd.f32 %v2443_v38, %v2331_v40  ;;  %v2333_v15 = vadd.f32 %v2332_v41, %v4628_v61 }
 0x239   : > { %v2334_v17 = vpop.f32.mrf.mxu0  ;;  %v2447_v18 = vpop.f32.mrf.mxu1 }
 0x23a   : > { %2974 = vst [vmem:[%s4632_s17] sm:$0xff] %v2444_v14  ;;  %v2446_v20 = vadd.f32 %v2445_v44, %v2333_v15  ;;  %v2335_v22 = vadd.f32 %v2334_v17, %v4622_v58 }
 0x23b   : > { %v2336_v3 = vpop.f32.mrf.mxu0  ;;  %v2449_v4 = vpop.f32.mrf.mxu1 }
 0x23c   : > { %2975 = vst [vmem:[%s4632_s17 + $0x8] sm:$0xff] %v2446_v20  ;;  %v2448_v6 = vadd.f32 %v2447_v18, %v2335_v22  ;;  %v2337_v7 = vadd.f32 %v2336_v3, %v4628_v61 }
 0x23d   : > { %v2340_v56 = vpop.f32.mrf.mxu0  ;;  %v2453_v0 = vpop.f32.mrf.mxu1 }
 0x23e   : > { %2980 = vst [vmem:[%s4632_s17 + $0x30] sm:$0xff] %v2448_v6  ;;  %v2450_v59 = vadd.f32 %v2449_v4, %v2337_v7  ;;  %v2341_v63 = vadd.f32 %v2340_v56, %v4622_v58 }
 0x23f   : > { %v2342_v53 = vpop.f32.mrf.mxu0  ;;  %v2455_v2 = vpop.f32.mrf.mxu1 }
 0x240   : > { %2981 = vst [vmem:[%s4632_s17 + $0x38] sm:$0xff] %v2450_v59  ;;  %v2454_v54 = vadd.f32 %v2453_v0, %v2341_v63  ;;  %v2343_v60 = vadd.f32 %v2342_v53, %v4628_v61 }
 0x241   : > { %v2344_v55 = vpop.f32.mrf.mxu0  ;;  %v2457_v10 = vpop.f32.mrf.mxu1 }
 0x242   : > { %2986 = vst [vmem:[%s4632_s17 + $0x60] sm:$0xff] %v2454_v54  ;;  %v2456_v8 = vadd.f32 %v2455_v2, %v2343_v60  ;;  %v2345_v12 = vadd.f32 %v2344_v55, %v4622_v58 }
 0x243   : > { %v2346_v52 = vpop.f32.mrf.mxu0  ;;  %v2459_v11 = vpop.f32.mrf.mxu1 }
 0x244   : > { %2987 = vst [vmem:[%s4632_s17 + $0x68] sm:$0xff] %v2456_v8  ;;  %v2458_v28 = vadd.f32 %v2457_v10, %v2345_v12  ;;  %v2347_v9 = vadd.f32 %v2346_v52, %v4628_v61 }
 0x245   : > { %v2350_v46 = vpop.f32.mrf.mxu0  ;;  %v2463_v42 = vpop.f32.mrf.mxu1 }
 0x246   : > { %2992 = vst [vmem:[%s4632_s17 + $0x90] sm:$0xff] %v2458_v28  ;;  %v2460_v47 = vadd.f32 %v2459_v11, %v2347_v9  ;;  %v2351_v29 = vadd.f32 %v2350_v46, %v4622_v58 }
 0x247   : > { %v2352_v48 = vpop.f32.mrf.mxu0  ;;  %v2465_v51 = vpop.f32.mrf.mxu1 }
 0x248   : > { %2993 = vst [vmem:[%s4632_s17 + $0x98] sm:$0xff] %v2460_v47  ;;  %v2464_v49 = vadd.f32 %v2463_v42, %v2351_v29  ;;  %v2353_v50 = vadd.f32 %v2352_v48, %v4628_v61 }
 0x249   : > { %v2354_v30 = vpop.f32.mrf.mxu0  ;;  %v2467_v5 = vpop.f32.mrf.mxu1 }
 0x24a   : > { %2998 = vst [vmem:[%s4632_s17 + $0xc0] sm:$0xff] %v2464_v49  ;;  %v2466_v36 = vadd.f32 %v2465_v51, %v2353_v50  ;;  %v2355_v27 = vadd.f32 %v2354_v30, %v4622_v58 }
 0x24b   : > { %v2356_v1 = vpop.f32.mrf.mxu0  ;;  %v2469_v24 = vpop.f32.mrf.mxu1 }
 0x24c   : > { %2999 = vst [vmem:[%s4632_s17 + $0xc8] sm:$0xff] %v2466_v36  ;;  %v2468_v13 = vadd.f32 %v2467_v5, %v2355_v27  ;;  %v2357_v16 = vadd.f32 %v2356_v1, %v4628_v61 }
 0x24d   : > { %v2360_v25 = vpop.f32.mrf.mxu0  ;;  %v2473_v32 = vpop.f32.mrf.mxu1 }
 0x24e   : > { %3004 = vst [vmem:[%s4632_s17 + $0xf0] sm:$0xff] %v2468_v13  ;;  %v2470_v26 = vadd.f32 %v2469_v24, %v2357_v16  ;;  %v2361_v31 = vadd.f32 %v2360_v25, %v4622_v58 }
 0x24f   : > { %v2362_v33 = vpop.f32.mrf.mxu0  ;;  %v2475_v39 = vpop.f32.mrf.mxu1 }
 0x250   : > { %3005 = vst [vmem:[%s4632_s17 + $0xf8] sm:$0xff] %v2470_v26  ;;  %v2474_v34 = vadd.f32 %v2473_v32, %v2361_v31  ;;  %v2363_v35 = vadd.f32 %v2362_v33, %v4628_v61 }
 0x251   : > { %v2364_v37 = vpop.f32.mrf.mxu0  ;;  %v2477_v62 = vpop.f32.mrf.mxu1 }
 0x252   : > { %3010 = vst [vmem:[%s4632_s17 + $0x120] sm:$0xff] %v2474_v34  ;;  %v2476_v43 = vadd.f32 %v2475_v39, %v2363_v35  ;;  %v2365_v45 = vadd.f32 %v2364_v37, %v4622_v58 }
 0x253   : > { %v2366_v38 = vpop.f32.mrf.mxu0  ;;  %v2479_v44 = vpop.f32.mrf.mxu1 }
 0x254   : > { %3011 = vst [vmem:[%s4632_s17 + $0x128] sm:$0xff] %v2476_v43  ;;  %v2478_v40 = vadd.f32 %v2477_v62, %v2365_v45  ;;  %v2367_v41 = vadd.f32 %v2366_v38, %v4628_v61 }
 0x255   : > { %v2370_v14 = vpop.f32.mrf.mxu0  ;;  %v2483_v18 = vpop.f32.mrf.mxu1 }
 0x256   : > { %3016 = vst [vmem:[%s4632_s17 + $0x150] sm:$0xff] %v2478_v40  ;;  %v2480_v15 = vadd.f32 %v2479_v44, %v2367_v41  ;;  %v2371_v17 = vadd.f32 %v2370_v14, %v4622_v58 }
 0x257   : > { %v2372_v20 = vpop.f32.mrf.mxu0  ;;  %v2485_v4 = vpop.f32.mrf.mxu1 }
 0x258   : > { %3017 = vst [vmem:[%s4632_s17 + $0x158] sm:$0xff] %v2480_v15  ;;  %v2484_v22 = vadd.f32 %v2483_v18, %v2371_v17  ;;  %v2373_v3 = vadd.f32 %v2372_v20, %v4628_v61  ;;  %v4695_v17 = vrot.slane %v4617_v57, %v380_v23 }
 0x259   : > { %v2374_v6 = vpop.f32.mrf.mxu0  ;;  %v2487_v59 = vpop.f32.mrf.mxu1 }
 0x25a   : > { %3022 = vst [vmem:[%s4632_s17 + $0x180] sm:$0xff] %v2484_v22  ;;  %v2486_v7 = vadd.f32 %v2485_v4, %v2373_v3  ;;  %v2375_v56 = vadd.f32 %v2374_v6, %v4622_v58  ;;  %v4702_v4 = vrot.slane %v4617_v57, %v384_v21 }
 0x25b   : > { %v2376_v63 = vpop.f32.mrf.mxu0  ;;  %v2489_v54 = vpop.f32.mrf.mxu1 }
 0x25c   : > { %3023 = vst [vmem:[%s4632_s17 + $0x188] sm:$0xff] %v2486_v7  ;;  %v2488_v0 = vadd.f32 %v2487_v59, %v2375_v56  ;;  %v2377_v53 = vadd.f32 %v2376_v63, %v4628_v61 }
 0x25d   : > { %v2380_v60 = vpop.f32.mrf.mxu0  ;;  %v2493_v8 = vpop.f32.mrf.mxu1 }
 0x25e   : > { %3028 = vst [vmem:[%s4632_s17 + $0x1b0] sm:$0xff] %v2488_v0  ;;  %v2490_v2 = vadd.f32 %v2489_v54, %v2377_v53  ;;  %v2381_v55 = vadd.f32 %v2380_v60, %v4622_v58 }
 0x25f   : > { %v2382_v12 = vpop.f32.mrf.mxu0  ;;  %v2495_v28 = vpop.f32.mrf.mxu1 }
 0x260   : > { %3029 = vst [vmem:[%s4632_s17 + $0x1b8] sm:$0xff] %v2490_v2  ;;  %v2494_v10 = vadd.f32 %v2493_v8, %v2381_v55  ;;  %v2383_v52 = vadd.f32 %v2382_v12, %v4628_v61 }
 0x261   : > { %v2384_v9 = vpop.f32.mrf.mxu0  ;;  %v2497_v47 = vpop.f32.mrf.mxu1 }
 0x262   : > { %3034 = vst [vmem:[%s4632_s17 + $0x1e0] sm:$0xff] %v2494_v10  ;;  %v2496_v11 = vadd.f32 %v2495_v28, %v2383_v52  ;;  %v2385_v46 = vadd.f32 %v2384_v9, %v4622_v58 }
 0x263   : > { %v2386_v29 = vpop.f32.mrf.mxu0  ;;  %v2499_v49 = vpop.f32.mrf.mxu1 }
 0x264   : > { %3035 = vst [vmem:[%s4632_s17 + $0x1e8] sm:$0xff] %v2496_v11  ;;  %v2498_v42 = vadd.f32 %v2497_v47, %v2385_v46  ;;  %v2387_v48 = vadd.f32 %v2386_v29, %v4628_v61 }
 0x265   : > { %v2390_v50 = vpop.f32.mrf.mxu0  ;;  %v2503_v36 = vpop.f32.mrf.mxu1 }
 0x266   : > { %3040 = vst [vmem:[%s4632_s17 + $0x210] sm:$0xff] %v2498_v42  ;;  %v2500_v51 = vadd.f32 %v2499_v49, %v2387_v48  ;;  %v2391_v30 = vadd.f32 %v2390_v50, %v4622_v58 }
 0x267   : > { %v2392_v27 = vpop.f32.mrf.mxu0  ;;  %v2505_v13 = vpop.f32.mrf.mxu1 }
 0x268   : > { %3041 = vst [vmem:[%s4632_s17 + $0x218] sm:$0xff] %v2500_v51  ;;  %v2504_v5 = vadd.f32 %v2503_v36, %v2391_v30  ;;  %v2393_v1 = vadd.f32 %v2392_v27, %v4628_v61 }
 0x269   : > { %v2394_v16 = vpop.f32.mrf.mxu0  ;;  %v2507_v26 = vpop.f32.mrf.mxu1 }
 0x26a   : > { %3046 = vst [vmem:[%s4632_s17 + $0x240] sm:$0xff] %v2504_v5  ;;  %v2506_v24 = vadd.f32 %v2505_v13, %v2393_v1  ;;  %v2395_v25 = vadd.f32 %v2394_v16, %v4622_v58 }
 0x26b   : > { %v2396_v31 = vpop.f32.mrf.mxu0  ;;  %v2509_v34 = vpop.f32.mrf.mxu1 }
 0x26c   : > { %3047 = vst [vmem:[%s4632_s17 + $0x248] sm:$0xff] %v2506_v24  ;;  %v2508_v32 = vadd.f32 %v2507_v26, %v2395_v25  ;;  %v2397_v33 = vadd.f32 %v2396_v31, %v4628_v61 }
 0x26d   : > { %v2400_v35 = vpop.f32.mrf.mxu0  ;;  %v2513_v43 = vpop.f32.mrf.mxu1 }
 0x26e   : > { %3052 = vst [vmem:[%s4632_s17 + $0x270] sm:$0xff] %v2508_v32  ;;  %v2510_v39 = vadd.f32 %v2509_v34, %v2397_v33  ;;  %v2401_v37 = vadd.f32 %v2400_v35, %v4622_v58 }
 0x26f   : > { %v2402_v45 = vpop.f32.mrf.mxu0  ;;  %v2515_v40 = vpop.f32.mrf.mxu1 }
 0x270   : > { %3053 = vst [vmem:[%s4632_s17 + $0x278] sm:$0xff] %v2510_v39  ;;  %v2514_v62 = vadd.f32 %v2513_v43, %v2401_v37  ;;  %v2403_v38 = vadd.f32 %v2402_v45, %v4628_v61 }
 0x271   : > { %v2404_v41 = vpop.f32.mrf.mxu0  ;;  %v2517_v15 = vpop.f32.mrf.mxu1 }
 0x272   : > { %3058 = vst [vmem:[%s4632_s17 + $0x2a0] sm:$0xff] %v2514_v62  ;;  %v2516_v44 = vadd.f32 %v2515_v40, %v2403_v38  ;;  %v2405_v14 = vadd.f32 %v2404_v41, %v4622_v58 }
 0x273   : > { %v2406_v18 = vpop.f32.mrf.mxu0  ;;  %v2519_v3 = vpop.f32.mrf.mxu1 }
 0x274   : > { %3059 = vst [vmem:[%s4632_s17 + $0x2a8] sm:$0xff] %v2516_v44  ;;  %v2518_v20 = vadd.f32 %v2517_v15, %v2405_v14  ;;  %v2407_v22 = vadd.f32 %v2406_v18, %v4628_v61 }
 0x275   : > { %v2556_v6 = vpop.f32.mrf.mxu0 }
 0x276   : > { %3064 = vst [vmem:[%s4632_s17 + $0x2d0] sm:$0xff] %v2518_v20  ;;  %v2520_v58 = vadd.f32 %v2519_v3, %v2407_v22  ;;  %v2557_v7 = vadd.f32 %v2556_v6, %v4695_v17  ;;  %v2669_v23 = vpop.f32.mrf.mxu1 }
 0x277   : > { %v2558_v56 = vpop.f32.mrf.mxu0 }
 0x278   : > { %3065 = vst [vmem:[%s4632_s17 + $0x2d8] sm:$0xff] %v2520_v58  ;;  %v2670_v59 = vadd.f32 %v2669_v23, %v2557_v7  ;;  %v2559_v63 = vadd.f32 %v2558_v56, %v4702_v4  ;;  %v2671_v61 = vpop.f32.mrf.mxu1 }
 0x279   : > { %v2560_v0 = vpop.f32.mrf.mxu0 }
 0x27a   : > { %2976 = vst [vmem:[%s4632_s17 + $0x10] sm:$0xff] %v2670_v59  ;;  %v2672_v53 = vadd.f32 %v2671_v61, %v2559_v63  ;;  %v2561_v21 = vadd.f32 %v2560_v0, %v4695_v17  ;;  %v2673_v54 = vpop.f32.mrf.mxu1 }
 0x27b   : > { %v2562_v60 = vpop.f32.mrf.mxu0 }
 0x27c   : > { %2977 = vst [vmem:[%s4632_s17 + $0x18] sm:$0xff] %v2672_v53  ;;  %v2674_v2 = vadd.f32 %v2673_v54, %v2561_v21  ;;  %v2563_v55 = vadd.f32 %v2562_v60, %v4702_v4  ;;  %v2675_v8 = vpop.f32.mrf.mxu1 }
 0x27d   : > { %v2566_v12 = vpop.f32.mrf.mxu0 }
 0x27e   : > { %2982 = vst [vmem:[%s4632_s17 + $0x40] sm:$0xff] %v2674_v2  ;;  %v2676_v10 = vadd.f32 %v2675_v8, %v2563_v55  ;;  %v2567_v52 = vadd.f32 %v2566_v12, %v4695_v17  ;;  %v2679_v28 = vpop.f32.mrf.mxu1 }
 0x27f   : > { %v2568_v9 = vpop.f32.mrf.mxu0 }
 0x280   : > { %2983 = vst [vmem:[%s4632_s17 + $0x48] sm:$0xff] %v2676_v10  ;;  %v2680_v11 = vadd.f32 %v2679_v28, %v2567_v52  ;;  %v2569_v46 = vadd.f32 %v2568_v9, %v4702_v4  ;;  %v2681_v47 = vpop.f32.mrf.mxu1 }
 0x281   : > { %v2570_v29 = vpop.f32.mrf.mxu0 }
 0x282   : > { %2988 = vst [vmem:[%s4632_s17 + $0x70] sm:$0xff] %v2680_v11  ;;  %v2682_v42 = vadd.f32 %v2681_v47, %v2569_v46  ;;  %v2571_v48 = vadd.f32 %v2570_v29, %v4695_v17  ;;  %v2683_v49 = vpop.f32.mrf.mxu1 }
 0x283   : > { %v2572_v50 = vpop.f32.mrf.mxu0 }
 0x284   : > { %2989 = vst [vmem:[%s4632_s17 + $0x78] sm:$0xff] %v2682_v42  ;;  %v2684_v51 = vadd.f32 %v2683_v49, %v2571_v48  ;;  %v2573_v30 = vadd.f32 %v2572_v50, %v4702_v4  ;;  %v2685_v36 = vpop.f32.mrf.mxu1 }
 0x285   : > { %v2576_v27 = vpop.f32.mrf.mxu0 }
 0x286   : > { %2994 = vst [vmem:[%s4632_s17 + $0xa0] sm:$0xff] %v2684_v51  ;;  %v2686_v5 = vadd.f32 %v2685_v36, %v2573_v30  ;;  %v2577_v1 = vadd.f32 %v2576_v27, %v4695_v17  ;;  %v2689_v13 = vpop.f32.mrf.mxu1 }
 0x287   : > { %v2578_v16 = vpop.f32.mrf.mxu0 }
 0x288   : > { %2995 = vst [vmem:[%s4632_s17 + $0xa8] sm:$0xff] %v2686_v5  ;;  %v2690_v24 = vadd.f32 %v2689_v13, %v2577_v1  ;;  %v2579_v25 = vadd.f32 %v2578_v16, %v4702_v4  ;;  %v2691_v26 = vpop.f32.mrf.mxu1 }
 0x289   : > { %v2580_v31 = vpop.f32.mrf.mxu0 }
 0x28a   : > { %3000 = vst [vmem:[%s4632_s17 + $0xd0] sm:$0xff] %v2690_v24  ;;  %v2692_v32 = vadd.f32 %v2691_v26, %v2579_v25  ;;  %v2581_v33 = vadd.f32 %v2580_v31, %v4695_v17  ;;  %v2693_v34 = vpop.f32.mrf.mxu1 }
 0x28b   : > { %v2582_v35 = vpop.f32.mrf.mxu0 }
 0x28c   : > { %3001 = vst [vmem:[%s4632_s17 + $0xd8] sm:$0xff] %v2692_v32  ;;  %v2694_v39 = vadd.f32 %v2693_v34, %v2581_v33  ;;  %v2583_v37 = vadd.f32 %v2582_v35, %v4702_v4  ;;  %v2695_v43 = vpop.f32.mrf.mxu1 }
 0x28d   : > { %v2586_v45 = vpop.f32.mrf.mxu0 }
 0x28e   : > { %3006 = vst [vmem:[%s4632_s17 + $0x100] sm:$0xff] %v2694_v39  ;;  %v2696_v62 = vadd.f32 %v2695_v43, %v2583_v37  ;;  %v2587_v38 = vadd.f32 %v2586_v45, %v4695_v17  ;;  %v2699_v40 = vpop.f32.mrf.mxu1 }
 0x28f   : > { %v2588_v41 = vpop.f32.mrf.mxu0 }
 0x290   : > { %3007 = vst [vmem:[%s4632_s17 + $0x108] sm:$0xff] %v2696_v62  ;;  %v2700_v44 = vadd.f32 %v2699_v40, %v2587_v38  ;;  %v2589_v14 = vadd.f32 %v2588_v41, %v4702_v4  ;;  %v2701_v15 = vpop.f32.mrf.mxu1 }
 0x291   : > { %v2590_v18 = vpop.f32.mrf.mxu0 }
 0x292   : > { %3012 = vst [vmem:[%s4632_s17 + $0x130] sm:$0xff] %v2700_v44  ;;  %v2702_v20 = vadd.f32 %v2701_v15, %v2589_v14  ;;  %v2591_v22 = vadd.f32 %v2590_v18, %v4695_v17  ;;  %v2703_v3 = vpop.f32.mrf.mxu1  ;;  %v1324_v18 = vsub.s32 4, %v4368_v19 }
 0x293   : > { %v2592_v6 = vpop.f32.mrf.mxu0 }
 0x294   : > { %3013 = vst [vmem:[%s4632_s17 + $0x138] sm:$0xff] %v2702_v20  ;;  %v2704_v58 = vadd.f32 %v2703_v3, %v2591_v22  ;;  %v2593_v7 = vadd.f32 %v2592_v6, %v4702_v4  ;;  %v2705_v23 = vpop.f32.mrf.mxu1 }
 0x295   : > { %v2596_v56 = vpop.f32.mrf.mxu0 }
 0x296   : > { %3018 = vst [vmem:[%s4632_s17 + $0x160] sm:$0xff] %v2704_v58  ;;  %v2706_v59 = vadd.f32 %v2705_v23, %v2593_v7  ;;  %v2597_v63 = vadd.f32 %v2596_v56, %v4695_v17  ;;  %v2709_v61 = vpop.f32.mrf.mxu1  ;;  %v1328_v58 = vsub.s32 5, %v4368_v19 }
 0x297   : > { %v2598_v0 = vpop.f32.mrf.mxu0 }
 0x298   : > { %3019 = vst [vmem:[%s4632_s17 + $0x168] sm:$0xff] %v2706_v59  ;;  %v2710_v53 = vadd.f32 %v2709_v61, %v2597_v63  ;;  %v2599_v21 = vadd.f32 %v2598_v0, %v4702_v4  ;;  %v2711_v54 = vpop.f32.mrf.mxu1  ;;  %v4769_v63 = vrot.slane %v4617_v57, %v1324_v18 }
 0x299   : > { %v2600_v60 = vpop.f32.mrf.mxu0 }
 0x29a   : > { %3024 = vst [vmem:[%s4632_s17 + $0x190] sm:$0xff] %v2710_v53  ;;  %v2712_v2 = vadd.f32 %v2711_v54, %v2599_v21  ;;  %v2601_v55 = vadd.f32 %v2600_v60, %v4695_v17  ;;  %v2713_v8 = vpop.f32.mrf.mxu1  ;;  %v4774_v54 = vrot.slane %v4617_v57, %v1328_v58 }
 0x29b   : > { %v2602_v12 = vpop.f32.mrf.mxu0 }
 0x29c   : > { %3025 = vst [vmem:[%s4632_s17 + $0x198] sm:$0xff] %v2712_v2  ;;  %v2714_v10 = vadd.f32 %v2713_v8, %v2601_v55  ;;  %v2603_v52 = vadd.f32 %v2602_v12, %v4702_v4  ;;  %v2715_v28 = vpop.f32.mrf.mxu1 }
 0x29d   : > { %v2606_v9 = vpop.f32.mrf.mxu0 }
 0x29e   : > { %3030 = vst [vmem:[%s4632_s17 + $0x1c0] sm:$0xff] %v2714_v10  ;;  %v2716_v11 = vadd.f32 %v2715_v28, %v2603_v52  ;;  %v2607_v46 = vadd.f32 %v2606_v9, %v4695_v17  ;;  %v2719_v47 = vpop.f32.mrf.mxu1 }
 0x29f   : > { %v2608_v29 = vpop.f32.mrf.mxu0 }
 0x2a0   : > { %3031 = vst [vmem:[%s4632_s17 + $0x1c8] sm:$0xff] %v2716_v11  ;;  %v2720_v42 = vadd.f32 %v2719_v47, %v2607_v46  ;;  %v2609_v48 = vadd.f32 %v2608_v29, %v4702_v4  ;;  %v2721_v49 = vpop.f32.mrf.mxu1 }
 0x2a1   : > { %v2610_v50 = vpop.f32.mrf.mxu0 }
 0x2a2   : > { %3036 = vst [vmem:[%s4632_s17 + $0x1f0] sm:$0xff] %v2720_v42  ;;  %v2722_v51 = vadd.f32 %v2721_v49, %v2609_v48  ;;  %v2611_v30 = vadd.f32 %v2610_v50, %v4695_v17  ;;  %v2723_v36 = vpop.f32.mrf.mxu1 }
 0x2a3   : > { %v2612_v27 = vpop.f32.mrf.mxu0 }
 0x2a4   : > { %3037 = vst [vmem:[%s4632_s17 + $0x1f8] sm:$0xff] %v2722_v51  ;;  %v2724_v5 = vadd.f32 %v2723_v36, %v2611_v30  ;;  %v2613_v1 = vadd.f32 %v2612_v27, %v4702_v4  ;;  %v2725_v13 = vpop.f32.mrf.mxu1 }
 0x2a5   : > { %v2616_v16 = vpop.f32.mrf.mxu0 }
 0x2a6   : > { %3042 = vst [vmem:[%s4632_s17 + $0x220] sm:$0xff] %v2724_v5  ;;  %v2726_v24 = vadd.f32 %v2725_v13, %v2613_v1  ;;  %v2617_v25 = vadd.f32 %v2616_v16, %v4695_v17  ;;  %v2729_v26 = vpop.f32.mrf.mxu1 }
 0x2a7   : > { %v2618_v31 = vpop.f32.mrf.mxu0 }
 0x2a8   : > { %3043 = vst [vmem:[%s4632_s17 + $0x228] sm:$0xff] %v2726_v24  ;;  %v2730_v32 = vadd.f32 %v2729_v26, %v2617_v25  ;;  %v2619_v33 = vadd.f32 %v2618_v31, %v4702_v4  ;;  %v2731_v34 = vpop.f32.mrf.mxu1 }
 0x2a9   : > { %v2620_v35 = vpop.f32.mrf.mxu0 }
 0x2aa   : > { %3048 = vst [vmem:[%s4632_s17 + $0x250] sm:$0xff] %v2730_v32  ;;  %v2732_v39 = vadd.f32 %v2731_v34, %v2619_v33  ;;  %v2621_v37 = vadd.f32 %v2620_v35, %v4695_v17  ;;  %v2733_v43 = vpop.f32.mrf.mxu1 }
 0x2ab   : > { %v2622_v45 = vpop.f32.mrf.mxu0 }
 0x2ac   : > { %3049 = vst [vmem:[%s4632_s17 + $0x258] sm:$0xff] %v2732_v39  ;;  %v2734_v62 = vadd.f32 %v2733_v43, %v2621_v37  ;;  %v2623_v38 = vadd.f32 %v2622_v45, %v4702_v4  ;;  %v2735_v40 = vpop.f32.mrf.mxu1 }
 0x2ad   : > { %v2626_v41 = vpop.f32.mrf.mxu0 }
 0x2ae   : > { %3054 = vst [vmem:[%s4632_s17 + $0x280] sm:$0xff] %v2734_v62  ;;  %v2736_v44 = vadd.f32 %v2735_v40, %v2623_v38  ;;  %v2627_v14 = vadd.f32 %v2626_v41, %v4695_v17  ;;  %v2739_v15 = vpop.f32.mrf.mxu1 }
 0x2af   : > { %v2628_v20 = vpop.f32.mrf.mxu0 }
 0x2b0   : > { %3055 = vst [vmem:[%s4632_s17 + $0x288] sm:$0xff] %v2736_v44  ;;  %v2740_v22 = vadd.f32 %v2739_v15, %v2627_v14  ;;  %v2629_v3 = vadd.f32 %v2628_v20, %v4702_v4  ;;  %v2741_v6 = vpop.f32.mrf.mxu1 }
 0x2b1   : > { %v2630_v7 = vpop.f32.mrf.mxu0 }
 0x2b2   : > { %3060 = vst [vmem:[%s4632_s17 + $0x2b0] sm:$0xff] %v2740_v22  ;;  %v2742_v23 = vadd.f32 %v2741_v6, %v2629_v3  ;;  %v2631_v56 = vadd.f32 %v2630_v7, %v4695_v17  ;;  %v2743_v59 = vpop.f32.mrf.mxu1 }
 0x2b3   : > { %v2632_v61 = vpop.f32.mrf.mxu0 }
 0x2b4   : > { %3061 = vst [vmem:[%s4632_s17 + $0x2b8] sm:$0xff] %v2742_v23  ;;  %v2744_v0 = vadd.f32 %v2743_v59, %v2631_v56  ;;  %v2633_v53 = vadd.f32 %v2632_v61, %v4702_v4  ;;  %v2745_v21 = vpop.f32.mrf.mxu1 }
 0x2b5   : > { %v2782_v19 = vpop.f32.mrf.mxu0 }
 0x2b6   : > { %3066 = vst [vmem:[%s4632_s17 + $0x2e0] sm:$0xff] %v2744_v0  ;;  %v2746_v60 = vadd.f32 %v2745_v21, %v2633_v53  ;;  %v2783_v17 = vadd.f32 %v2782_v19, %v4769_v63 }
 0x2b7   : > { %v2895_v2 = vpop.f32.mrf.mxu1  ;;  %v2784_v55 = vpop.f32.mrf.mxu0 }
 0x2b8   : > { %3067 = vst [vmem:[%s4632_s17 + $0x2e8] sm:$0xff] %v2746_v60  ;;  %v2896_v8 = vadd.f32 %v2895_v2, %v2783_v17  ;;  %v2785_v12 = vadd.f32 %v2784_v55, %v4774_v54 }
 0x2b9   : > { %v2897_v10 = vpop.f32.mrf.mxu1  ;;  %v2786_v52 = vpop.f32.mrf.mxu0 }
 0x2ba   : > { %2978 = vst [vmem:[%s4632_s17 + $0x20] sm:$0xff] %v2896_v8  ;;  %v2898_v4 = vadd.f32 %v2897_v10, %v2785_v12  ;;  %v2787_v57 = vadd.f32 %v2786_v52, %v4769_v63 }
 0x2bb   : > { %v2899_v28 = vpop.f32.mrf.mxu1  ;;  %v2788_v9 = vpop.f32.mrf.mxu0 }
 0x2bc   : > { %2979 = vst [vmem:[%s4632_s17 + $0x28] sm:$0xff] %v2898_v4  ;;  %v2900_v11 = vadd.f32 %v2899_v28, %v2787_v57  ;;  %v2789_v46 = vadd.f32 %v2788_v9, %v4774_v54 }
 0x2bd   : > { %v2901_v47 = vpop.f32.mrf.mxu1  ;;  %v2792_v29 = vpop.f32.mrf.mxu0 }
 0x2be   : > { %2984 = vst [vmem:[%s4632_s17 + $0x50] sm:$0xff] %v2900_v11  ;;  %v2902_v42 = vadd.f32 %v2901_v47, %v2789_v46  ;;  %v2793_v48 = vadd.f32 %v2792_v29, %v4769_v63 }
 0x2bf   : > { %v2905_v49 = vpop.f32.mrf.mxu1  ;;  %v2794_v50 = vpop.f32.mrf.mxu0 }
 0x2c0   : > { %2985 = vst [vmem:[%s4632_s17 + $0x58] sm:$0xff] %v2902_v42  ;;  %v2906_v51 = vadd.f32 %v2905_v49, %v2793_v48  ;;  %v2795_v30 = vadd.f32 %v2794_v50, %v4774_v54 }
 0x2c1   : > { %v2907_v36 = vpop.f32.mrf.mxu1  ;;  %v2796_v27 = vpop.f32.mrf.mxu0 }
 0x2c2   : > { %2990 = vst [vmem:[%s4632_s17 + $0x80] sm:$0xff] %v2906_v51  ;;  %v2908_v5 = vadd.f32 %v2907_v36, %v2795_v30  ;;  %v2797_v1 = vadd.f32 %v2796_v27, %v4769_v63 }
 0x2c3   : > { %v2909_v13 = vpop.f32.mrf.mxu1  ;;  %v2798_v16 = vpop.f32.mrf.mxu0 }
 0x2c4   : > { %2991 = vst [vmem:[%s4632_s17 + $0x88] sm:$0xff] %v2908_v5  ;;  %v2910_v24 = vadd.f32 %v2909_v13, %v2797_v1  ;;  %v2799_v25 = vadd.f32 %v2798_v16, %v4774_v54 }
 0x2c5   : > { %v2911_v26 = vpop.f32.mrf.mxu1  ;;  %v2802_v31 = vpop.f32.mrf.mxu0 }
 0x2c6   : > { %2996 = vst [vmem:[%s4632_s17 + $0xb0] sm:$0xff] %v2910_v24  ;;  %v2912_v32 = vadd.f32 %v2911_v26, %v2799_v25  ;;  %v2803_v33 = vadd.f32 %v2802_v31, %v4769_v63 }
 0x2c7   : > { %v2915_v34 = vpop.f32.mrf.mxu1  ;;  %v2804_v35 = vpop.f32.mrf.mxu0 }
 0x2c8   : > { %2997 = vst [vmem:[%s4632_s17 + $0xb8] sm:$0xff] %v2912_v32  ;;  %v2916_v39 = vadd.f32 %v2915_v34, %v2803_v33  ;;  %v2805_v37 = vadd.f32 %v2804_v35, %v4774_v54 }
 0x2c9   : > { %v2917_v43 = vpop.f32.mrf.mxu1  ;;  %v2806_v45 = vpop.f32.mrf.mxu0 }
 0x2ca   : > { %3002 = vst [vmem:[%s4632_s17 + $0xe0] sm:$0xff] %v2916_v39  ;;  %v2918_v62 = vadd.f32 %v2917_v43, %v2805_v37  ;;  %v2807_v38 = vadd.f32 %v2806_v45, %v4769_v63 }
 0x2cb   : > { %v2919_v40 = vpop.f32.mrf.mxu1  ;;  %v2808_v41 = vpop.f32.mrf.mxu0 }
 0x2cc   : > { %3003 = vst [vmem:[%s4632_s17 + $0xe8] sm:$0xff] %v2918_v62  ;;  %v2920_v44 = vadd.f32 %v2919_v40, %v2807_v38  ;;  %v2809_v14 = vadd.f32 %v2808_v41, %v4774_v54 }
 0x2cd   : > { %v2921_v15 = vpop.f32.mrf.mxu1  ;;  %v2812_v18 = vpop.f32.mrf.mxu0 }
 0x2ce   : > { %3008 = vst [vmem:[%s4632_s17 + $0x110] sm:$0xff] %v2920_v44  ;;  %v2922_v20 = vadd.f32 %v2921_v15, %v2809_v14  ;;  %v2813_v22 = vadd.f32 %v2812_v18, %v4769_v63 }
 0x2cf   : > { %v2925_v3 = vpop.f32.mrf.mxu1  ;;  %v2814_v6 = vpop.f32.mrf.mxu0 }
 0x2d0   : > { %3009 = vst [vmem:[%s4632_s17 + $0x118] sm:$0xff] %v2922_v20  ;;  %v2926_v58 = vadd.f32 %v2925_v3, %v2813_v22  ;;  %v2815_v7 = vadd.f32 %v2814_v6, %v4774_v54 }
 0x2d1   : > { %v2927_v23 = vpop.f32.mrf.mxu1  ;;  %v2816_v56 = vpop.f32.mrf.mxu0 }
 0x2d2   : > { %3014 = vst [vmem:[%s4632_s17 + $0x140] sm:$0xff] %v2926_v58  ;;  %v2928_v59 = vadd.f32 %v2927_v23, %v2815_v7  ;;  %v2817_v61 = vadd.f32 %v2816_v56, %v4769_v63 }
 0x2d3   : > { %v2929_v0 = vpop.f32.mrf.mxu1  ;;  %v2818_v53 = vpop.f32.mrf.mxu0 }
 0x2d4   : > { %3015 = vst [vmem:[%s4632_s17 + $0x148] sm:$0xff] %v2928_v59  ;;  %v2930_v21 = vadd.f32 %v2929_v0, %v2817_v61  ;;  %v2819_v19 = vadd.f32 %v2818_v53, %v4774_v54 }
 0x2d5   : > { %v2931_v60 = vpop.f32.mrf.mxu1  ;;  %v2822_v17 = vpop.f32.mrf.mxu0 }
 0x2d6   : > { %3020 = vst [vmem:[%s4632_s17 + $0x170] sm:$0xff] %v2930_v21  ;;  %v2932_v2 = vadd.f32 %v2931_v60, %v2819_v19  ;;  %v2823_v55 = vadd.f32 %v2822_v17, %v4769_v63 }
 0x2d7   : > { %v2935_v8 = vpop.f32.mrf.mxu1  ;;  %v2824_v12 = vpop.f32.mrf.mxu0 }
 0x2d8   : > { %3021 = vst [vmem:[%s4632_s17 + $0x178] sm:$0xff] %v2932_v2  ;;  %v2936_v10 = vadd.f32 %v2935_v8, %v2823_v55  ;;  %v2825_v52 = vadd.f32 %v2824_v12, %v4774_v54 }
 0x2d9   : > { %v2937_v4 = vpop.f32.mrf.mxu1  ;;  %v2826_v57 = vpop.f32.mrf.mxu0 }
 0x2da   : > { %3026 = vst [vmem:[%s4632_s17 + $0x1a0] sm:$0xff] %v2936_v10  ;;  %v2938_v28 = vadd.f32 %v2937_v4, %v2825_v52  ;;  %v2827_v9 = vadd.f32 %v2826_v57, %v4769_v63 }
 0x2db   : > { %v2939_v11 = vpop.f32.mrf.mxu1  ;;  %v2828_v46 = vpop.f32.mrf.mxu0 }
 0x2dc   : > { %3027 = vst [vmem:[%s4632_s17 + $0x1a8] sm:$0xff] %v2938_v28  ;;  %v2940_v47 = vadd.f32 %v2939_v11, %v2827_v9  ;;  %v2829_v29 = vadd.f32 %v2828_v46, %v4774_v54 }
 0x2dd   : > { %v2941_v42 = vpop.f32.mrf.mxu1  ;;  %v2832_v48 = vpop.f32.mrf.mxu0 }
 0x2de   : > { %3032 = vst [vmem:[%s4632_s17 + $0x1d0] sm:$0xff] %v2940_v47  ;;  %v2942_v49 = vadd.f32 %v2941_v42, %v2829_v29  ;;  %v2833_v50 = vadd.f32 %v2832_v48, %v4769_v63 }
 0x2df   : > { %v2945_v51 = vpop.f32.mrf.mxu1  ;;  %v2834_v30 = vpop.f32.mrf.mxu0 }
 0x2e0   : > { %3033 = vst [vmem:[%s4632_s17 + $0x1d8] sm:$0xff] %v2942_v49  ;;  %v2946_v36 = vadd.f32 %v2945_v51, %v2833_v50  ;;  %v2835_v27 = vadd.f32 %v2834_v30, %v4774_v54 }
 0x2e1   : > { %v2947_v5 = vpop.f32.mrf.mxu1  ;;  %v2836_v1 = vpop.f32.mrf.mxu0 }
 0x2e2   : > { %3038 = vst [vmem:[%s4632_s17 + $0x200] sm:$0xff] %v2946_v36  ;;  %v2948_v13 = vadd.f32 %v2947_v5, %v2835_v27  ;;  %v2837_v16 = vadd.f32 %v2836_v1, %v4769_v63 }
 0x2e3   : > { %v2949_v24 = vpop.f32.mrf.mxu1  ;;  %v2838_v25 = vpop.f32.mrf.mxu0 }
 0x2e4   : > { %3039 = vst [vmem:[%s4632_s17 + $0x208] sm:$0xff] %v2948_v13  ;;  %v2950_v26 = vadd.f32 %v2949_v24, %v2837_v16  ;;  %v2839_v31 = vadd.f32 %v2838_v25, %v4774_v54 }
 0x2e5   : > { %v2951_v32 = vpop.f32.mrf.mxu1  ;;  %v2842_v33 = vpop.f32.mrf.mxu0 }
 0x2e6   : > { %3044 = vst [vmem:[%s4632_s17 + $0x230] sm:$0xff] %v2950_v26  ;;  %v2952_v34 = vadd.f32 %v2951_v32, %v2839_v31  ;;  %v2843_v35 = vadd.f32 %v2842_v33, %v4769_v63 }
 0x2e7   : > { %v2955_v39 = vpop.f32.mrf.mxu1  ;;  %v2844_v37 = vpop.f32.mrf.mxu0 }
 0x2e8   : > { %3045 = vst [vmem:[%s4632_s17 + $0x238] sm:$0xff] %v2952_v34  ;;  %v2956_v43 = vadd.f32 %v2955_v39, %v2843_v35  ;;  %v2845_v45 = vadd.f32 %v2844_v37, %v4774_v54 }
 0x2e9   : > { %v2957_v62 = vpop.f32.mrf.mxu1  ;;  %v2846_v38 = vpop.f32.mrf.mxu0 }
 0x2ea   : > { %3050 = vst [vmem:[%s4632_s17 + $0x260] sm:$0xff] %v2956_v43  ;;  %v2958_v40 = vadd.f32 %v2957_v62, %v2845_v45  ;;  %v2847_v41 = vadd.f32 %v2846_v38, %v4769_v63 }
 0x2eb   : > { %v2959_v44 = vpop.f32.mrf.mxu1  ;;  %v2848_v14 = vpop.f32.mrf.mxu0 }
 0x2ec   : > { %3051 = vst [vmem:[%s4632_s17 + $0x268] sm:$0xff] %v2958_v40  ;;  %v2960_v15 = vadd.f32 %v2959_v44, %v2847_v41  ;;  %v2849_v18 = vadd.f32 %v2848_v14, %v4774_v54 }
 0x2ed   : > { %v2961_v20 = vpop.f32.mrf.mxu1  ;;  %v2852_v22 = vpop.f32.mrf.mxu0 }
 0x2ee   : > { %3056 = vst [vmem:[%s4632_s17 + $0x290] sm:$0xff] %v2960_v15  ;;  %v2962_v3 = vadd.f32 %v2961_v20, %v2849_v18  ;;  %v2853_v6 = vadd.f32 %v2852_v22, %v4769_v63 }
 0x2ef   : > { %v2965_v58 = vpop.f32.mrf.mxu1  ;;  %v2854_v7 = vpop.f32.mrf.mxu0 }
 0x2f0   : > { %3057 = vst [vmem:[%s4632_s17 + $0x298] sm:$0xff] %v2962_v3  ;;  %v2966_v23 = vadd.f32 %v2965_v58, %v2853_v6  ;;  %v2855_v56 = vadd.f32 %v2854_v7, %v4774_v54 }
 0x2f1   : > { %v2967_v59 = vpop.f32.mrf.mxu1  ;;  %v2856_v61 = vpop.f32.mrf.mxu0 }
 0x2f2   : > { %3062 = vst [vmem:[%s4632_s17 + $0x2c0] sm:$0xff] %v2966_v23  ;;  %v2968_v0 = vadd.f32 %v2967_v59, %v2855_v56  ;;  %v2857_v53 = vadd.f32 %v2856_v61, %v4769_v63 }
 0x2f3   : > { %v2969_v21 = vpop.f32.mrf.mxu1  ;;  %v2858_v19 = vpop.f32.mrf.mxu0 }
 0x2f4   : > { %3063 = vst [vmem:[%s4632_s17 + $0x2c8] sm:$0xff] %v2968_v0  ;;  %v2970_v60 = vadd.f32 %v2969_v21, %v2857_v53  ;;  %v2859_v17 = vadd.f32 %v2858_v19, %v4774_v54 }
 0x2f5   : > { %v2971_v2 = vpop.f32.mrf.mxu1 }
 0x2f6   : > { %3068 = vst [vmem:[%s4632_s17 + $0x2f0] sm:$0xff] %v2970_v60  ;;  %v2972_v55 = vadd.f32 %v2971_v2, %v2859_v17 }
 0x2f8   : > { %3069 = vst [vmem:[%s4632_s17 + $0x2f8] sm:$0xff] %v2972_v55 }
 0x2f9   : > { %4095 = shalt.err (!%p4092_p9)
}
 0x2fa   : > { %s4096_s12 = scalar_lea.hbm %s4845_s14, 12288  ;;  %s4100_s26 = scalar_lea.hbm %s4897_s5, 24576 }
 0x2fb   : > { %p4097_p1 = scmp.ne.s32.totalorder %s4845_s14, %s4096_s12  ;;  %p4101_p11 = scmp.lt.s32.totalorder %s4845_s14, %s4897_s5 }
 0x2fc   : > { %p4102_p13 = scmp.lt.s32.totalorder %s4100_s26, %s4096_s12 }
 0x2fd   : > { %p4098_p8 = pnand %p4097_p1, %p4915_p6 }
 0x2fe   : > { %p4103_p2 = por %p4102_p13, %p4101_p11 }
 0x2ff   : > { %p4099_p10 = pneg %p4098_p8 }
 0x301   : > { %p4104_p4 = pnand %p4103_p2, %p4099_p10 }
 0x303   : > { %4107 = shalt.err (!%p4104_p4)
}
 0x304   : > { %s4167_s23 = smov 768   ;;  %s4168_s29 = smov 48  }
 0x305   : > { %3497 = dma.vmem_to_hbm [thread:$0]  (%p4915_p6), %s4848_s27, 12288, %s4845_s14, %s3071_s22, %s4167_s23, %s4167_s23, %s4168_s29  }
 0x306 PF: > { %s3100_s13 = sand.u32 1, %s4142_s18   ;;  %p4916_p12 = scmp.ne.s32.totalorder %s4903_s25, 0 }
 0x307   : > { %p4917_p0 = scmp.ge.s32.totalorder %s4154_s21, 2  ;;  %s3101_s16 = scalar_lea.sflag [#allocation4], %s3100_s13 }
 0x309   : > { %p3514_p5 = pnand %p4917_p0, %p4916_p12 }
 0x30b   : > { %p3515_p3 = pneg %p3514_p5 }
 0x30d   : > { %4137 = dma.done.wait (%p3515_p3), %s3101_s16, 12288  }
 0x30e   : > { %4139 = vsyncadd (%p3515_p3), %s3101_s16, 4294955008  ;;  %p20_p7 = scmp.ge.s32.totalorder %s4279_s6, 4   ;;  %s4918_s18 = smov %s4146_s19 }
 0x30f   : > { %s4919_s19 = smov %s4150_s20  ;;  %s4920_s20 = smov %s4289_s10 }
 0x310   : > { %s4921_s21 = smov %s4279_s6  ;;  %22 = sbr.rel (!%p20_p7) target bundleno = 7 (0x7), region = 97 }
 0x315   :  { %3106 = vsyncpa [#allocation3], 1 }
 0x316   :  { %3108 = vsyncpa [#allocation3 + $0x1], 1 }
 0x317   :  { %3109 = vsyncpa [#allocation6], 1 }
 0x318   :  { %3110 = vsyncpa [#allocation9], 1 }
 0x319   :  { %3111 = vsyncpa [#allocation4], 1 }
 0x31a   :  { %3113 = vsyncpa [#allocation4 + $0x1], 1 }

</bundles_post_ra>
